<compile_context>
chip_gen: v7x
topology: tpu7x:2x2x1
jax: 0.10.0
libtpu: 0.0.40
codegen_flags: <defaults>
</compile_context>

<pallas_src>
import functools

import numpy as np

import jax
import jax.numpy as jnp
from jax.experimental import pallas as pl
from jax.experimental.pallas import tpu as pltpu


# -----------------------------------------------------------------------------
# Fused kernel: all flows in one pass.
#   x_ref    : (tm, dim)            f32
#   W1_ref   : (n_flows, dim, 2nh)  bf16     b1_ref  : (n_flows, 1, 2nh)  f32
#   W2_ref   : (n_flows, 2nh, 2nh)  bf16     b2_ref  : (n_flows, 1, 2nh)  f32
#   W3s_ref  : (n_flows, 2nh, dim)  bf16     b3s_ref : (n_flows, 1, dim)  f32
#   W3t_ref  : (n_flows, 2nh, dim)  bf16     b3t_ref : (n_flows, 1, dim)  f32
#   P_ref    : (n_flows, dim, dim)  0/1 permutation matrices (phys -> abstract)
#   out_refs : n_flows x (tm, dim) z outputs (PyTorch column order), (tm, 1) log_det
# -----------------------------------------------------------------------------
def _fused_flow_kernel(x_ref, W1_ref, b1_ref, W2_ref, b2_ref,
                       W3s_ref, b3s_ref, W3t_ref, b3t_ref, P_ref,
                       *out_refs):
    *zs_refs, ld_ref = out_refs
    n_flows = W1_ref.shape[0]
    mm_dt = W1_ref.dtype          # bf16 matmul inputs, f32 accumulation
    p_dt = P_ref.dtype

    x = x_ref[...].astype(jnp.float32)
    log_det = jnp.zeros((x.shape[0], 1), dtype=jnp.float32)

    # Static unroll over flows: flows stay resident on-chip.
    # TODO(synk): if n_flows ever grows large enough to show vreg spills in the
    # bundle dump, switch this to lax.fori_loop with dynamic W*_ref[i] indexing.
    for i in range(n_flows):
        xb = x.astype(mm_dt)
        h = jnp.dot(xb, W1_ref[i], preferred_element_type=jnp.float32) + b1_ref[i]
        h = jnp.where(h > 0, h, 0.2 * h)                        # LeakyReLU(0.2)
        h = jnp.dot(h.astype(mm_dt), W2_ref[i],
                    preferred_element_type=jnp.float32) + b2_ref[i]
        h = jnp.where(h > 0, h, 0.2 * h)
        hb = h.astype(mm_dt)

        # Two independent scatter-dots (no mid-vreg st[:, :dim]/st[:, dim:] slice).
        s = jnp.dot(hb, W3s_ref[i], preferred_element_type=jnp.float32) + b3s_ref[i]
        t = jnp.dot(hb, W3t_ref[i], preferred_element_type=jnp.float32) + b3t_ref[i]

        # s/t are exactly 0 at pass-through (conditioner) columns, so
        # exp(0)*x + 0 keeps them bit-exact in the f32 carried state.
        x = jnp.exp(s) * x + t
        log_det = log_det + jnp.sum(s, axis=1, keepdims=True)

        # Store this flow's z directly in the PyTorch (abstract) column order:
        # one tiny (tm,dim)x(dim,dim) permutation dot on an idle MXU slot
        # replaces the old post-kernel un-permute gather (an extra HBM pass).
        z_abs = jnp.dot(x.astype(p_dt), P_ref[i],
                        preferred_element_type=jnp.float32)
        zs_refs[i][...] = z_abs.astype(zs_refs[i].dtype)

    ld_ref[...] = log_det                                       # stored once


# -----------------------------------------------------------------------------
# Trace-time fusion of the per-flow parameters.
#
# The AffineHalfFlow split x0 = x[:, ::2], x1 = x[:, 1::2] and the final
# concat([z0, z1]) are pure column permutations.  We track the physical ->
# abstract column permutation in numpy and absorb it into zero-padded /
# scattered weight matrices, plus a 0/1 permutation matrix P per flow that maps
# the physical carried state to that flow's abstract output order.
# -----------------------------------------------------------------------------
def _build_fused_params(flow_params, dim, *, w_dtype=jnp.bfloat16,
                        p_dtype=jnp.bfloat16):
    n_flows = len(flow_params)
    d2 = dim // 2
    nh = flow_params[0]["sW1"].shape[1]

    perm = np.arange(dim)      # perm[p] = abstract column currently at physical p
    W1s, b1s, W2s, b2s = [], [], [], []
    W3ss, b3ss, W3ts, b3ts, Ps = [], [], [], [], []

    for i, p in enumerate(flow_params):
        parity = i % 2
        even = np.arange(0, dim, 2)
        odd = np.arange(1, dim, 2)
        cond_abs, trans_abs = (odd, even) if parity else (even, odd)

        inv = np.argsort(perm)               # abstract -> physical
        pos_cond = inv[cond_abs]             # physical positions of MLP inputs
        pos_trans = inv[trans_abs]           # physical positions of transformed cols

        # Layer 1: conditioner-column gather absorbed into zero-padded rows,
        # s / t nets concatenated along the output axis.
        # TODO(synk): for very large dim (dim/2 >= 128) feed only the dim/2
        # conditioner columns instead of zero-padding to dim rows.
        W1_cat = jnp.concatenate([p["sW1"], p["tW1"]], axis=1)            # (d2, 2nh)
        W1_big = jnp.zeros((dim, 2 * nh), jnp.float32).at[pos_cond].set(W1_cat)
        b1_cat = jnp.concatenate([p["sb1"], p["tb1"]], axis=1)            # (1, 2nh)

        # Layer 2: block-diagonal keeps s / t networks independent.
        # TODO(synk): for nh >= 128 split back into two nh x nh dots to avoid
        # doubling MXU MAC work on the zero off-diagonal blocks.
        W2_big = (jnp.zeros((2 * nh, 2 * nh), jnp.float32)
                  .at[:nh, :nh].set(p["sW2"])
                  .at[nh:, nh:].set(p["tW2"]))
        b2_cat = jnp.concatenate([p["sb2"], p["tb2"]], axis=1)            # (1, 2nh)

        # Layer 3: scatter s / t outputs to the physical columns they transform.
        W3s_big = jnp.zeros((2 * nh, dim), jnp.float32).at[:nh, pos_trans].set(p["sW3"])
        W3t_big = jnp.zeros((2 * nh, dim), jnp.float32).at[nh:, pos_trans].set(p["tW3"])
        b3s_big = jnp.zeros((1, dim), jnp.float32).at[:, pos_trans].set(p["sb3"])
        b3t_big = jnp.zeros((1, dim), jnp.float32).at[:, pos_trans].set(p["tb3"])

        W1s.append(W1_big); b1s.append(b1_cat)
        W2s.append(W2_big); b2s.append(b2_cat)
        W3ss.append(W3s_big); b3ss.append(b3s_big)
        W3ts.append(W3t_big); b3ts.append(b3t_big)

        # New physical -> abstract mapping after z = cat([z0, z1], dim=1).
        new_perm = np.empty(dim, dtype=np.int64)
        for k in range(d2):
            if parity:
                new_perm[pos_trans[k]] = k
                new_perm[pos_cond[k]] = d2 + k
            else:
                new_perm[pos_cond[k]] = k
                new_perm[pos_trans[k]] = d2 + k
        perm = new_perm

        # Permutation matrix: z_abstract = x_physical @ P (0/1, exact in bf16).
        inv_out = np.argsort(perm)
        P = np.zeros((dim, dim), np.float32)
        P[inv_out, np.arange(dim)] = 1.0
        Ps.append(jnp.asarray(P))

    def stack(lst, dt):
        return jnp.stack(lst).astype(dt)

    return (stack(W1s, w_dtype), stack(b1s, jnp.float32),
            stack(W2s, w_dtype), stack(b2s, jnp.float32),
            stack(W3ss, w_dtype), stack(b3ss, jnp.float32),
            stack(W3ts, w_dtype), stack(b3ts, jnp.float32),
            stack(Ps, p_dtype))


# -----------------------------------------------------------------------------
# NormalizingFlow forward
# -----------------------------------------------------------------------------
def normalizing_flow_forward(x, flow_params, *, block_m=512,
                             zs_dtype=jnp.bfloat16,
                             single_buffer_weights=True):
    m, dim = x.shape
    n_flows = len(flow_params)
    nh = flow_params[0]["sW1"].shape[1]

    p_dtype = jnp.bfloat16 if zs_dtype == jnp.bfloat16 else jnp.float32
    weights = _build_fused_params(flow_params, dim,
                                  w_dtype=jnp.bfloat16, p_dtype=p_dtype)

    # Batch tiling: large tiles amortize the ~0.35us per-grid-step overhead;
    # force >= 2 grid steps when possible so v7x's two TensorCores both work.
    tm = min(block_m, m)
    if m == tm and m >= 16:
        tm = max(8, (((m + 1) // 2) + 7) // 8 * 8)
    grid = (pl.cdiv(m, tm),)

    # Explicit VMEM budget: x tile + per-flow z tiles + log_det are
    # double-buffered by the pipeline; weight stacks are resident
    # (single-buffered when supported).  Clamp to ~75% of physical VMEM
    # (128 MiB on v5e/v6e, 64 MiB on v7x).
    try:
        vmem_cap = int(pltpu.get_tpu_info().vmem_capacity_bytes)
    except Exception:
        vmem_cap = 64 * 1024 * 1024
    weight_bytes = sum(int(np.prod(w.shape)) * w.dtype.itemsize for w in weights)
    zs_itemsize = 2 if zs_dtype == jnp.bfloat16 else 4
    io_bytes = 2 * tm * dim * 4 + 2 * (n_flows * tm * dim * zs_itemsize + tm * 4)
    act_bytes = 6 * tm * max(2 * nh, dim) * 4          # activation / spill headroom
    need = weight_bytes * (1 if single_buffer_weights else 2) + io_bytes + act_bytes
    vmem_limit = int(min(max(32 << 20, 2 * need), int(0.75 * vmem_cap)))

    def const_spec(shape):
        nd = len(shape)
        if single_buffer_weights:
            # Constant index_map -> weights stay resident across grid steps;
            # double-buffering them only wastes VMEM (worst on v7x's 64 MiB).
            return pl.BlockSpec(shape, lambda i: (0,) * nd,
                                pipeline_mode=pl.Buffered(1))
        return pl.BlockSpec(shape, lambda i: (0,) * nd)

    in_specs = [pl.BlockSpec((tm, dim), lambda i: (i, 0))]
    in_specs += [const_spec(tuple(w.shape)) for w in weights]

    # Each flow's z is its own output (written in PyTorch column order in-kernel),
    # so no post-kernel un-permute / slicing pass touches HBM at all.
    # For dim >= 128 each z store is lane-dense; for tiny dim the narrow store is
    # the minimum traffic the per-flow output list can have.
    out_shape = tuple(jax.ShapeDtypeStruct((m, dim), zs_dtype)
                      for _ in range(n_flows))
    out_shape += (jax.ShapeDtypeStruct((m, 1), jnp.float32),)
    out_specs = tuple(pl.BlockSpec((tm, dim), lambda i: (i, 0))
                      for _ in range(n_flows))
    out_specs += (pl.BlockSpec((tm, 1), lambda i: (i, 0)),)

    outs = pl.pallas_call(
        _fused_flow_kernel,
        out_shape=out_shape,
        grid=grid,
        in_specs=in_specs,
        out_specs=out_specs,
        compiler_params=pltpu.CompilerParams(
            dimension_semantics=("parallel",),
            vmem_limit_bytes=vmem_limit),
    )(x, *weights)

    zs = [x] + list(outs[:-1])
    log_det = outs[-1][:, 0]
    return zs, log_det


# -----------------------------------------------------------------------------
# Pure-JAX reference (matches nflib AffineHalfFlow / MLP).  bf16_matmuls=True
# mirrors the kernel's matmul precision for a tighter check.
# -----------------------------------------------------------------------------
def _mlp_ref(x, W1, b1, W2, b2, W3, b3, cast):
    def c(v):
        return v.astype(jnp.bfloat16) if cast else v
    h = jnp.dot(c(x), c(W1), preferred_element_type=jnp.float32) + b1
    h = jnp.where(h > 0, h, 0.2 * h)
    h = jnp.dot(c(h), c(W2), preferred_element_type=jnp.float32) + b2
    h = jnp.where(h > 0, h, 0.2 * h)
    return jnp.dot(c(h), c(W3), preferred_element_type=jnp.float32) + b3


def normalizing_flow_forward_ref(x, flow_params, *, bf16_matmuls=False):
    m, _ = x.shape
    log_det = jnp.zeros((m,), dtype=jnp.float32)
    zs = [x]
    for i, p in enumerate(flow_params):
        parity = i % 2
        x0, x1 = x[:, ::2], x[:, 1::2]
        if parity:
            x0, x1 = x1, x0
        s = _mlp_ref(x0, p["sW1"], p["sb1"], p["sW2"], p["sb2"],
                     p["sW3"], p["sb3"], bf16_matmuls)
        t = _mlp_ref(x0, p["tW1"], p["tb1"], p["tW2"], p["tb2"],
                     p["tW3"], p["tb3"], bf16_matmuls)
        z0 = x0
        z1 = jnp.exp(s) * x1 + t
        if parity:
            z0, z1 = z1, z0
        x = jnp.concatenate([z0, z1], axis=1)
        log_det = log_det + jnp.sum(s, axis=1)
        zs.append(x)
    return zs, log_det


# -----------------------------------------------------------------------------
# Deterministic parameter init (same layout as the per-flow PyTorch params)
# -----------------------------------------------------------------------------
def init_flow_params(key, n_flows, dim, nh):
    d2 = dim // 2
    params = []
    for _ in range(n_flows):
        p = {}
        for net in ("s", "t"):
            shapes = {
                "W1": (d2, nh), "b1": (1, nh),
                "W2": (nh, nh), "b2": (1, nh),
                "W3": (nh, d2), "b3": (1, d2),
            }
            for name, shp in shapes.items():
                key, sub = jax.random.split(key)
                p[net + name] = (0.1 * jax.random.normal(sub, shp)).astype(jnp.float32)
        params.append(p)
    return params


if __name__ == "__main__":
    key = jax.random.PRNGKey(0)
    m, dim, nh, n_flows = 8, 8, 32, 4

    key, kx = jax.random.split(key)
    x = jax.random.normal(kx, (m, dim), dtype=jnp.float32)
    flow_params = init_flow_params(key, n_flows, dim, nh)

    fwd = jax.jit(functools.partial(normalizing_flow_forward,
                                    single_buffer_weights=True))
    try:
        zs, log_det = fwd(x, flow_params)
        jax.block_until_ready(log_det)
    except Exception:
        # Fallback if this JAX build rejects single-buffered (Buffered(1)) specs.
        fwd = jax.jit(functools.partial(normalizing_flow_forward,
                                        single_buffer_weights=False))
        zs, log_det = fwd(x, flow_params)
    jax.block_until_ready(zs[-1])
    jax.block_until_ready(log_det)

    # Reference 1: same matmul precision as the kernel (bf16 inputs, f32 accum).
    zs_b, ld_b = normalizing_flow_forward_ref(x, flow_params, bf16_matmuls=True)
    # Reference 2: full-f32 semantics (PyTorch parity), coarse sanity bound.
    zs_f, ld_f = normalizing_flow_forward_ref(x, flow_params, bf16_matmuls=False)

    assert len(zs) == n_flows + 1
    assert jnp.array_equal(zs[0], x)
    for i in range(1, n_flows + 1):
        zk = zs[i].astype(jnp.float32)
        zb = zs_b[i].astype(jnp.bfloat16).astype(jnp.float32)
        assert zk.shape == (m, dim)
        assert jnp.allclose(zk, zb, atol=2e-2, rtol=2e-2), (
            i, float(jnp.max(jnp.abs(zk - zb))))
        assert float(jnp.max(jnp.abs(zk - zs_f[i]))) < 5e-2
    assert log_det.shape == (m,)
    assert jnp.allclose(log_det, ld_b, atol=2e-2, rtol=2e-2)
    assert float(jnp.max(jnp.abs(log_det - ld_f))) < 5e-2

    print("KERNEL_OK")
</pallas_src>

<mosaic_0001>
module attributes {stable_mosaic.version = 11 : i64} {
  func.func @_fused_flow_kernel(%arg0: i32, %arg1: memref<8x8xf32, #tpu.memory_space<vmem>>, %arg2: memref<4x8x64xbf16, #tpu.memory_space<vmem>>, %arg3: memref<4x1x64xf32, #tpu.memory_space<vmem>>, %arg4: memref<4x64x64xbf16, #tpu.memory_space<vmem>>, %arg5: memref<4x1x64xf32, #tpu.memory_space<vmem>>, %arg6: memref<4x64x8xbf16, #tpu.memory_space<vmem>>, %arg7: memref<4x1x8xf32, #tpu.memory_space<vmem>>, %arg8: memref<4x64x8xbf16, #tpu.memory_space<vmem>>, %arg9: memref<4x1x8xf32, #tpu.memory_space<vmem>>, %arg10: memref<4x8x8xbf16, #tpu.memory_space<vmem>>, %arg11: memref<8x8xbf16, #tpu.memory_space<vmem>>, %arg12: memref<8x8xbf16, #tpu.memory_space<vmem>>, %arg13: memref<8x8xbf16, #tpu.memory_space<vmem>>, %arg14: memref<8x8xbf16, #tpu.memory_space<vmem>>, %arg15: memref<8x1xf32, #tpu.memory_space<vmem>>) attributes {dimension_semantics = [#tpu.dimension_semantics<parallel>], iteration_bounds = array<i64: 1>, scalar_prefetch = 0 : i64, scratch_operands = 0 : i64, tpu.core_type = #tpu.core_type<tc>, window_params = [{transform_indices = @transform_0, window_bounds = array<i64: 8, 8>}, {pipeline_mode = #tpu.pipeline_mode<synchronous>, transform_indices = @transform_1, window_bounds = array<i64: 4, 8, 64>}, {pipeline_mode = #tpu.pipeline_mode<synchronous>, transform_indices = @transform_2, window_bounds = array<i64: 4, 1, 64>}, {pipeline_mode = #tpu.pipeline_mode<synchronous>, transform_indices = @transform_3, window_bounds = array<i64: 4, 64, 64>}, {pipeline_mode = #tpu.pipeline_mode<synchronous>, transform_indices = @transform_4, window_bounds = array<i64: 4, 1, 64>}, {pipeline_mode = #tpu.pipeline_mode<synchronous>, transform_indices = @transform_5, window_bounds = array<i64: 4, 64, 8>}, {pipeline_mode = #tpu.pipeline_mode<synchronous>, transform_indices = @transform_6, window_bounds = array<i64: 4, 1, 8>}, {pipeline_mode = #tpu.pipeline_mode<synchronous>, transform_indices = @transform_7, window_bounds = array<i64: 4, 64, 8>}, {pipeline_mode = #tpu.pipeline_mode<synchronous>, transform_indices = @transform_8, window_bounds = array<i64: 4, 1, 8>}, {pipeline_mode = #tpu.pipeline_mode<synchronous>, transform_indices = @transform_9, window_bounds = array<i64: 4, 8, 8>}, {transform_indices = @transform_10, window_bounds = array<i64: 8, 8>}, {transform_indices = @transform_11, window_bounds = array<i64: 8, 8>}, {transform_indices = @transform_12, window_bounds = array<i64: 8, 8>}, {transform_indices = @transform_13, window_bounds = array<i64: 8, 8>}, {transform_indices = @transform_14, window_bounds = array<i64: 8, 1>}]} {
    %c0 = arith.constant 0 : index
    %c0_0 = arith.constant 0 : index
    %0 = vector.load %arg1[%c0, %c0_0] : memref<8x8xf32, #tpu.memory_space<vmem>>, vector<8x8xf32>
    %cst = arith.constant 0.000000e+00 : f32
    %1 = vector.broadcast %cst : f32 to vector<8x1xf32>
    %2 = arith.truncf %0 : vector<8x8xf32> to vector<8x8xbf16>
    %c0_1 = arith.constant 0 : index
    %c0_2 = arith.constant 0 : index
    %c0_3 = arith.constant 0 : index
    %3 = vector.load %arg2[%c0_1, %c0_2, %c0_3] : memref<4x8x64xbf16, #tpu.memory_space<vmem>>, vector<1x8x64xbf16>
    %4 = vector.shape_cast %3 : vector<1x8x64xbf16> to vector<8x64xbf16>
    %cst_4 = arith.constant dense<0.000000e+00> : vector<8x64xf32>
    %5 = tpu.matmul %2, %4, %cst_4 {dimension_numbers = #tpu.dot_dimension_numbers<[1], [0], [0], [1], [0, 0, 1, 1], [], []>} : vector<8x8xbf16>, vector<8x64xbf16>, vector<8x64xf32> -> vector<8x64xf32>
    %c0_5 = arith.constant 0 : index
    %c0_6 = arith.constant 0 : index
    %c0_7 = arith.constant 0 : index
    %6 = vector.load %arg3[%c0_5, %c0_6, %c0_7] : memref<4x1x64xf32, #tpu.memory_space<vmem>>, vector<1x1x64xf32>
    %7 = vector.shape_cast %6 : vector<1x1x64xf32> to vector<1x64xf32>
    %8 = vector.broadcast %7 : vector<1x64xf32> to vector<8x64xf32>
    %9 = arith.addf %5, %8 : vector<8x64xf32>
    %cst_8 = arith.constant 0.000000e+00 : f32
    %10 = vector.broadcast %cst_8 : f32 to vector<8x64xf32>
    %11 = arith.cmpf ogt, %9, %10 : vector<8x64xf32>
    %cst_9 = arith.constant 2.000000e-01 : f32
    %12 = vector.broadcast %cst_9 : f32 to vector<8x64xf32>
    %13 = arith.mulf %12, %9 : vector<8x64xf32>
    %14 = arith.select %11, %9, %13 : vector<8x64xi1>, vector<8x64xf32>
    %15 = arith.truncf %14 : vector<8x64xf32> to vector<8x64xbf16>
    %c0_10 = arith.constant 0 : index
    %c0_11 = arith.constant 0 : index
    %c0_12 = arith.constant 0 : index
    %16 = vector.load %arg4[%c0_10, %c0_11, %c0_12] : memref<4x64x64xbf16, #tpu.memory_space<vmem>>, vector<1x64x64xbf16>
    %17 = vector.shape_cast %16 : vector<1x64x64xbf16> to vector<64x64xbf16>
    %cst_13 = arith.constant dense<0.000000e+00> : vector<8x64xf32>
    %18 = tpu.matmul %15, %17, %cst_13 {dimension_numbers = #tpu.dot_dimension_numbers<[1], [0], [0], [1], [0, 0, 1, 1], [], []>} : vector<8x64xbf16>, vector<64x64xbf16>, vector<8x64xf32> -> vector<8x64xf32>
    %c0_14 = arith.constant 0 : index
    %c0_15 = arith.constant 0 : index
    %c0_16 = arith.constant 0 : index
    %19 = vector.load %arg5[%c0_14, %c0_15, %c0_16] : memref<4x1x64xf32, #tpu.memory_space<vmem>>, vector<1x1x64xf32>
    %20 = vector.shape_cast %19 : vector<1x1x64xf32> to vector<1x64xf32>
    %21 = vector.broadcast %20 : vector<1x64xf32> to vector<8x64xf32>
    %22 = arith.addf %18, %21 : vector<8x64xf32>
    %cst_17 = arith.constant 0.000000e+00 : f32
    %23 = vector.broadcast %cst_17 : f32 to vector<8x64xf32>
    %24 = arith.cmpf ogt, %22, %23 : vector<8x64xf32>
    %cst_18 = arith.constant 2.000000e-01 : f32
    %25 = vector.broadcast %cst_18 : f32 to vector<8x64xf32>
    %26 = arith.mulf %25, %22 : vector<8x64xf32>
    %27 = arith.select %24, %22, %26 : vector<8x64xi1>, vector<8x64xf32>
    %28 = arith.truncf %27 : vector<8x64xf32> to vector<8x64xbf16>
    %c0_19 = arith.constant 0 : index
    %c0_20 = arith.constant 0 : index
    %c0_21 = arith.constant 0 : index
    %29 = vector.load %arg6[%c0_19, %c0_20, %c0_21] : memref<4x64x8xbf16, #tpu.memory_space<vmem>>, vector<1x64x8xbf16>
    %30 = vector.shape_cast %29 : vector<1x64x8xbf16> to vector<64x8xbf16>
    %cst_22 = arith.constant dense<0.000000e+00> : vector<8x8xf32>
    %31 = tpu.matmul %28, %30, %cst_22 {dimension_numbers = #tpu.dot_dimension_numbers<[1], [0], [0], [1], [0, 0, 1, 1], [], []>} : vector<8x64xbf16>, vector<64x8xbf16>, vector<8x8xf32> -> vector<8x8xf32>
    %c0_23 = arith.constant 0 : index
    %c0_24 = arith.constant 0 : index
    %c0_25 = arith.constant 0 : index
    %32 = vector.load %arg7[%c0_23, %c0_24, %c0_25] : memref<4x1x8xf32, #tpu.memory_space<vmem>>, vector<1x1x8xf32>
    %33 = vector.shape_cast %32 : vector<1x1x8xf32> to vector<1x8xf32>
    %34 = vector.broadcast %33 : vector<1x8xf32> to vector<8x8xf32>
    %35 = arith.addf %31, %34 : vector<8x8xf32>
    %c0_26 = arith.constant 0 : index
    %c0_27 = arith.constant 0 : index
    %c0_28 = arith.constant 0 : index
    %36 = vector.load %arg8[%c0_26, %c0_27, %c0_28] : memref<4x64x8xbf16, #tpu.memory_space<vmem>>, vector<1x64x8xbf16>
    %37 = vector.shape_cast %36 : vector<1x64x8xbf16> to vector<64x8xbf16>
    %cst_29 = arith.constant dense<0.000000e+00> : vector<8x8xf32>
    %38 = tpu.matmul %28, %37, %cst_29 {dimension_numbers = #tpu.dot_dimension_numbers<[1], [0], [0], [1], [0, 0, 1, 1], [], []>} : vector<8x64xbf16>, vector<64x8xbf16>, vector<8x8xf32> -> vector<8x8xf32>
    %c0_30 = arith.constant 0 : index
    %c0_31 = arith.constant 0 : index
    %c0_32 = arith.constant 0 : index
    %39 = vector.load %arg9[%c0_30, %c0_31, %c0_32] : memref<4x1x8xf32, #tpu.memory_space<vmem>>, vector<1x1x8xf32>
    %40 = vector.shape_cast %39 : vector<1x1x8xf32> to vector<1x8xf32>
    %41 = vector.broadcast %40 : vector<1x8xf32> to vector<8x8xf32>
    %42 = arith.addf %38, %41 : vector<8x8xf32>
    %43 = math.exp %35 : vector<8x8xf32>
    %44 = arith.mulf %43, %0 : vector<8x8xf32>
    %45 = arith.addf %44, %42 : vector<8x8xf32>
    %cst_33 = arith.constant dense<0.000000e+00> : vector<8xf32>
    %46 = vector.multi_reduction <add>, %35, %cst_33 [1] : vector<8x8xf32> to vector<8xf32>
    %47 = vector.shape_cast %46 : vector<8xf32> to vector<8x1xf32>
    %48 = arith.addf %1, %47 : vector<8x1xf32>
    %49 = arith.truncf %45 : vector<8x8xf32> to vector<8x8xbf16>
    %c0_34 = arith.constant 0 : index
    %c0_35 = arith.constant 0 : index
    %c0_36 = arith.constant 0 : index
    %50 = vector.load %arg10[%c0_34, %c0_35, %c0_36] : memref<4x8x8xbf16, #tpu.memory_space<vmem>>, vector<1x8x8xbf16>
    %51 = vector.shape_cast %50 : vector<1x8x8xbf16> to vector<8x8xbf16>
    %cst_37 = arith.constant dense<0.000000e+00> : vector<8x8xf32>
    %52 = tpu.matmul %49, %51, %cst_37 {dimension_numbers = #tpu.dot_dimension_numbers<[1], [0], [0], [1], [0, 0, 1, 1], [], []>} : vector<8x8xbf16>, vector<8x8xbf16>, vector<8x8xf32> -> vector<8x8xf32>
    %53 = arith.truncf %52 : vector<8x8xf32> to vector<8x8xbf16>
    %c0_38 = arith.constant 0 : index
    %c0_39 = arith.constant 0 : index
    %54 = vector.load %arg11[%c0_38, %c0_39] : memref<8x8xbf16, #tpu.memory_space<vmem>>, vector<8x8xbf16>
    tpu.vector_store %arg11[%c0_38, %c0_39], %53 {strides = array<i32>} : memref<8x8xbf16, #tpu.memory_space<vmem>>, vector<8x8xbf16>,
    %55 = arith.truncf %45 : vector<8x8xf32> to vector<8x8xbf16>
    %c1 = arith.constant 1 : index
    %c0_40 = arith.constant 0 : index
    %c0_41 = arith.constant 0 : index
    %56 = vector.load %arg2[%c1, %c0_40, %c0_41] : memref<4x8x64xbf16, #tpu.memory_space<vmem>>, vector<1x8x64xbf16>
    %57 = vector.shape_cast %56 : vector<1x8x64xbf16> to vector<8x64xbf16>
    %cst_42 = arith.constant dense<0.000000e+00> : vector<8x64xf32>
    %58 = tpu.matmul %55, %57, %cst_42 {dimension_numbers = #tpu.dot_dimension_numbers<[1], [0], [0], [1], [0, 0, 1, 1], [], []>} : vector<8x8xbf16>, vector<8x64xbf16>, vector<8x64xf32> -> vector<8x64xf32>
    %c1_43 = arith.constant 1 : index
    %c0_44 = arith.constant 0 : index
    %c0_45 = arith.constant 0 : index
    %59 = vector.load %arg3[%c1_43, %c0_44, %c0_45] : memref<4x1x64xf32, #tpu.memory_space<vmem>>, vector<1x1x64xf32>
    %60 = vector.shape_cast %59 : vector<1x1x64xf32> to vector<1x64xf32>
    %61 = vector.broadcast %60 : vector<1x64xf32> to vector<8x64xf32>
    %62 = arith.addf %58, %61 : vector<8x64xf32>
    %cst_46 = arith.constant 0.000000e+00 : f32
    %63 = vector.broadcast %cst_46 : f32 to vector<8x64xf32>
    %64 = arith.cmpf ogt, %62, %63 : vector<8x64xf32>
    %cst_47 = arith.constant 2.000000e-01 : f32
    %65 = vector.broadcast %cst_47 : f32 to vector<8x64xf32>
    %66 = arith.mulf %65, %62 : vector<8x64xf32>
    %67 = arith.select %64, %62, %66 : vector<8x64xi1>, vector<8x64xf32>
    %68 = arith.truncf %67 : vector<8x64xf32> to vector<8x64xbf16>
    %c1_48 = arith.constant 1 : index
    %c0_49 = arith.constant 0 : index
    %c0_50 = arith.constant 0 : index
    %69 = vector.load %arg4[%c1_48, %c0_49, %c0_50] : memref<4x64x64xbf16, #tpu.memory_space<vmem>>, vector<1x64x64xbf16>
    %70 = vector.shape_cast %69 : vector<1x64x64xbf16> to vector<64x64xbf16>
    %cst_51 = arith.constant dense<0.000000e+00> : vector<8x64xf32>
    %71 = tpu.matmul %68, %70, %cst_51 {dimension_numbers = #tpu.dot_dimension_numbers<[1], [0], [0], [1], [0, 0, 1, 1], [], []>} : vector<8x64xbf16>, vector<64x64xbf16>, vector<8x64xf32> -> vector<8x64xf32>
    %c1_52 = arith.constant 1 : index
    %c0_53 = arith.constant 0 : index
    %c0_54 = arith.constant 0 : index
    %72 = vector.load %arg5[%c1_52, %c0_53, %c0_54] : memref<4x1x64xf32, #tpu.memory_space<vmem>>, vector<1x1x64xf32>
    %73 = vector.shape_cast %72 : vector<1x1x64xf32> to vector<1x64xf32>
    %74 = vector.broadcast %73 : vector<1x64xf32> to vector<8x64xf32>
    %75 = arith.addf %71, %74 : vector<8x64xf32>
    %cst_55 = arith.constant 0.000000e+00 : f32
    %76 = vector.broadcast %cst_55 : f32 to vector<8x64xf32>
    %77 = arith.cmpf ogt, %75, %76 : vector<8x64xf32>
    %cst_56 = arith.constant 2.000000e-01 : f32
    %78 = vector.broadcast %cst_56 : f32 to vector<8x64xf32>
    %79 = arith.mulf %78, %75 : vector<8x64xf32>
    %80 = arith.select %77, %75, %79 : vector<8x64xi1>, vector<8x64xf32>
    %81 = arith.truncf %80 : vector<8x64xf32> to vector<8x64xbf16>
    %c1_57 = arith.constant 1 : index
    %c0_58 = arith.constant 0 : index
    %c0_59 = arith.constant 0 : index
    %82 = vector.load %arg6[%c1_57, %c0_58, %c0_59] : memref<4x64x8xbf16, #tpu.memory_space<vmem>>, vector<1x64x8xbf16>
    %83 = vector.shape_cast %82 : vector<1x64x8xbf16> to vector<64x8xbf16>
    %cst_60 = arith.constant dense<0.000000e+00> : vector<8x8xf32>
    %84 = tpu.matmul %81, %83, %cst_60 {dimension_numbers = #tpu.dot_dimension_numbers<[1], [0], [0], [1], [0, 0, 1, 1], [], []>} : vector<8x64xbf16>, vector<64x8xbf16>, vector<8x8xf32> -> vector<8x8xf32>
    %c1_61 = arith.constant 1 : index
    %c0_62 = arith.constant 0 : index
    %c0_63 = arith.constant 0 : index
    %85 = vector.load %arg7[%c1_61, %c0_62, %c0_63] : memref<4x1x8xf32, #tpu.memory_space<vmem>>, vector<1x1x8xf32>
    %86 = vector.shape_cast %85 : vector<1x1x8xf32> to vector<1x8xf32>
    %87 = vector.broadcast %86 : vector<1x8xf32> to vector<8x8xf32>
    %88 = arith.addf %84, %87 : vector<8x8xf32>
    %c1_64 = arith.constant 1 : index
    %c0_65 = arith.constant 0 : index
    %c0_66 = arith.constant 0 : index
    %89 = vector.load %arg8[%c1_64, %c0_65, %c0_66] : memref<4x64x8xbf16, #tpu.memory_space<vmem>>, vector<1x64x8xbf16>
    %90 = vector.shape_cast %89 : vector<1x64x8xbf16> to vector<64x8xbf16>
    %cst_67 = arith.constant dense<0.000000e+00> : vector<8x8xf32>
    %91 = tpu.matmul %81, %90, %cst_67 {dimension_numbers = #tpu.dot_dimension_numbers<[1], [0], [0], [1], [0, 0, 1, 1], [], []>} : vector<8x64xbf16>, vector<64x8xbf16>, vector<8x8xf32> -> vector<8x8xf32>
    %c1_68 = arith.constant 1 : index
    %c0_69 = arith.constant 0 : index
    %c0_70 = arith.constant 0 : index
    %92 = vector.load %arg9[%c1_68, %c0_69, %c0_70] : memref<4x1x8xf32, #tpu.memory_space<vmem>>, vector<1x1x8xf32>
    %93 = vector.shape_cast %92 : vector<1x1x8xf32> to vector<1x8xf32>
    %94 = vector.broadcast %93 : vector<1x8xf32> to vector<8x8xf32>
    %95 = arith.addf %91, %94 : vector<8x8xf32>
    %96 = math.exp %88 : vector<8x8xf32>
    %97 = arith.mulf %96, %45 : vector<8x8xf32>
    %98 = arith.addf %97, %95 : vector<8x8xf32>
    %cst_71 = arith.constant dense<0.000000e+00> : vector<8xf32>
    %99 = vector.multi_reduction <add>, %88, %cst_71 [1] : vector<8x8xf32> to vector<8xf32>
    %100 = vector.shape_cast %99 : vector<8xf32> to vector<8x1xf32>
    %101 = arith.addf %48, %100 : vector<8x1xf32>
    %102 = arith.truncf %98 : vector<8x8xf32> to vector<8x8xbf16>
    %c1_72 = arith.constant 1 : index
    %c0_73 = arith.constant 0 : index
    %c0_74 = arith.constant 0 : index
    %103 = vector.load %arg10[%c1_72, %c0_73, %c0_74] : memref<4x8x8xbf16, #tpu.memory_space<vmem>>, vector<1x8x8xbf16>
    %104 = vector.shape_cast %103 : vector<1x8x8xbf16> to vector<8x8xbf16>
    %cst_75 = arith.constant dense<0.000000e+00> : vector<8x8xf32>
    %105 = tpu.matmul %102, %104, %cst_75 {dimension_numbers = #tpu.dot_dimension_numbers<[1], [0], [0], [1], [0, 0, 1, 1], [], []>} : vector<8x8xbf16>, vector<8x8xbf16>, vector<8x8xf32> -> vector<8x8xf32>
    %106 = arith.truncf %105 : vector<8x8xf32> to vector<8x8xbf16>
    %c0_76 = arith.constant 0 : index
    %c0_77 = arith.constant 0 : index
    %107 = vector.load %arg12[%c0_76, %c0_77] : memref<8x8xbf16, #tpu.memory_space<vmem>>, vector<8x8xbf16>
    tpu.vector_store %arg12[%c0_76, %c0_77], %106 {strides = array<i32>} : memref<8x8xbf16, #tpu.memory_space<vmem>>, vector<8x8xbf16>,
    %108 = arith.truncf %98 : vector<8x8xf32> to vector<8x8xbf16>
    %c2 = arith.constant 2 : index
    %c0_78 = arith.constant 0 : index
    %c0_79 = arith.constant 0 : index
    %109 = vector.load %arg2[%c2, %c0_78, %c0_79] : memref<4x8x64xbf16, #tpu.memory_space<vmem>>, vector<1x8x64xbf16>
    %110 = vector.shape_cast %109 : vector<1x8x64xbf16> to vector<8x64xbf16>
    %cst_80 = arith.constant dense<0.000000e+00> : vector<8x64xf32>
    %111 = tpu.matmul %108, %110, %cst_80 {dimension_numbers = #tpu.dot_dimension_numbers<[1], [0], [0], [1], [0, 0, 1, 1], [], []>} : vector<8x8xbf16>, vector<8x64xbf16>, vector<8x64xf32> -> vector<8x64xf32>
    %c2_81 = arith.constant 2 : index
    %c0_82 = arith.constant 0 : index
    %c0_83 = arith.constant 0 : index
    %112 = vector.load %arg3[%c2_81, %c0_82, %c0_83] : memref<4x1x64xf32, #tpu.memory_space<vmem>>, vector<1x1x64xf32>
    %113 = vector.shape_cast %112 : vector<1x1x64xf32> to vector<1x64xf32>
    %114 = vector.broadcast %113 : vector<1x64xf32> to vector<8x64xf32>
    %115 = arith.addf %111, %114 : vector<8x64xf32>
    %cst_84 = arith.constant 0.000000e+00 : f32
    %116 = vector.broadcast %cst_84 : f32 to vector<8x64xf32>
    %117 = arith.cmpf ogt, %115, %116 : vector<8x64xf32>
    %cst_85 = arith.constant 2.000000e-01 : f32
    %118 = vector.broadcast %cst_85 : f32 to vector<8x64xf32>
    %119 = arith.mulf %118, %115 : vector<8x64xf32>
    %120 = arith.select %117, %115, %119 : vector<8x64xi1>, vector<8x64xf32>
    %121 = arith.truncf %120 : vector<8x64xf32> to vector<8x64xbf16>
    %c2_86 = arith.constant 2 : index
    %c0_87 = arith.constant 0 : index
    %c0_88 = arith.constant 0 : index
    %122 = vector.load %arg4[%c2_86, %c0_87, %c0_88] : memref<4x64x64xbf16, #tpu.memory_space<vmem>>, vector<1x64x64xbf16>
    %123 = vector.shape_cast %122 : vector<1x64x64xbf16> to vector<64x64xbf16>
    %cst_89 = arith.constant dense<0.000000e+00> : vector<8x64xf32>
    %124 = tpu.matmul %121, %123, %cst_89 {dimension_numbers = #tpu.dot_dimension_numbers<[1], [0], [0], [1], [0, 0, 1, 1], [], []>} : vector<8x64xbf16>, vector<64x64xbf16>, vector<8x64xf32> -> vector<8x64xf32>
    %c2_90 = arith.constant 2 : index
    %c0_91 = arith.constant 0 : index
    %c0_92 = arith.constant 0 : index
    %125 = vector.load %arg5[%c2_90, %c0_91, %c0_92] : memref<4x1x64xf32, #tpu.memory_space<vmem>>, vector<1x1x64xf32>
    %126 = vector.shape_cast %125 : vector<1x1x64xf32> to vector<1x64xf32>
    %127 = vector.broadcast %126 : vector<1x64xf32> to vector<8x64xf32>
    %128 = arith.addf %124, %127 : vector<8x64xf32>
    %cst_93 = arith.constant 0.000000e+00 : f32
    %129 = vector.broadcast %cst_93 : f32 to vector<8x64xf32>
    %130 = arith.cmpf ogt, %128, %129 : vector<8x64xf32>
    %cst_94 = arith.constant 2.000000e-01 : f32
    %131 = vector.broadcast %cst_94 : f32 to vector<8x64xf32>
    %132 = arith.mulf %131, %128 : vector<8x64xf32>
    %133 = arith.select %130, %128, %132 : vector<8x64xi1>, vector<8x64xf32>
    %134 = arith.truncf %133 : vector<8x64xf32> to vector<8x64xbf16>
    %c2_95 = arith.constant 2 : index
    %c0_96 = arith.constant 0 : index
    %c0_97 = arith.constant 0 : index
    %135 = vector.load %arg6[%c2_95, %c0_96, %c0_97] : memref<4x64x8xbf16, #tpu.memory_space<vmem>>, vector<1x64x8xbf16>
    %136 = vector.shape_cast %135 : vector<1x64x8xbf16> to vector<64x8xbf16>
    %cst_98 = arith.constant dense<0.000000e+00> : vector<8x8xf32>
    %137 = tpu.matmul %134, %136, %cst_98 {dimension_numbers = #tpu.dot_dimension_numbers<[1], [0], [0], [1], [0, 0, 1, 1], [], []>} : vector<8x64xbf16>, vector<64x8xbf16>, vector<8x8xf32> -> vector<8x8xf32>
    %c2_99 = arith.constant 2 : index
    %c0_100 = arith.constant 0 : index
    %c0_101 = arith.constant 0 : index
    %138 = vector.load %arg7[%c2_99, %c0_100, %c0_101] : memref<4x1x8xf32, #tpu.memory_space<vmem>>, vector<1x1x8xf32>
    %139 = vector.shape_cast %138 : vector<1x1x8xf32> to vector<1x8xf32>
    %140 = vector.broadcast %139 : vector<1x8xf32> to vector<8x8xf32>
    %141 = arith.addf %137, %140 : vector<8x8xf32>
    %c2_102 = arith.constant 2 : index
    %c0_103 = arith.constant 0 : index
    %c0_104 = arith.constant 0 : index
    %142 = vector.load %arg8[%c2_102, %c0_103, %c0_104] : memref<4x64x8xbf16, #tpu.memory_space<vmem>>, vector<1x64x8xbf16>
    %143 = vector.shape_cast %142 : vector<1x64x8xbf16> to vector<64x8xbf16>
    %cst_105 = arith.constant dense<0.000000e+00> : vector<8x8xf32>
    %144 = tpu.matmul %134, %143, %cst_105 {dimension_numbers = #tpu.dot_dimension_numbers<[1], [0], [0], [1], [0, 0, 1, 1], [], []>} : vector<8x64xbf16>, vector<64x8xbf16>, vector<8x8xf32> -> vector<8x8xf32>
    %c2_106 = arith.constant 2 : index
    %c0_107 = arith.constant 0 : index
    %c0_108 = arith.constant 0 : index
    %145 = vector.load %arg9[%c2_106, %c0_107, %c0_108] : memref<4x1x8xf32, #tpu.memory_space<vmem>>, vector<1x1x8xf32>
    %146 = vector.shape_cast %145 : vector<1x1x8xf32> to vector<1x8xf32>
    %147 = vector.broadcast %146 : vector<1x8xf32> to vector<8x8xf32>
    %148 = arith.addf %144, %147 : vector<8x8xf32>
    %149 = math.exp %141 : vector<8x8xf32>
    %150 = arith.mulf %149, %98 : vector<8x8xf32>
    %151 = arith.addf %150, %148 : vector<8x8xf32>
    %cst_109 = arith.constant dense<0.000000e+00> : vector<8xf32>
    %152 = vector.multi_reduction <add>, %141, %cst_109 [1] : vector<8x8xf32> to vector<8xf32>
    %153 = vector.shape_cast %152 : vector<8xf32> to vector<8x1xf32>
    %154 = arith.addf %101, %153 : vector<8x1xf32>
    %155 = arith.truncf %151 : vector<8x8xf32> to vector<8x8xbf16>
    %c2_110 = arith.constant 2 : index
    %c0_111 = arith.constant 0 : index
    %c0_112 = arith.constant 0 : index
    %156 = vector.load %arg10[%c2_110, %c0_111, %c0_112] : memref<4x8x8xbf16, #tpu.memory_space<vmem>>, vector<1x8x8xbf16>
    %157 = vector.shape_cast %156 : vector<1x8x8xbf16> to vector<8x8xbf16>
    %cst_113 = arith.constant dense<0.000000e+00> : vector<8x8xf32>
    %158 = tpu.matmul %155, %157, %cst_113 {dimension_numbers = #tpu.dot_dimension_numbers<[1], [0], [0], [1], [0, 0, 1, 1], [], []>} : vector<8x8xbf16>, vector<8x8xbf16>, vector<8x8xf32> -> vector<8x8xf32>
    %159 = arith.truncf %158 : vector<8x8xf32> to vector<8x8xbf16>
    %c0_114 = arith.constant 0 : index
    %c0_115 = arith.constant 0 : index
    %160 = vector.load %arg13[%c0_114, %c0_115] : memref<8x8xbf16, #tpu.memory_space<vmem>>, vector<8x8xbf16>
    tpu.vector_store %arg13[%c0_114, %c0_115], %159 {strides = array<i32>} : memref<8x8xbf16, #tpu.memory_space<vmem>>, vector<8x8xbf16>,
    %161 = arith.truncf %151 : vector<8x8xf32> to vector<8x8xbf16>
    %c3 = arith.constant 3 : index
    %c0_116 = arith.constant 0 : index
    %c0_117 = arith.constant 0 : index
    %162 = vector.load %arg2[%c3, %c0_116, %c0_117] : memref<4x8x64xbf16, #tpu.memory_space<vmem>>, vector<1x8x64xbf16>
    %163 = vector.shape_cast %162 : vector<1x8x64xbf16> to vector<8x64xbf16>
    %cst_118 = arith.constant dense<0.000000e+00> : vector<8x64xf32>
    %164 = tpu.matmul %161, %163, %cst_118 {dimension_numbers = #tpu.dot_dimension_numbers<[1], [0], [0], [1], [0, 0, 1, 1], [], []>} : vector<8x8xbf16>, vector<8x64xbf16>, vector<8x64xf32> -> vector<8x64xf32>
    %c3_119 = arith.constant 3 : index
    %c0_120 = arith.constant 0 : index
    %c0_121 = arith.constant 0 : index
    %165 = vector.load %arg3[%c3_119, %c0_120, %c0_121] : memref<4x1x64xf32, #tpu.memory_space<vmem>>, vector<1x1x64xf32>
    %166 = vector.shape_cast %165 : vector<1x1x64xf32> to vector<1x64xf32>
    %167 = vector.broadcast %166 : vector<1x64xf32> to vector<8x64xf32>
    %168 = arith.addf %164, %167 : vector<8x64xf32>
    %cst_122 = arith.constant 0.000000e+00 : f32
    %169 = vector.broadcast %cst_122 : f32 to vector<8x64xf32>
    %170 = arith.cmpf ogt, %168, %169 : vector<8x64xf32>
    %cst_123 = arith.constant 2.000000e-01 : f32
    %171 = vector.broadcast %cst_123 : f32 to vector<8x64xf32>
    %172 = arith.mulf %171, %168 : vector<8x64xf32>
    %173 = arith.select %170, %168, %172 : vector<8x64xi1>, vector<8x64xf32>
    %174 = arith.truncf %173 : vector<8x64xf32> to vector<8x64xbf16>
    %c3_124 = arith.constant 3 : index
    %c0_125 = arith.constant 0 : index
    %c0_126 = arith.constant 0 : index
    %175 = vector.load %arg4[%c3_124, %c0_125, %c0_126] : memref<4x64x64xbf16, #tpu.memory_space<vmem>>, vector<1x64x64xbf16>
    %176 = vector.shape_cast %175 : vector<1x64x64xbf16> to vector<64x64xbf16>
    %cst_127 = arith.constant dense<0.000000e+00> : vector<8x64xf32>
    %177 = tpu.matmul %174, %176, %cst_127 {dimension_numbers = #tpu.dot_dimension_numbers<[1], [0], [0], [1], [0, 0, 1, 1], [], []>} : vector<8x64xbf16>, vector<64x64xbf16>, vector<8x64xf32> -> vector<8x64xf32>
    %c3_128 = arith.constant 3 : index
    %c0_129 = arith.constant 0 : index
    %c0_130 = arith.constant 0 : index
    %178 = vector.load %arg5[%c3_128, %c0_129, %c0_130] : memref<4x1x64xf32, #tpu.memory_space<vmem>>, vector<1x1x64xf32>
    %179 = vector.shape_cast %178 : vector<1x1x64xf32> to vector<1x64xf32>
    %180 = vector.broadcast %179 : vector<1x64xf32> to vector<8x64xf32>
    %181 = arith.addf %177, %180 : vector<8x64xf32>
    %cst_131 = arith.constant 0.000000e+00 : f32
    %182 = vector.broadcast %cst_131 : f32 to vector<8x64xf32>
    %183 = arith.cmpf ogt, %181, %182 : vector<8x64xf32>
    %cst_132 = arith.constant 2.000000e-01 : f32
    %184 = vector.broadcast %cst_132 : f32 to vector<8x64xf32>
    %185 = arith.mulf %184, %181 : vector<8x64xf32>
    %186 = arith.select %183, %181, %185 : vector<8x64xi1>, vector<8x64xf32>
    %187 = arith.truncf %186 : vector<8x64xf32> to vector<8x64xbf16>
    %c3_133 = arith.constant 3 : index
    %c0_134 = arith.constant 0 : index
    %c0_135 = arith.constant 0 : index
    %188 = vector.load %arg6[%c3_133, %c0_134, %c0_135] : memref<4x64x8xbf16, #tpu.memory_space<vmem>>, vector<1x64x8xbf16>
    %189 = vector.shape_cast %188 : vector<1x64x8xbf16> to vector<64x8xbf16>
    %cst_136 = arith.constant dense<0.000000e+00> : vector<8x8xf32>
    %190 = tpu.matmul %187, %189, %cst_136 {dimension_numbers = #tpu.dot_dimension_numbers<[1], [0], [0], [1], [0, 0, 1, 1], [], []>} : vector<8x64xbf16>, vector<64x8xbf16>, vector<8x8xf32> -> vector<8x8xf32>
    %c3_137 = arith.constant 3 : index
    %c0_138 = arith.constant 0 : index
    %c0_139 = arith.constant 0 : index
    %191 = vector.load %arg7[%c3_137, %c0_138, %c0_139] : memref<4x1x8xf32, #tpu.memory_space<vmem>>, vector<1x1x8xf32>
    %192 = vector.shape_cast %191 : vector<1x1x8xf32> to vector<1x8xf32>
    %193 = vector.broadcast %192 : vector<1x8xf32> to vector<8x8xf32>
    %194 = arith.addf %190, %193 : vector<8x8xf32>
    %c3_140 = arith.constant 3 : index
    %c0_141 = arith.constant 0 : index
    %c0_142 = arith.constant 0 : index
    %195 = vector.load %arg8[%c3_140, %c0_141, %c0_142] : memref<4x64x8xbf16, #tpu.memory_space<vmem>>, vector<1x64x8xbf16>
    %196 = vector.shape_cast %195 : vector<1x64x8xbf16> to vector<64x8xbf16>
    %cst_143 = arith.constant dense<0.000000e+00> : vector<8x8xf32>
    %197 = tpu.matmul %187, %196, %cst_143 {dimension_numbers = #tpu.dot_dimension_numbers<[1], [0], [0], [1], [0, 0, 1, 1], [], []>} : vector<8x64xbf16>, vector<64x8xbf16>, vector<8x8xf32> -> vector<8x8xf32>
    %c3_144 = arith.constant 3 : index
    %c0_145 = arith.constant 0 : index
    %c0_146 = arith.constant 0 : index
    %198 = vector.load %arg9[%c3_144, %c0_145, %c0_146] : memref<4x1x8xf32, #tpu.memory_space<vmem>>, vector<1x1x8xf32>
    %199 = vector.shape_cast %198 : vector<1x1x8xf32> to vector<1x8xf32>
    %200 = vector.broadcast %199 : vector<1x8xf32> to vector<8x8xf32>
    %201 = arith.addf %197, %200 : vector<8x8xf32>
    %202 = math.exp %194 : vector<8x8xf32>
    %203 = arith.mulf %202, %151 : vector<8x8xf32>
    %204 = arith.addf %203, %201 : vector<8x8xf32>
    %cst_147 = arith.constant dense<0.000000e+00> : vector<8xf32>
    %205 = vector.multi_reduction <add>, %194, %cst_147 [1] : vector<8x8xf32> to vector<8xf32>
    %206 = vector.shape_cast %205 : vector<8xf32> to vector<8x1xf32>
    %207 = arith.addf %154, %206 : vector<8x1xf32>
    %208 = arith.truncf %204 : vector<8x8xf32> to vector<8x8xbf16>
    %c3_148 = arith.constant 3 : index
    %c0_149 = arith.constant 0 : index
    %c0_150 = arith.constant 0 : index
    %209 = vector.load %arg10[%c3_148, %c0_149, %c0_150] : memref<4x8x8xbf16, #tpu.memory_space<vmem>>, vector<1x8x8xbf16>
    %210 = vector.shape_cast %209 : vector<1x8x8xbf16> to vector<8x8xbf16>
    %cst_151 = arith.constant dense<0.000000e+00> : vector<8x8xf32>
    %211 = tpu.matmul %208, %210, %cst_151 {dimension_numbers = #tpu.dot_dimension_numbers<[1], [0], [0], [1], [0, 0, 1, 1], [], []>} : vector<8x8xbf16>, vector<8x8xbf16>, vector<8x8xf32> -> vector<8x8xf32>
    %212 = arith.truncf %211 : vector<8x8xf32> to vector<8x8xbf16>
    %c0_152 = arith.constant 0 : index
    %c0_153 = arith.constant 0 : index
    %213 = vector.load %arg14[%c0_152, %c0_153] : memref<8x8xbf16, #tpu.memory_space<vmem>>, vector<8x8xbf16>
    tpu.vector_store %arg14[%c0_152, %c0_153], %212 {strides = array<i32>} : memref<8x8xbf16, #tpu.memory_space<vmem>>, vector<8x8xbf16>,
    %c0_154 = arith.constant 0 : index
    %c0_155 = arith.constant 0 : index
    %214 = vector.load %arg15[%c0_154, %c0_155] : memref<8x1xf32, #tpu.memory_space<vmem>>, vector<8x1xf32>
    tpu.vector_store %arg15[%c0_154, %c0_155], %207 {strides = array<i32>} : memref<8x1xf32, #tpu.memory_space<vmem>>, vector<8x1xf32>,
    return
  }
  func.func @transform_0(%arg0: i32) -> (i32, i32) {
    %c0_i32 = arith.constant 0 : i32
    %c0_i32_0 = arith.constant 0 : i32
    return %arg0, %c0_i32 : i32, i32
  }
  func.func @transform_1(%arg0: i32) -> (i32, i32, i32) {
    %c0_i32 = arith.constant 0 : i32
    %c0_i32_0 = arith.constant 0 : i32
    %c0_i32_1 = arith.constant 0 : i32
    %c0_i32_2 = arith.constant 0 : i32
    return %c0_i32, %c0_i32_0, %c0_i32_1 : i32, i32, i32
  }
  func.func @transform_2(%arg0: i32) -> (i32, i32, i32) {
    %c0_i32 = arith.constant 0 : i32
    %c0_i32_0 = arith.constant 0 : i32
    %c0_i32_1 = arith.constant 0 : i32
    %c0_i32_2 = arith.constant 0 : i32
    return %c0_i32, %c0_i32_0, %c0_i32_1 : i32, i32, i32
  }
  func.func @transform_3(%arg0: i32) -> (i32, i32, i32) {
    %c0_i32 = arith.constant 0 : i32
    %c0_i32_0 = arith.constant 0 : i32
    %c0_i32_1 = arith.constant 0 : i32
    %c0_i32_2 = arith.constant 0 : i32
    return %c0_i32, %c0_i32_0, %c0_i32_1 : i32, i32, i32
  }
  func.func @transform_4(%arg0: i32) -> (i32, i32, i32) {
    %c0_i32 = arith.constant 0 : i32
    %c0_i32_0 = arith.constant 0 : i32
    %c0_i32_1 = arith.constant 0 : i32
    %c0_i32_2 = arith.constant 0 : i32
    return %c0_i32, %c0_i32_0, %c0_i32_1 : i32, i32, i32
  }
  func.func @transform_5(%arg0: i32) -> (i32, i32, i32) {
    %c0_i32 = arith.constant 0 : i32
    %c0_i32_0 = arith.constant 0 : i32
    %c0_i32_1 = arith.constant 0 : i32
    %c0_i32_2 = arith.constant 0 : i32
    return %c0_i32, %c0_i32_0, %c0_i32_1 : i32, i32, i32
  }
  func.func @transform_6(%arg0: i32) -> (i32, i32, i32) {
    %c0_i32 = arith.constant 0 : i32
    %c0_i32_0 = arith.constant 0 : i32
    %c0_i32_1 = arith.constant 0 : i32
    %c0_i32_2 = arith.constant 0 : i32
    return %c0_i32, %c0_i32_0, %c0_i32_1 : i32, i32, i32
  }
  func.func @transform_7(%arg0: i32) -> (i32, i32, i32) {
    %c0_i32 = arith.constant 0 : i32
    %c0_i32_0 = arith.constant 0 : i32
    %c0_i32_1 = arith.constant 0 : i32
    %c0_i32_2 = arith.constant 0 : i32
    return %c0_i32, %c0_i32_0, %c0_i32_1 : i32, i32, i32
  }
  func.func @transform_8(%arg0: i32) -> (i32, i32, i32) {
    %c0_i32 = arith.constant 0 : i32
    %c0_i32_0 = arith.constant 0 : i32
    %c0_i32_1 = arith.constant 0 : i32
    %c0_i32_2 = arith.constant 0 : i32
    return %c0_i32, %c0_i32_0, %c0_i32_1 : i32, i32, i32
  }
  func.func @transform_9(%arg0: i32) -> (i32, i32, i32) {
    %c0_i32 = arith.constant 0 : i32
    %c0_i32_0 = arith.constant 0 : i32
    %c0_i32_1 = arith.constant 0 : i32
    %c0_i32_2 = arith.constant 0 : i32
    return %c0_i32, %c0_i32_0, %c0_i32_1 : i32, i32, i32
  }
  func.func @transform_10(%arg0: i32) -> (i32, i32) {
    %c0_i32 = arith.constant 0 : i32
    %c0_i32_0 = arith.constant 0 : i32
    return %arg0, %c0_i32 : i32, i32
  }
  func.func @transform_11(%arg0: i32) -> (i32, i32) {
    %c0_i32 = arith.constant 0 : i32
    %c0_i32_0 = arith.constant 0 : i32
    return %arg0, %c0_i32 : i32, i32
  }
  func.func @transform_12(%arg0: i32) -> (i32, i32) {
    %c0_i32 = arith.constant 0 : i32
    %c0_i32_0 = arith.constant 0 : i32
    return %arg0, %c0_i32 : i32, i32
  }
  func.func @transform_13(%arg0: i32) -> (i32, i32) {
    %c0_i32 = arith.constant 0 : i32
    %c0_i32_0 = arith.constant 0 : i32
    return %arg0, %c0_i32 : i32, i32
  }
  func.func @transform_14(%arg0: i32) -> (i32, i32) {
    %c0_i32 = arith.constant 0 : i32
    %c0_i32_0 = arith.constant 0 : i32
    return %arg0, %c0_i32 : i32, i32
  }
}

module attributes {stable_mosaic.version = 11 : i64} {
  func.func @_fused_flow_kernel(%arg0: i32, %arg1: memref<8x8xf32, #tpu.memory_space<vmem>>, %arg2: memref<4x8x64xbf16, #tpu.memory_space<vmem>>, %arg3: memref<4x1x64xf32, #tpu.memory_space<vmem>>, %arg4: memref<4x64x64xbf16, #tpu.memory_space<vmem>>, %arg5: memref<4x1x64xf32, #tpu.memory_space<vmem>>, %arg6: memref<4x64x8xbf16, #tpu.memory_space<vmem>>, %arg7: memref<4x1x8xf32, #tpu.memory_space<vmem>>, %arg8: memref<4x64x8xbf16, #tpu.memory_space<vmem>>, %arg9: memref<4x1x8xf32, #tpu.memory_space<vmem>>, %arg10: memref<4x8x8xbf16, #tpu.memory_space<vmem>>, %arg11: memref<8x8xbf16, #tpu.memory_space<vmem>>, %arg12: memref<8x8xbf16, #tpu.memory_space<vmem>>, %arg13: memref<8x8xbf16, #tpu.memory_space<vmem>>, %arg14: memref<8x8xbf16, #tpu.memory_space<vmem>>, %arg15: memref<8x1xf32, #tpu.memory_space<vmem>>) attributes {dimension_semantics = [#tpu.dimension_semantics<parallel>], iteration_bounds = array<i64: 1>, scalar_prefetch = 0 : i64, scratch_operands = 0 : i64, tpu.core_type = #tpu.core_type<tc>, window_params = [{transform_indices = @transform_0, window_bounds = array<i64: 8, 8>}, {pipeline_mode = #tpu.pipeline_mode<synchronous>, transform_indices = @transform_1, window_bounds = array<i64: 4, 8, 64>}, {pipeline_mode = #tpu.pipeline_mode<synchronous>, transform_indices = @transform_2, window_bounds = array<i64: 4, 1, 64>}, {pipeline_mode = #tpu.pipeline_mode<synchronous>, transform_indices = @transform_3, window_bounds = array<i64: 4, 64, 64>}, {pipeline_mode = #tpu.pipeline_mode<synchronous>, transform_indices = @transform_4, window_bounds = array<i64: 4, 1, 64>}, {pipeline_mode = #tpu.pipeline_mode<synchronous>, transform_indices = @transform_5, window_bounds = array<i64: 4, 64, 8>}, {pipeline_mode = #tpu.pipeline_mode<synchronous>, transform_indices = @transform_6, window_bounds = array<i64: 4, 1, 8>}, {pipeline_mode = #tpu.pipeline_mode<synchronous>, transform_indices = @transform_7, window_bounds = array<i64: 4, 64, 8>}, {pipeline_mode = #tpu.pipeline_mode<synchronous>, transform_indices = @transform_8, window_bounds = array<i64: 4, 1, 8>}, {pipeline_mode = #tpu.pipeline_mode<synchronous>, transform_indices = @transform_9, window_bounds = array<i64: 4, 8, 8>}, {transform_indices = @transform_10, window_bounds = array<i64: 8, 8>}, {transform_indices = @transform_11, window_bounds = array<i64: 8, 8>}, {transform_indices = @transform_12, window_bounds = array<i64: 8, 8>}, {transform_indices = @transform_13, window_bounds = array<i64: 8, 8>}, {transform_indices = @transform_14, window_bounds = array<i64: 8, 1>}]} {
    %c0 = arith.constant 0 : index
    %c0_0 = arith.constant 0 : index
    %0 = vector.load %arg1[%c0, %c0_0] : memref<8x8xf32, #tpu.memory_space<vmem>>, vector<8x8xf32>
    %cst = arith.constant 0.000000e+00 : f32
    %1 = vector.broadcast %cst : f32 to vector<8x1xf32>
    %2 = arith.truncf %0 : vector<8x8xf32> to vector<8x8xbf16>
    %c0_1 = arith.constant 0 : index
    %c0_2 = arith.constant 0 : index
    %c0_3 = arith.constant 0 : index
    %3 = vector.load %arg2[%c0_1, %c0_2, %c0_3] : memref<4x8x64xbf16, #tpu.memory_space<vmem>>, vector<1x8x64xbf16>
    %4 = vector.shape_cast %3 : vector<1x8x64xbf16> to vector<8x64xbf16>
    %cst_4 = arith.constant dense<0.000000e+00> : vector<8x64xf32>
    %5 = tpu.matmul %2, %4, %cst_4 {dimension_numbers = #tpu.dot_dimension_numbers<[1], [0], [0], [1], [0, 0, 1, 1], [], []>} : vector<8x8xbf16>, vector<8x64xbf16>, vector<8x64xf32> -> vector<8x64xf32>
    %c0_5 = arith.constant 0 : index
    %c0_6 = arith.constant 0 : index
    %c0_7 = arith.constant 0 : index
    %6 = vector.load %arg3[%c0_5, %c0_6, %c0_7] : memref<4x1x64xf32, #tpu.memory_space<vmem>>, vector<1x1x64xf32>
    %7 = vector.shape_cast %6 : vector<1x1x64xf32> to vector<1x64xf32>
    %8 = vector.broadcast %7 : vector<1x64xf32> to vector<8x64xf32>
    %9 = arith.addf %5, %8 : vector<8x64xf32>
    %cst_8 = arith.constant 0.000000e+00 : f32
    %10 = vector.broadcast %cst_8 : f32 to vector<8x64xf32>
    %11 = arith.cmpf ogt, %9, %10 : vector<8x64xf32>
    %cst_9 = arith.constant 2.000000e-01 : f32
    %12 = vector.broadcast %cst_9 : f32 to vector<8x64xf32>
    %13 = arith.mulf %12, %9 : vector<8x64xf32>
    %14 = arith.select %11, %9, %13 : vector<8x64xi1>, vector<8x64xf32>
    %15 = arith.truncf %14 : vector<8x64xf32> to vector<8x64xbf16>
    %c0_10 = arith.constant 0 : index
    %c0_11 = arith.constant 0 : index
    %c0_12 = arith.constant 0 : index
    %16 = vector.load %arg4[%c0_10, %c0_11, %c0_12] : memref<4x64x64xbf16, #tpu.memory_space<vmem>>, vector<1x64x64xbf16>
    %17 = vector.shape_cast %16 : vector<1x64x64xbf16> to vector<64x64xbf16>
    %cst_13 = arith.constant dense<0.000000e+00> : vector<8x64xf32>
    %18 = tpu.matmul %15, %17, %cst_13 {dimension_numbers = #tpu.dot_dimension_numbers<[1], [0], [0], [1], [0, 0, 1, 1], [], []>} : vector<8x64xbf16>, vector<64x64xbf16>, vector<8x64xf32> -> vector<8x64xf32>
    %c0_14 = arith.constant 0 : index
    %c0_15 = arith.constant 0 : index
    %c0_16 = arith.constant 0 : index
    %19 = vector.load %arg5[%c0_14, %c0_15, %c0_16] : memref<4x1x64xf32, #tpu.memory_space<vmem>>, vector<1x1x64xf32>
    %20 = vector.shape_cast %19 : vector<1x1x64xf32> to vector<1x64xf32>
    %21 = vector.broadcast %20 : vector<1x64xf32> to vector<8x64xf32>
    %22 = arith.addf %18, %21 : vector<8x64xf32>
    %cst_17 = arith.constant 0.000000e+00 : f32
    %23 = vector.broadcast %cst_17 : f32 to vector<8x64xf32>
    %24 = arith.cmpf ogt, %22, %23 : vector<8x64xf32>
    %cst_18 = arith.constant 2.000000e-01 : f32
    %25 = vector.broadcast %cst_18 : f32 to vector<8x64xf32>
    %26 = arith.mulf %25, %22 : vector<8x64xf32>
    %27 = arith.select %24, %22, %26 : vector<8x64xi1>, vector<8x64xf32>
    %28 = arith.truncf %27 : vector<8x64xf32> to vector<8x64xbf16>
    %c0_19 = arith.constant 0 : index
    %c0_20 = arith.constant 0 : index
    %c0_21 = arith.constant 0 : index
    %29 = vector.load %arg6[%c0_19, %c0_20, %c0_21] : memref<4x64x8xbf16, #tpu.memory_space<vmem>>, vector<1x64x8xbf16>
    %30 = vector.shape_cast %29 : vector<1x64x8xbf16> to vector<64x8xbf16>
    %cst_22 = arith.constant dense<0.000000e+00> : vector<8x8xf32>
    %31 = tpu.matmul %28, %30, %cst_22 {dimension_numbers = #tpu.dot_dimension_numbers<[1], [0], [0], [1], [0, 0, 1, 1], [], []>} : vector<8x64xbf16>, vector<64x8xbf16>, vector<8x8xf32> -> vector<8x8xf32>
    %c0_23 = arith.constant 0 : index
    %c0_24 = arith.constant 0 : index
    %c0_25 = arith.constant 0 : index
    %32 = vector.load %arg7[%c0_23, %c0_24, %c0_25] : memref<4x1x8xf32, #tpu.memory_space<vmem>>, vector<1x1x8xf32>
    %33 = vector.shape_cast %32 : vector<1x1x8xf32> to vector<1x8xf32>
    %34 = vector.broadcast %33 : vector<1x8xf32> to vector<8x8xf32>
    %35 = arith.addf %31, %34 : vector<8x8xf32>
    %c0_26 = arith.constant 0 : index
    %c0_27 = arith.constant 0 : index
    %c0_28 = arith.constant 0 : index
    %36 = vector.load %arg8[%c0_26, %c0_27, %c0_28] : memref<4x64x8xbf16, #tpu.memory_space<vmem>>, vector<1x64x8xbf16>
    %37 = vector.shape_cast %36 : vector<1x64x8xbf16> to vector<64x8xbf16>
    %cst_29 = arith.constant dense<0.000000e+00> : vector<8x8xf32>
    %38 = tpu.matmul %28, %37, %cst_29 {dimension_numbers = #tpu.dot_dimension_numbers<[1], [0], [0], [1], [0, 0, 1, 1], [], []>} : vector<8x64xbf16>, vector<64x8xbf16>, vector<8x8xf32> -> vector<8x8xf32>
    %c0_30 = arith.constant 0 : index
    %c0_31 = arith.constant 0 : index
    %c0_32 = arith.constant 0 : index
    %39 = vector.load %arg9[%c0_30, %c0_31, %c0_32] : memref<4x1x8xf32, #tpu.memory_space<vmem>>, vector<1x1x8xf32>
    %40 = vector.shape_cast %39 : vector<1x1x8xf32> to vector<1x8xf32>
    %41 = vector.broadcast %40 : vector<1x8xf32> to vector<8x8xf32>
    %42 = arith.addf %38, %41 : vector<8x8xf32>
    %43 = math.exp %35 : vector<8x8xf32>
    %44 = arith.mulf %43, %0 : vector<8x8xf32>
    %45 = arith.addf %44, %42 : vector<8x8xf32>
    %cst_33 = arith.constant dense<0.000000e+00> : vector<8xf32>
    %46 = vector.multi_reduction <add>, %35, %cst_33 [1] : vector<8x8xf32> to vector<8xf32>
    %47 = vector.shape_cast %46 : vector<8xf32> to vector<8x1xf32>
    %48 = arith.addf %1, %47 : vector<8x1xf32>
    %49 = arith.truncf %45 : vector<8x8xf32> to vector<8x8xbf16>
    %c0_34 = arith.constant 0 : index
    %c0_35 = arith.constant 0 : index
    %c0_36 = arith.constant 0 : index
    %50 = vector.load %arg10[%c0_34, %c0_35, %c0_36] : memref<4x8x8xbf16, #tpu.memory_space<vmem>>, vector<1x8x8xbf16>
    %51 = vector.shape_cast %50 : vector<1x8x8xbf16> to vector<8x8xbf16>
    %cst_37 = arith.constant dense<0.000000e+00> : vector<8x8xf32>
    %52 = tpu.matmul %49, %51, %cst_37 {dimension_numbers = #tpu.dot_dimension_numbers<[1], [0], [0], [1], [0, 0, 1, 1], [], []>} : vector<8x8xbf16>, vector<8x8xbf16>, vector<8x8xf32> -> vector<8x8xf32>
    %53 = arith.truncf %52 : vector<8x8xf32> to vector<8x8xbf16>
    %c0_38 = arith.constant 0 : index
    %c0_39 = arith.constant 0 : index
    %54 = vector.load %arg11[%c0_38, %c0_39] : memref<8x8xbf16, #tpu.memory_space<vmem>>, vector<8x8xbf16>
    tpu.vector_store %arg11[%c0_38, %c0_39], %53 {strides = array<i32>} : memref<8x8xbf16, #tpu.memory_space<vmem>>, vector<8x8xbf16>,
    %55 = arith.truncf %45 : vector<8x8xf32> to vector<8x8xbf16>
    %c1 = arith.constant 1 : index
    %c0_40 = arith.constant 0 : index
    %c0_41 = arith.constant 0 : index
    %56 = vector.load %arg2[%c1, %c0_40, %c0_41] : memref<4x8x64xbf16, #tpu.memory_space<vmem>>, vector<1x8x64xbf16>
    %57 = vector.shape_cast %56 : vector<1x8x64xbf16> to vector<8x64xbf16>
    %cst_42 = arith.constant dense<0.000000e+00> : vector<8x64xf32>
    %58 = tpu.matmul %55, %57, %cst_42 {dimension_numbers = #tpu.dot_dimension_numbers<[1], [0], [0], [1], [0, 0, 1, 1], [], []>} : vector<8x8xbf16>, vector<8x64xbf16>, vector<8x64xf32> -> vector<8x64xf32>
    %c1_43 = arith.constant 1 : index
    %c0_44 = arith.constant 0 : index
    %c0_45 = arith.constant 0 : index
    %59 = vector.load %arg3[%c1_43, %c0_44, %c0_45] : memref<4x1x64xf32, #tpu.memory_space<vmem>>, vector<1x1x64xf32>
    %60 = vector.shape_cast %59 : vector<1x1x64xf32> to vector<1x64xf32>
    %61 = vector.broadcast %60 : vector<1x64xf32> to vector<8x64xf32>
    %62 = arith.addf %58, %61 : vector<8x64xf32>
    %cst_46 = arith.constant 0.000000e+00 : f32
    %63 = vector.broadcast %cst_46 : f32 to vector<8x64xf32>
    %64 = arith.cmpf ogt, %62, %63 : vector<8x64xf32>
    %cst_47 = arith.constant 2.000000e-01 : f32
    %65 = vector.broadcast %cst_47 : f32 to vector<8x64xf32>
    %66 = arith.mulf %65, %62 : vector<8x64xf32>
    %67 = arith.select %64, %62, %66 : vector<8x64xi1>, vector<8x64xf32>
    %68 = arith.truncf %67 : vector<8x64xf32> to vector<8x64xbf16>
    %c1_48 = arith.constant 1 : index
    %c0_49 = arith.constant 0 : index
    %c0_50 = arith.constant 0 : index
    %69 = vector.load %arg4[%c1_48, %c0_49, %c0_50] : memref<4x64x64xbf16, #tpu.memory_space<vmem>>, vector<1x64x64xbf16>
    %70 = vector.shape_cast %69 : vector<1x64x64xbf16> to vector<64x64xbf16>
    %cst_51 = arith.constant dense<0.000000e+00> : vector<8x64xf32>
    %71 = tpu.matmul %68, %70, %cst_51 {dimension_numbers = #tpu.dot_dimension_numbers<[1], [0], [0], [1], [0, 0, 1, 1], [], []>} : vector<8x64xbf16>, vector<64x64xbf16>, vector<8x64xf32> -> vector<8x64xf32>
    %c1_52 = arith.constant 1 : index
    %c0_53 = arith.constant 0 : index
    %c0_54 = arith.constant 0 : index
    %72 = vector.load %arg5[%c1_52, %c0_53, %c0_54] : memref<4x1x64xf32, #tpu.memory_space<vmem>>, vector<1x1x64xf32>
    %73 = vector.shape_cast %72 : vector<1x1x64xf32> to vector<1x64xf32>
    %74 = vector.broadcast %73 : vector<1x64xf32> to vector<8x64xf32>
    %75 = arith.addf %71, %74 : vector<8x64xf32>
    %cst_55 = arith.constant 0.000000e+00 : f32
    %76 = vector.broadcast %cst_55 : f32 to vector<8x64xf32>
    %77 = arith.cmpf ogt, %75, %76 : vector<8x64xf32>
    %cst_56 = arith.constant 2.000000e-01 : f32
    %78 = vector.broadcast %cst_56 : f32 to vector<8x64xf32>
    %79 = arith.mulf %78, %75 : vector<8x64xf32>
    %80 = arith.select %77, %75, %79 : vector<8x64xi1>, vector<8x64xf32>
    %81 = arith.truncf %80 : vector<8x64xf32> to vector<8x64xbf16>
    %c1_57 = arith.constant 1 : index
    %c0_58 = arith.constant 0 : index
    %c0_59 = arith.constant 0 : index
    %82 = vector.load %arg6[%c1_57, %c0_58, %c0_59] : memref<4x64x8xbf16, #tpu.memory_space<vmem>>, vector<1x64x8xbf16>
    %83 = vector.shape_cast %82 : vector<1x64x8xbf16> to vector<64x8xbf16>
    %cst_60 = arith.constant dense<0.000000e+00> : vector<8x8xf32>
    %84 = tpu.matmul %81, %83, %cst_60 {dimension_numbers = #tpu.dot_dimension_numbers<[1], [0], [0], [1], [0, 0, 1, 1], [], []>} : vector<8x64xbf16>, vector<64x8xbf16>, vector<8x8xf32> -> vector<8x8xf32>
    %c1_61 = arith.constant 1 : index
    %c0_62 = arith.constant 0 : index
    %c0_63 = arith.constant 0 : index
    %85 = vector.load %arg7[%c1_61, %c0_62, %c0_63] : memref<4x1x8xf32, #tpu.memory_space<vmem>>, vector<1x1x8xf32>
    %86 = vector.shape_cast %85 : vector<1x1x8xf32> to vector<1x8xf32>
    %87 = vector.broadcast %86 : vector<1x8xf32> to vector<8x8xf32>
    %88 = arith.addf %84, %87 : vector<8x8xf32>
    %c1_64 = arith.constant 1 : index
    %c0_65 = arith.constant 0 : index
    %c0_66 = arith.constant 0 : index
    %89 = vector.load %arg8[%c1_64, %c0_65, %c0_66] : memref<4x64x8xbf16, #tpu.memory_space<vmem>>, vector<1x64x8xbf16>
    %90 = vector.shape_cast %89 : vector<1x64x8xbf16> to vector<64x8xbf16>
    %cst_67 = arith.constant dense<0.000000e+00> : vector<8x8xf32>
    %91 = tpu.matmul %81, %90, %cst_67 {dimension_numbers = #tpu.dot_dimension_numbers<[1], [0], [0], [1], [0, 0, 1, 1], [], []>} : vector<8x64xbf16>, vector<64x8xbf16>, vector<8x8xf32> -> vector<8x8xf32>
    %c1_68 = arith.constant 1 : index
    %c0_69 = arith.constant 0 : index
    %c0_70 = arith.constant 0 : index
    %92 = vector.load %arg9[%c1_68, %c0_69, %c0_70] : memref<4x1x8xf32, #tpu.memory_space<vmem>>, vector<1x1x8xf32>
    %93 = vector.shape_cast %92 : vector<1x1x8xf32> to vector<1x8xf32>
    %94 = vector.broadcast %93 : vector<1x8xf32> to vector<8x8xf32>
    %95 = arith.addf %91, %94 : vector<8x8xf32>
    %96 = math.exp %88 : vector<8x8xf32>
    %97 = arith.mulf %96, %45 : vector<8x8xf32>
    %98 = arith.addf %97, %95 : vector<8x8xf32>
    %cst_71 = arith.constant dense<0.000000e+00> : vector<8xf32>
    %99 = vector.multi_reduction <add>, %88, %cst_71 [1] : vector<8x8xf32> to vector<8xf32>
    %100 = vector.shape_cast %99 : vector<8xf32> to vector<8x1xf32>
    %101 = arith.addf %48, %100 : vector<8x1xf32>
    %102 = arith.truncf %98 : vector<8x8xf32> to vector<8x8xbf16>
    %c1_72 = arith.constant 1 : index
    %c0_73 = arith.constant 0 : index
    %c0_74 = arith.constant 0 : index
    %103 = vector.load %arg10[%c1_72, %c0_73, %c0_74] : memref<4x8x8xbf16, #tpu.memory_space<vmem>>, vector<1x8x8xbf16>
    %104 = vector.shape_cast %103 : vector<1x8x8xbf16> to vector<8x8xbf16>
    %cst_75 = arith.constant dense<0.000000e+00> : vector<8x8xf32>
    %105 = tpu.matmul %102, %104, %cst_75 {dimension_numbers = #tpu.dot_dimension_numbers<[1], [0], [0], [1], [0, 0, 1, 1], [], []>} : vector<8x8xbf16>, vector<8x8xbf16>, vector<8x8xf32> -> vector<8x8xf32>
    %106 = arith.truncf %105 : vector<8x8xf32> to vector<8x8xbf16>
    %c0_76 = arith.constant 0 : index
    %c0_77 = arith.constant 0 : index
    %107 = vector.load %arg12[%c0_76, %c0_77] : memref<8x8xbf16, #tpu.memory_space<vmem>>, vector<8x8xbf16>
    tpu.vector_store %arg12[%c0_76, %c0_77], %106 {strides = array<i32>} : memref<8x8xbf16, #tpu.memory_space<vmem>>, vector<8x8xbf16>,
    %108 = arith.truncf %98 : vector<8x8xf32> to vector<8x8xbf16>
    %c2 = arith.constant 2 : index
    %c0_78 = arith.constant 0 : index
    %c0_79 = arith.constant 0 : index
    %109 = vector.load %arg2[%c2, %c0_78, %c0_79] : memref<4x8x64xbf16, #tpu.memory_space<vmem>>, vector<1x8x64xbf16>
    %110 = vector.shape_cast %109 : vector<1x8x64xbf16> to vector<8x64xbf16>
    %cst_80 = arith.constant dense<0.000000e+00> : vector<8x64xf32>
    %111 = tpu.matmul %108, %110, %cst_80 {dimension_numbers = #tpu.dot_dimension_numbers<[1], [0], [0], [1], [0, 0, 1, 1], [], []>} : vector<8x8xbf16>, vector<8x64xbf16>, vector<8x64xf32> -> vector<8x64xf32>
    %c2_81 = arith.constant 2 : index
    %c0_82 = arith.constant 0 : index
    %c0_83 = arith.constant 0 : index
    %112 = vector.load %arg3[%c2_81, %c0_82, %c0_83] : memref<4x1x64xf32, #tpu.memory_space<vmem>>, vector<1x1x64xf32>
    %113 = vector.shape_cast %112 : vector<1x1x64xf32> to vector<1x64xf32>
    %114 = vector.broadcast %113 : vector<1x64xf32> to vector<8x64xf32>
    %115 = arith.addf %111, %114 : vector<8x64xf32>
    %cst_84 = arith.constant 0.000000e+00 : f32
    %116 = vector.broadcast %cst_84 : f32 to vector<8x64xf32>
    %117 = arith.cmpf ogt, %115, %116 : vector<8x64xf32>
    %cst_85 = arith.constant 2.000000e-01 : f32
    %118 = vector.broadcast %cst_85 : f32 to vector<8x64xf32>
    %119 = arith.mulf %118, %115 : vector<8x64xf32>
    %120 = arith.select %117, %115, %119 : vector<8x64xi1>, vector<8x64xf32>
    %121 = arith.truncf %120 : vector<8x64xf32> to vector<8x64xbf16>
    %c2_86 = arith.constant 2 : index
    %c0_87 = arith.constant 0 : index
    %c0_88 = arith.constant 0 : index
    %122 = vector.load %arg4[%c2_86, %c0_87, %c0_88] : memref<4x64x64xbf16, #tpu.memory_space<vmem>>, vector<1x64x64xbf16>
    %123 = vector.shape_cast %122 : vector<1x64x64xbf16> to vector<64x64xbf16>
    %cst_89 = arith.constant dense<0.000000e+00> : vector<8x64xf32>
    %124 = tpu.matmul %121, %123, %cst_89 {dimension_numbers = #tpu.dot_dimension_numbers<[1], [0], [0], [1], [0, 0, 1, 1], [], []>} : vector<8x64xbf16>, vector<64x64xbf16>, vector<8x64xf32> -> vector<8x64xf32>
    %c2_90 = arith.constant 2 : index
    %c0_91 = arith.constant 0 : index
    %c0_92 = arith.constant 0 : index
    %125 = vector.load %arg5[%c2_90, %c0_91, %c0_92] : memref<4x1x64xf32, #tpu.memory_space<vmem>>, vector<1x1x64xf32>
    %126 = vector.shape_cast %125 : vector<1x1x64xf32> to vector<1x64xf32>
    %127 = vector.broadcast %126 : vector<1x64xf32> to vector<8x64xf32>
    %128 = arith.addf %124, %127 : vector<8x64xf32>
    %cst_93 = arith.constant 0.000000e+00 : f32
    %129 = vector.broadcast %cst_93 : f32 to vector<8x64xf32>
    %130 = arith.cmpf ogt, %128, %129 : vector<8x64xf32>
    %cst_94 = arith.constant 2.000000e-01 : f32
    %131 = vector.broadcast %cst_94 : f32 to vector<8x64xf32>
    %132 = arith.mulf %131, %128 : vector<8x64xf32>
    %133 = arith.select %130, %128, %132 : vector<8x64xi1>, vector<8x64xf32>
    %134 = arith.truncf %133 : vector<8x64xf32> to vector<8x64xbf16>
    %c2_95 = arith.constant 2 : index
    %c0_96 = arith.constant 0 : index
    %c0_97 = arith.constant 0 : index
    %135 = vector.load %arg6[%c2_95, %c0_96, %c0_97] : memref<4x64x8xbf16, #tpu.memory_space<vmem>>, vector<1x64x8xbf16>
    %136 = vector.shape_cast %135 : vector<1x64x8xbf16> to vector<64x8xbf16>
    %cst_98 = arith.constant dense<0.000000e+00> : vector<8x8xf32>
    %137 = tpu.matmul %134, %136, %cst_98 {dimension_numbers = #tpu.dot_dimension_numbers<[1], [0], [0], [1], [0, 0, 1, 1], [], []>} : vector<8x64xbf16>, vector<64x8xbf16>, vector<8x8xf32> -> vector<8x8xf32>
    %c2_99 = arith.constant 2 : index
    %c0_100 = arith.constant 0 : index
    %c0_101 = arith.constant 0 : index
    %138 = vector.load %arg7[%c2_99, %c0_100, %c0_101] : memref<4x1x8xf32, #tpu.memory_space<vmem>>, vector<1x1x8xf32>
    %139 = vector.shape_cast %138 : vector<1x1x8xf32> to vector<1x8xf32>
    %140 = vector.broadcast %139 : vector<1x8xf32> to vector<8x8xf32>
    %141 = arith.addf %137, %140 : vector<8x8xf32>
    %c2_102 = arith.constant 2 : index
    %c0_103 = arith.constant 0 : index
    %c0_104 = arith.constant 0 : index
    %142 = vector.load %arg8[%c2_102, %c0_103, %c0_104] : memref<4x64x8xbf16, #tpu.memory_space<vmem>>, vector<1x64x8xbf16>
    %143 = vector.shape_cast %142 : vector<1x64x8xbf16> to vector<64x8xbf16>
    %cst_105 = arith.constant dense<0.000000e+00> : vector<8x8xf32>
    %144 = tpu.matmul %134, %143, %cst_105 {dimension_numbers = #tpu.dot_dimension_numbers<[1], [0], [0], [1], [0, 0, 1, 1], [], []>} : vector<8x64xbf16>, vector<64x8xbf16>, vector<8x8xf32> -> vector<8x8xf32>
    %c2_106 = arith.constant 2 : index
    %c0_107 = arith.constant 0 : index
    %c0_108 = arith.constant 0 : index
    %145 = vector.load %arg9[%c2_106, %c0_107, %c0_108] : memref<4x1x8xf32, #tpu.memory_space<vmem>>, vector<1x1x8xf32>
    %146 = vector.shape_cast %145 : vector<1x1x8xf32> to vector<1x8xf32>
    %147 = vector.broadcast %146 : vector<1x8xf32> to vector<8x8xf32>
    %148 = arith.addf %144, %147 : vector<8x8xf32>
    %149 = math.exp %141 : vector<8x8xf32>
    %150 = arith.mulf %149, %98 : vector<8x8xf32>
    %151 = arith.addf %150, %148 : vector<8x8xf32>
    %cst_109 = arith.constant dense<0.000000e+00> : vector<8xf32>
    %152 = vector.multi_reduction <add>, %141, %cst_109 [1] : vector<8x8xf32> to vector<8xf32>
    %153 = vector.shape_cast %152 : vector<8xf32> to vector<8x1xf32>
    %154 = arith.addf %101, %153 : vector<8x1xf32>
    %155 = arith.truncf %151 : vector<8x8xf32> to vector<8x8xbf16>
    %c2_110 = arith.constant 2 : index
    %c0_111 = arith.constant 0 : index
    %c0_112 = arith.constant 0 : index
    %156 = vector.load %arg10[%c2_110, %c0_111, %c0_112] : memref<4x8x8xbf16, #tpu.memory_space<vmem>>, vector<1x8x8xbf16>
    %157 = vector.shape_cast %156 : vector<1x8x8xbf16> to vector<8x8xbf16>
    %cst_113 = arith.constant dense<0.000000e+00> : vector<8x8xf32>
    %158 = tpu.matmul %155, %157, %cst_113 {dimension_numbers = #tpu.dot_dimension_numbers<[1], [0], [0], [1], [0, 0, 1, 1], [], []>} : vector<8x8xbf16>, vector<8x8xbf16>, vector<8x8xf32> -> vector<8x8xf32>
    %159 = arith.truncf %158 : vector<8x8xf32> to vector<8x8xbf16>
    %c0_114 = arith.constant 0 : index
    %c0_115 = arith.constant 0 : index
    %160 = vector.load %arg13[%c0_114, %c0_115] : memref<8x8xbf16, #tpu.memory_space<vmem>>, vector<8x8xbf16>
    tpu.vector_store %arg13[%c0_114, %c0_115], %159 {strides = array<i32>} : memref<8x8xbf16, #tpu.memory_space<vmem>>, vector<8x8xbf16>,
    %161 = arith.truncf %151 : vector<8x8xf32> to vector<8x8xbf16>
    %c3 = arith.constant 3 : index
    %c0_116 = arith.constant 0 : index
    %c0_117 = arith.constant 0 : index
    %162 = vector.load %arg2[%c3, %c0_116, %c0_117] : memref<4x8x64xbf16, #tpu.memory_space<vmem>>, vector<1x8x64xbf16>
    %163 = vector.shape_cast %162 : vector<1x8x64xbf16> to vector<8x64xbf16>
    %cst_118 = arith.constant dense<0.000000e+00> : vector<8x64xf32>
    %164 = tpu.matmul %161, %163, %cst_118 {dimension_numbers = #tpu.dot_dimension_numbers<[1], [0], [0], [1], [0, 0, 1, 1], [], []>} : vector<8x8xbf16>, vector<8x64xbf16>, vector<8x64xf32> -> vector<8x64xf32>
    %c3_119 = arith.constant 3 : index
    %c0_120 = arith.constant 0 : index
    %c0_121 = arith.constant 0 : index
    %165 = vector.load %arg3[%c3_119, %c0_120, %c0_121] : memref<4x1x64xf32, #tpu.memory_space<vmem>>, vector<1x1x64xf32>
    %166 = vector.shape_cast %165 : vector<1x1x64xf32> to vector<1x64xf32>
    %167 = vector.broadcast %166 : vector<1x64xf32> to vector<8x64xf32>
    %168 = arith.addf %164, %167 : vector<8x64xf32>
    %cst_122 = arith.constant 0.000000e+00 : f32
    %169 = vector.broadcast %cst_122 : f32 to vector<8x64xf32>
    %170 = arith.cmpf ogt, %168, %169 : vector<8x64xf32>
    %cst_123 = arith.constant 2.000000e-01 : f32
    %171 = vector.broadcast %cst_123 : f32 to vector<8x64xf32>
    %172 = arith.mulf %171, %168 : vector<8x64xf32>
    %173 = arith.select %170, %168, %172 : vector<8x64xi1>, vector<8x64xf32>
    %174 = arith.truncf %173 : vector<8x64xf32> to vector<8x64xbf16>
    %c3_124 = arith.constant 3 : index
    %c0_125 = arith.constant 0 : index
    %c0_126 = arith.constant 0 : index
    %175 = vector.load %arg4[%c3_124, %c0_125, %c0_126] : memref<4x64x64xbf16, #tpu.memory_space<vmem>>, vector<1x64x64xbf16>
    %176 = vector.shape_cast %175 : vector<1x64x64xbf16> to vector<64x64xbf16>
    %cst_127 = arith.constant dense<0.000000e+00> : vector<8x64xf32>
    %177 = tpu.matmul %174, %176, %cst_127 {dimension_numbers = #tpu.dot_dimension_numbers<[1], [0], [0], [1], [0, 0, 1, 1], [], []>} : vector<8x64xbf16>, vector<64x64xbf16>, vector<8x64xf32> -> vector<8x64xf32>
    %c3_128 = arith.constant 3 : index
    %c0_129 = arith.constant 0 : index
    %c0_130 = arith.constant 0 : index
    %178 = vector.load %arg5[%c3_128, %c0_129, %c0_130] : memref<4x1x64xf32, #tpu.memory_space<vmem>>, vector<1x1x64xf32>
    %179 = vector.shape_cast %178 : vector<1x1x64xf32> to vector<1x64xf32>
    %180 = vector.broadcast %179 : vector<1x64xf32> to vector<8x64xf32>
    %181 = arith.addf %177, %180 : vector<8x64xf32>
    %cst_131 = arith.constant 0.000000e+00 : f32
    %182 = vector.broadcast %cst_131 : f32 to vector<8x64xf32>
    %183 = arith.cmpf ogt, %181, %182 : vector<8x64xf32>
    %cst_132 = arith.constant 2.000000e-01 : f32
    %184 = vector.broadcast %cst_132 : f32 to vector<8x64xf32>
    %185 = arith.mulf %184, %181 : vector<8x64xf32>
    %186 = arith.select %183, %181, %185 : vector<8x64xi1>, vector<8x64xf32>
    %187 = arith.truncf %186 : vector<8x64xf32> to vector<8x64xbf16>
    %c3_133 = arith.constant 3 : index
    %c0_134 = arith.constant 0 : index
    %c0_135 = arith.constant 0 : index
    %188 = vector.load %arg6[%c3_133, %c0_134, %c0_135] : memref<4x64x8xbf16, #tpu.memory_space<vmem>>, vector<1x64x8xbf16>
    %189 = vector.shape_cast %188 : vector<1x64x8xbf16> to vector<64x8xbf16>
    %cst_136 = arith.constant dense<0.000000e+00> : vector<8x8xf32>
    %190 = tpu.matmul %187, %189, %cst_136 {dimension_numbers = #tpu.dot_dimension_numbers<[1], [0], [0], [1], [0, 0, 1, 1], [], []>} : vector<8x64xbf16>, vector<64x8xbf16>, vector<8x8xf32> -> vector<8x8xf32>
    %c3_137 = arith.constant 3 : index
    %c0_138 = arith.constant 0 : index
    %c0_139 = arith.constant 0 : index
    %191 = vector.load %arg7[%c3_137, %c0_138, %c0_139] : memref<4x1x8xf32, #tpu.memory_space<vmem>>, vector<1x1x8xf32>
    %192 = vector.shape_cast %191 : vector<1x1x8xf32> to vector<1x8xf32>
    %193 = vector.broadcast %192 : vector<1x8xf32> to vector<8x8xf32>
    %194 = arith.addf %190, %193 : vector<8x8xf32>
    %c3_140 = arith.constant 3 : index
    %c0_141 = arith.constant 0 : index
    %c0_142 = arith.constant 0 : index
    %195 = vector.load %arg8[%c3_140, %c0_141, %c0_142] : memref<4x64x8xbf16, #tpu.memory_space<vmem>>, vector<1x64x8xbf16>
    %196 = vector.shape_cast %195 : vector<1x64x8xbf16> to vector<64x8xbf16>
    %cst_143 = arith.constant dense<0.000000e+00> : vector<8x8xf32>
    %197 = tpu.matmul %187, %196, %cst_143 {dimension_numbers = #tpu.dot_dimension_numbers<[1], [0], [0], [1], [0, 0, 1, 1], [], []>} : vector<8x64xbf16>, vector<64x8xbf16>, vector<8x8xf32> -> vector<8x8xf32>
    %c3_144 = arith.constant 3 : index
    %c0_145 = arith.constant 0 : index
    %c0_146 = arith.constant 0 : index
    %198 = vector.load %arg9[%c3_144, %c0_145, %c0_146] : memref<4x1x8xf32, #tpu.memory_space<vmem>>, vector<1x1x8xf32>
    %199 = vector.shape_cast %198 : vector<1x1x8xf32> to vector<1x8xf32>
    %200 = vector.broadcast %199 : vector<1x8xf32> to vector<8x8xf32>
    %201 = arith.addf %197, %200 : vector<8x8xf32>
    %202 = math.exp %194 : vector<8x8xf32>
    %203 = arith.mulf %202, %151 : vector<8x8xf32>
    %204 = arith.addf %203, %201 : vector<8x8xf32>
    %cst_147 = arith.constant dense<0.000000e+00> : vector<8xf32>
    %205 = vector.multi_reduction <add>, %194, %cst_147 [1] : vector<8x8xf32> to vector<8xf32>
    %206 = vector.shape_cast %205 : vector<8xf32> to vector<8x1xf32>
    %207 = arith.addf %154, %206 : vector<8x1xf32>
    %208 = arith.truncf %204 : vector<8x8xf32> to vector<8x8xbf16>
    %c3_148 = arith.constant 3 : index
    %c0_149 = arith.constant 0 : index
    %c0_150 = arith.constant 0 : index
    %209 = vector.load %arg10[%c3_148, %c0_149, %c0_150] : memref<4x8x8xbf16, #tpu.memory_space<vmem>>, vector<1x8x8xbf16>
    %210 = vector.shape_cast %209 : vector<1x8x8xbf16> to vector<8x8xbf16>
    %cst_151 = arith.constant dense<0.000000e+00> : vector<8x8xf32>
    %211 = tpu.matmul %208, %210, %cst_151 {dimension_numbers = #tpu.dot_dimension_numbers<[1], [0], [0], [1], [0, 0, 1, 1], [], []>} : vector<8x8xbf16>, vector<8x8xbf16>, vector<8x8xf32> -> vector<8x8xf32>
    %212 = arith.truncf %211 : vector<8x8xf32> to vector<8x8xbf16>
    %c0_152 = arith.constant 0 : index
    %c0_153 = arith.constant 0 : index
    %213 = vector.load %arg14[%c0_152, %c0_153] : memref<8x8xbf16, #tpu.memory_space<vmem>>, vector<8x8xbf16>
    tpu.vector_store %arg14[%c0_152, %c0_153], %212 {strides = array<i32>} : memref<8x8xbf16, #tpu.memory_space<vmem>>, vector<8x8xbf16>,
    %c0_154 = arith.constant 0 : index
    %c0_155 = arith.constant 0 : index
    %214 = vector.load %arg15[%c0_154, %c0_155] : memref<8x1xf32, #tpu.memory_space<vmem>>, vector<8x1xf32>
    tpu.vector_store %arg15[%c0_154, %c0_155], %207 {strides = array<i32>} : memref<8x1xf32, #tpu.memory_space<vmem>>, vector<8x1xf32>,
    return
  }
  func.func @transform_0(%arg0: i32) -> (i32, i32) {
    %c0_i32 = arith.constant 0 : i32
    %c0_i32_0 = arith.constant 0 : i32
    return %arg0, %c0_i32 : i32, i32
  }
  func.func @transform_1(%arg0: i32) -> (i32, i32, i32) {
    %c0_i32 = arith.constant 0 : i32
    %c0_i32_0 = arith.constant 0 : i32
    %c0_i32_1 = arith.constant 0 : i32
    %c0_i32_2 = arith.constant 0 : i32
    return %c0_i32, %c0_i32_0, %c0_i32_1 : i32, i32, i32
  }
  func.func @transform_2(%arg0: i32) -> (i32, i32, i32) {
    %c0_i32 = arith.constant 0 : i32
    %c0_i32_0 = arith.constant 0 : i32
    %c0_i32_1 = arith.constant 0 : i32
    %c0_i32_2 = arith.constant 0 : i32
    return %c0_i32, %c0_i32_0, %c0_i32_1 : i32, i32, i32
  }
  func.func @transform_3(%arg0: i32) -> (i32, i32, i32) {
    %c0_i32 = arith.constant 0 : i32
    %c0_i32_0 = arith.constant 0 : i32
    %c0_i32_1 = arith.constant 0 : i32
    %c0_i32_2 = arith.constant 0 : i32
    return %c0_i32, %c0_i32_0, %c0_i32_1 : i32, i32, i32
  }
  func.func @transform_4(%arg0: i32) -> (i32, i32, i32) {
    %c0_i32 = arith.constant 0 : i32
    %c0_i32_0 = arith.constant 0 : i32
    %c0_i32_1 = arith.constant 0 : i32
    %c0_i32_2 = arith.constant 0 : i32
    return %c0_i32, %c0_i32_0, %c0_i32_1 : i32, i32, i32
  }
  func.func @transform_5(%arg0: i32) -> (i32, i32, i32) {
    %c0_i32 = arith.constant 0 : i32
    %c0_i32_0 = arith.constant 0 : i32
    %c0_i32_1 = arith.constant 0 : i32
    %c0_i32_2 = arith.constant 0 : i32
    return %c0_i32, %c0_i32_0, %c0_i32_1 : i32, i32, i32
  }
  func.func @transform_6(%arg0: i32) -> (i32, i32, i32) {
    %c0_i32 = arith.constant 0 : i32
    %c0_i32_0 = arith.constant 0 : i32
    %c0_i32_1 = arith.constant 0 : i32
    %c0_i32_2 = arith.constant 0 : i32
    return %c0_i32, %c0_i32_0, %c0_i32_1 : i32, i32, i32
  }
  func.func @transform_7(%arg0: i32) -> (i32, i32, i32) {
    %c0_i32 = arith.constant 0 : i32
    %c0_i32_0 = arith.constant 0 : i32
    %c0_i32_1 = arith.constant 0 : i32
    %c0_i32_2 = arith.constant 0 : i32
    return %c0_i32, %c0_i32_0, %c0_i32_1 : i32, i32, i32
  }
  func.func @transform_8(%arg0: i32) -> (i32, i32, i32) {
    %c0_i32 = arith.constant 0 : i32
    %c0_i32_0 = arith.constant 0 : i32
    %c0_i32_1 = arith.constant 0 : i32
    %c0_i32_2 = arith.constant 0 : i32
    return %c0_i32, %c0_i32_0, %c0_i32_1 : i32, i32, i32
  }
  func.func @transform_9(%arg0: i32) -> (i32, i32, i32) {
    %c0_i32 = arith.constant 0 : i32
    %c0_i32_0 = arith.constant 0 : i32
    %c0_i32_1 = arith.constant 0 : i32
    %c0_i32_2 = arith.constant 0 : i32
    return %c0_i32, %c0_i32_0, %c0_i32_1 : i32, i32, i32
  }
  func.func @transform_10(%arg0: i32) -> (i32, i32) {
    %c0_i32 = arith.constant 0 : i32
    %c0_i32_0 = arith.constant 0 : i32
    return %arg0, %c0_i32 : i32, i32
  }
  func.func @transform_11(%arg0: i32) -> (i32, i32) {
    %c0_i32 = arith.constant 0 : i32
    %c0_i32_0 = arith.constant 0 : i32
    return %arg0, %c0_i32 : i32, i32
  }
  func.func @transform_12(%arg0: i32) -> (i32, i32) {
    %c0_i32 = arith.constant 0 : i32
    %c0_i32_0 = arith.constant 0 : i32
    return %arg0, %c0_i32 : i32, i32
  }
  func.func @transform_13(%arg0: i32) -> (i32, i32) {
    %c0_i32 = arith.constant 0 : i32
    %c0_i32_0 = arith.constant 0 : i32
    return %arg0, %c0_i32 : i32, i32
  }
  func.func @transform_14(%arg0: i32) -> (i32, i32) {
    %c0_i32 = arith.constant 0 : i32
    %c0_i32_0 = arith.constant 0 : i32
    return %arg0, %c0_i32 : i32, i32
  }
}

</mosaic_0001>

<bundles_post_ra>
// kernel: normalizing_flow_forward.1
= control target key start
LH: loop header
LB: loop body
LE: loop exit
PB: predicated region body
PF: predicated region fallthrough
CT: control target
= control target key end

     0   :  { %20 = vsyncpa [#allocation3], 0  ;;  %s2682_s0 = inlined_call_operand.vmem [shape: f32[8,8], index: 0, kind: input, shape index: {}]   ;;  %s2683_s1 = inlined_call_operand.vmem [shape: bf16[4,8,64], index: 1, kind: input, shape index: {}]   ;;  %s2684_s2 = inlined_call_operand.vmem [shape: f32[4,1,64], index: 2, kind: input, shape index: {}]   ;;  %s2685_s3 = inlined_call_operand.vmem [shape: bf16[4,64,64], index: 3, kind: input, shape index: {}]   ;;  %s2686_s4 = inlined_call_operand.vmem [shape: f32[4,1,64], index: 4, kind: input, shape index: {}]   ;;  %s2687_s5 = inlined_call_operand.vmem [shape: bf16[4,64,8], index: 5, kind: input, shape index: {}]   ;;  %s2688_s6 = inlined_call_operand.vmem [shape: f32[4,1,8], index: 6, kind: input, shape index: {}]   ;;  %s2689_s7 = inlined_call_operand.vmem [shape: bf16[4,64,8], index: 7, kind: input, shape index: {}]   ;;  %s2690_s8 = inlined_call_operand.vmem [shape: f32[4,1,8], index: 8, kind: input, shape index: {}]   ;;  %s2691_s9 = inlined_call_operand.vmem [shape: bf16[4,8,8], index: 9, kind: input, shape index: {}]   ;;  %s2692_s10 = inlined_call_operand.hbm [shape: bf16[8,8], index: 10, kind: output, shape index: {0}]   ;;  %s2693_s11 = inlined_call_operand.hbm [shape: bf16[8,8], index: 11, kind: output, shape index: {1}]   ;;  %s2694_s12 = inlined_call_operand.hbm [shape: bf16[8,8], index: 12, kind: output, shape index: {2}]   ;;  %s2695_s13 = inlined_call_operand.hbm [shape: bf16[8,8], index: 13, kind: output, shape index: {3}]   ;;  %s2696_s14 = inlined_call_operand.vmem [shape: f32[8,1], index: 14, kind: output, shape index: {4}]  }
   0x1   :  { %21 = vsyncpa [#allocation5], 0  ;;  %v46_v0 = vld [vmem:[%s2683_s1] sm:$0xf]  ;;  %vm58_vm0 = vcmask 1043456   ;;  %v2179_v2 = vmov 0.0  }
   0x2   :  { %v2266_v1 = vld [vmem:[%s2682_s0] sm:$0xff]  ;;  %1831 = vmatprep.subr.bf16.mxu0 %v2179_v2  ;;  %v60_v3 = vsel %vm58_vm0, %v46_v0, 0  ;;  %vm2180_vm1 = vmmov 0   ;;  %vm54_vm2 = vcmask 64512   ;;  %1837 = vmatprep.subr.bf16.mxu1 %v2179_v2  ;;  %v2030_v6 = vld [vmem:[%s2685_s3 + $0x8] sm:$0xff]  }
   0x3   :  { %1833 = vmatprep.mubr.msk.bf16.mxu0 %vm2180_vm1, %v2179_v2  ;;  %v45_v4 = vpack.c.bf16 %v2266_v1, %v2266_v1  ;;  %1832 = vmatpush3.bf16.msra.mxu0 %v60_v3  ;;  %v2029_v5 = vld [vmem:[%s2685_s3] sm:$0xff]  }
   0x4   :  { %1845 = vmatprep.mubr.msk.bf16.mxu1 %vm2180_vm1, %v2179_v2  ;;  %1849 = vmatprep.subr.bf16.mxu0 %v2179_v2 }
   0x5   :  { %1838 = vmatpush3.bf16.msra.mxu1 %v2029_v5 }
   0x6   :  { %1834 = vmatmul.mubr.msk.bf16.vlgmr.msra.gmra.mrb[0].mxu0 %vm54_vm2, %v45_v4  ;;  %1839 = vmatprep.subr.bf16.mxu1 %v2179_v2 }
   0x7   :  { %1857 = vmatprep.mubr.msk.bf16.mxu0 %vm2180_vm1, %v2179_v2 }
   0x9   :  { %1840 = vmatpush3.bf16.msra.mxu1 %v2030_v6 }
   0xa   :  { %1841 = vmatprep.subr.bf16.mxu1 %v2179_v2 }
   0xb   :  { %22 = vsyncpa [#allocation8], 0  ;;  %v2031_v7 = vld [vmem:[%s2685_s3 + $0x10] sm:$0xff]   ;;  %v2032_v8 = vld [vmem:[%s2685_s3 + $0x18] sm:$0xff]   ;;  %vm145_vm4 = vcmask 523264   ;;  %vm411_vm6 = vcmask 60416  }
   0xc   :  { %v2033_v9 = vld [vmem:[%s2687_s5] sm:$0xff]   ;;  %v2035_v10 = vld [vmem:[%s2687_s5 + $0x8] sm:$0xff]   ;;  %v2037_v22 = vld [vmem:[%s2687_s5 + $0x10] sm:$0xff]   ;;  %s2182_s16 = smov [#allocation2]  }
   0xd   :  { %1842 = vmatpush3.bf16.msra.mxu1 %v2031_v7  ;;  %1850 = vmatpush3.bf16.msra.mxu0 %v2033_v9  ;;  %v1581_v11 = vld [vmem:[%s2684_s2] ss:$0 sm:$0xff]  ;;  %v2036_v21 = vld [vmem:[%s2689_s7 + $0x8] sm:$0xff]   ;;  %v2038_v23 = vld [vmem:[%s2689_s7 + $0x10] sm:$0xff]  }
   0xe   :  { %1843 = vmatprep.subr.bf16.mxu1 %v2179_v2  ;;  %1851 = vmatprep.subr.bf16.mxu0 %v2179_v2  ;;  %v2034_v19 = vld [vmem:[%s2689_s7] sm:$0xff]   ;;  %v2039_v24 = vld [vmem:[%s2687_s5 + $0x18] sm:$0xff]   ;;  %v2042_v58 = vld [vmem:[%s2685_s3 + $0x28] sm:$0xff]  }
   0xf   :  { %v2040_v25 = vld [vmem:[%s2689_s7 + $0x18] sm:$0xff]   ;;  %v1583_v26 = vld [vmem:[%s2686_s4] ss:$0 sm:$0xff]  ;;  %v1602_v53 = vld [vmem:[%s2683_s1 + $0x4] sm:$0xf] }
  0x10   :  { %v363_v35 = vld [vmem:[%s2691_s9] sm:$0xf]  ;;  %v424_v56 = vsel %vm58_vm0, %v1602_v53, 0  ;;  %v2043_v59 = vld [vmem:[%s2685_s3 + $0x30] sm:$0xff]   ;;  %v2044_v60 = vld [vmem:[%s2685_s3 + $0x38] sm:$0xff]  }
  0x11   :  { %1844 = vmatpush3.bf16.msra.mxu1 %v2032_v8  ;;  %1852 = vmatpush3.bf16.msra.mxu0 %v2035_v10  ;;  %v368_v36 = vsel %vm58_vm0, %v363_v35, 0  ;;  %v1589_v37 = vld [vmem:[%s2688_s6] ss:$0 sm:$0xff]  ;;  %v2047_v62 = vld [vmem:[%s2687_s5 + $0x28] sm:$0xff]   ;;  %v1604_v5 = vld [vmem:[%s2684_s2 + $0x1] ss:$0 sm:$0xff] }
  0x12   :  { %1861 = vmatprep.subr.bf16.mxu1 %v2179_v2  ;;  %1853 = vmatprep.subr.bf16.mxu0 %v2179_v2  ;;  %v1595_v49 = vld [vmem:[%s2690_s8] ss:$0 sm:$0xff]  ;;  %v2055_v53 = vld [vmem:[%s2685_s3 + $0x50] sm:$0xff]  }
  0x13   :  { %v2041_v57 = vld [vmem:[%s2685_s3 + $0x20] sm:$0xff]  }
  0x14   :  { %v2045_v61 = vld [vmem:[%s2687_s5 + $0x20] sm:$0xff]  }
  0x15   :  { %1854 = vmatpush3.bf16.msra.mxu0 %v2037_v22 }
  0x16   :  { %1855 = vmatprep.subr.bf16.mxu0 %v2179_v2 }
  0x19   :  { %1856 = vmatpush3.bf16.msra.mxu0 %v2039_v24 }
  0x1a   :  { %1873 = vmatprep.subr.bf16.mxu0 %v2179_v2 }
  0xd9   :  { %v96_v12 = vpop.f32.mrb[0].mxu0 }
  0xda   :  { %v97_v13 = vadd.f32 %v1581_v11, %v96_v12  ;;  %v1835_v14 = vpop.f32.mrb[1].mxu0 }
  0xdb   :  { %v99_v15 = vpop.f32.mrb[2].mxu0 }
  0xdc   :  { %vm102_vm3 = vcmp.gt.f32.partialorder %v97_v13, 0.0  ;;  %v103_v16 = vmul.f32 0.2, %v97_v13  ;;  %v1836_v17 = vpop.f32.mrb[3].mxu0  ;;  %v2048_v15 = vld [vmem:[%s2689_s7 + $0x28] sm:$0xff]  }
  0xdd   :  { %v2050_v17 = vld [vmem:[%s2689_s7 + $0x30] sm:$0xff]  }
  0xde   :  { %v104_v18 = vsel %vm102_vm3, %v97_v13, %v103_v16  ;;  %v2046_v13 = vld [vmem:[%s2689_s7 + $0x20] sm:$0xff]   ;;  %v2049_v16 = vld [vmem:[%s2687_s5 + $0x30] sm:$0xff]  }
  0xdf   :  { %v105_v20 = vpack.c.bf16 %v104_v18, %v104_v18  ;;  %v2051_v18 = vld [vmem:[%s2687_s5 + $0x38] sm:$0xff]  }
  0xe1   :  { %1846 = vmatmul.mubr.msk.bf16.vlgmr.msra.gmra.mrb[0].mxu1 %vm145_vm4, %v105_v20  ;;  %v1615_v20 = vld [vmem:[%s2686_s4 + $0x1] ss:$0 sm:$0xff] }
  0xe2   :  { %1862 = vmatpush3.bf16.msra.mxu1 %v2034_v19  ;;  %1869 = vmatprep.mubr.msk.bf16.mxu1 %vm2180_vm1, %v2179_v2  ;;  %v2052_v19 = vld [vmem:[%s2689_s7 + $0x38] sm:$0xff]  }
  0xe3   :  { %1863 = vmatprep.subr.bf16.mxu1 %v2179_v2 }
  0xe6   :  { %1864 = vmatpush3.bf16.msra.mxu1 %v2036_v21 }
  0xe7   :  { %1865 = vmatprep.subr.bf16.mxu1 %v2179_v2 }
  0xea   :  { %1866 = vmatpush3.bf16.msra.mxu1 %v2038_v23 }
  0xeb   :  { %1867 = vmatprep.subr.bf16.mxu1 %v2179_v2 }
  0xee   :  { %1868 = vmatpush3.bf16.msra.mxu1 %v2040_v25 }
  0xef   :  { %1885 = vmatprep.subr.bf16.mxu1 %v2179_v2 }
 0x1b4   :  { %v183_v27 = vpop.f32.mrb[0].mxu1 }
 0x1b5   :  { %v184_v28 = vadd.f32 %v1583_v26, %v183_v27  ;;  %v1847_v29 = vpop.f32.mrb[1].mxu1 }
 0x1b6   :  { %v186_v30 = vpop.f32.mrb[2].mxu1  ;;  %v1651_v29 = vld [vmem:[%s2691_s9 + $0x4] sm:$0xf] }
 0x1b7   :  { %vm189_vm5 = vcmp.gt.f32.partialorder %v184_v28, 0.0  ;;  %v190_v31 = vmul.f32 0.2, %v184_v28  ;;  %v1848_v32 = vpop.f32.mrb[3].mxu1  ;;  %v738_v30 = vsel %vm58_vm0, %v1651_v29, 0 }
 0x1b9   :  { %v191_v33 = vsel %vm189_vm5, %v184_v28, %v190_v31  ;;  %v1630_v31 = vld [vmem:[%s2688_s6 + $0x1] ss:$0 sm:$0xff] }
 0x1ba   :  { %v192_v34 = vpack.c.bf16 %v191_v33, %v191_v33 }
 0x1bc   :  { %1858 = vmatmul.mubr.msk.bf16.vlgmr.msra.gmra.mrb[4].mxu0 %vm145_vm4, %v192_v34  ;;  %1870 = vmatmul.mubr.msk.bf16.vlgmr.msra.gmra.mrb[4].mxu1 %vm145_vm4, %v192_v34 }
 0x1bd   :  { %1875 = vmatprep.mubr.msk.bf16.mxu0 %vm2180_vm1, %v2179_v2  ;;  %1893 = vmatprep.mubr.msk.bf16.mxu1 %vm2180_vm1, %v2179_v2 }
 0x1be   :  { %1874 = vmatpush3.bf16.msra.mxu0 %v368_v36  ;;  %1886 = vmatpush3.bf16.msra.mxu1 %v2041_v57 }
 0x1bf   :  { %1879 = vmatprep.subr.bf16.mxu0 %v2179_v2  ;;  %1887 = vmatprep.subr.bf16.mxu1 %v2179_v2 }
 0x1c2   :  { %1888 = vmatpush3.bf16.msra.mxu1 %v2042_v58 }
 0x1c3   :  { %1889 = vmatprep.subr.bf16.mxu1 %v2179_v2 }
 0x1c6   :  { %1890 = vmatpush3.bf16.msra.mxu1 %v2043_v59 }
 0x1c7   :  { %1891 = vmatprep.subr.bf16.mxu1 %v2179_v2 }
 0x1ca   :  { %1892 = vmatpush3.bf16.msra.mxu1 %v2044_v60 }
 0x1cb   :  { %1909 = vmatprep.subr.bf16.mxu1 %v2179_v2 }
 0x28f   :  { %v269_v38 = vpop.f32.mrb[4].mxu0  ;;  %v348_v39 = vpop.f32.mrb[4].mxu1 }
 0x290   :  { %v270_v40 = vadd.f32 %v1589_v37, %v269_v38  ;;  %v1859_v41 = vpop.f32.mrb[5].mxu0  ;;  %v1871_v42 = vpop.f32.mrb[5].mxu1  ;;  %v349_v51 = vadd.f32 %v1595_v49, %v348_v39 }
 0x291   :  { %v272_v43 = vpop.f32.mrb[6].mxu0  ;;  %v351_v44 = vpop.f32.mrb[6].mxu1 }
 0x292   :  { %v354_v45 = vmul.f32 1.442695, %v270_v40  ;;  %v1860_v46 = vpop.f32.mrb[7].mxu0  ;;  %v1872_v47 = vpop.f32.mrb[7].mxu1  ;;  %v358_v48 = vsel %vm54_vm2, %v270_v40, 0.0 }
 0x293   :  { %359 = vadd.xlane.f32.xlu0 %v358_v48  ;;  %v1645_v43 = vld [vmem:[%s2690_s8 + $0x1] ss:$0 sm:$0xff]  ;;  %v1653_v47 = vld [vmem:[%s2683_s1 + $0x8] sm:$0xf] }
 0x294   :  { %2077 = vpow2.f32 %v354_v45 }
 0x29e   :  { %v2078_v50 = vpop.eup %2077 }
 0x29f   :  { %v356_v52 = vmul.f32 %v2078_v50, %v2266_v1  ;;  %v793_v50 = vsel %vm58_vm0, %v1653_v47, 0  ;;  %v2067_v47 = vld [vmem:[%s2685_s3 + $0x70] sm:$0xff]  }
 0x2a1   :  { %v2360_v54 = vadd.f32 %v356_v52, %v349_v51  ;;  %v2053_v51 = vld [vmem:[%s2685_s3 + $0x40] sm:$0xff]   ;;  %v2054_v52 = vld [vmem:[%s2685_s3 + $0x48] sm:$0xff]  }
 0x2a3   :  { %v362_v55 = vpack.c.bf16 %v2360_v54, %v2360_v54 }
 0x2a5   :  { %1876 = vmatmul.mubr.msk.bf16.vlgmr.msra.gmra.mrb[8].mxu0 %vm54_vm2, %v362_v55 }
 0x2a6   :  { %1880 = vmatpush3.bf16.msra.mxu0 %v424_v56  ;;  %1881 = vmatprep.mubr.msk.bf16.mxu0 %vm2180_vm1, %v2179_v2  ;;  %v2059_v56 = vld [vmem:[%s2687_s5 + $0x48] sm:$0xff]  }
 0x2a7   :  { %1897 = vmatprep.subr.bf16.mxu0 %v2179_v2 }
 0x2ad   :  { %1882 = vmatmul.mubr.msk.bf16.vlgmr.msra.gmra.mrb[12].mxu0 %vm54_vm2, %v362_v55  ;;  %v2057_v55 = vld [vmem:[%s2687_s5 + $0x40] sm:$0xff]  }
 0x2ae   :  { %1905 = vmatprep.mubr.msk.bf16.mxu0 %vm2180_vm1, %v2179_v2  ;;  %1898 = vmatpush3.bf16.msra.mxu0 %v2045_v61 }
 0x2af   :  { %1899 = vmatprep.subr.bf16.mxu0 %v2179_v2 }
 0x2b2   :  { %1900 = vmatpush3.bf16.msra.mxu0 %v2047_v62  ;;  %v1655_v62 = vld [vmem:[%s2684_s2 + $0x2] ss:$0 sm:$0xff] }
 0x2b3   :  { %1901 = vmatprep.subr.bf16.mxu0 %v2179_v2 }
 0x2b6   :  { %1902 = vmatpush3.bf16.msra.mxu0 %v2049_v16 }
 0x2b7   :  { %1903 = vmatprep.subr.bf16.mxu0 %v2179_v2 }
 0x2ba   :  { %1904 = vmatpush3.bf16.msra.mxu0 %v2051_v18 }
 0x2bb   :  { %1921 = vmatprep.subr.bf16.mxu0 %v2179_v2 }
 0x378   :  { %v404_v63 = vpop.f32.mrb[8].mxu0 }
 0x379   :  { %v410_v0 = vpack.c.bf16 %v404_v63, %v404_v63  ;;  %v1877_v1 = vpop.f32.mrb[9].mxu0 }
 0x37a   :  { %v407_v3 = vpop.f32.mrb[10].mxu0 }
 0x37b   :  { %v1878_v4 = vpop.f32.mrb[11].mxu0  ;;  %412 = vst.msk [vmem:[#allocation2] sm:$0xf] %vm411_vm6, %v410_v0 }
 0x380   :  { %v460_v6 = vpop.f32.mrb[12].mxu0 }
 0x381   :  { %v461_v7 = vadd.f32 %v1604_v5, %v460_v6  ;;  %v1883_v8 = vpop.f32.mrb[13].mxu0 }
 0x382   :  { %v463_v9 = vpop.f32.mrb[14].mxu0 }
 0x383   :  { %vm466_vm7 = vcmp.gt.f32.partialorder %v461_v7, 0.0  ;;  %v467_v10 = vmul.f32 0.2, %v461_v7  ;;  %v1884_v11 = vpop.f32.mrb[15].mxu0  ;;  %v2060_v9 = vld [vmem:[%s2689_s7 + $0x48] sm:$0xff]  }
 0x384   :  { %v2062_v11 = vld [vmem:[%s2689_s7 + $0x50] sm:$0xff]  }
 0x385   :  { %v468_v12 = vsel %vm466_vm7, %v461_v7, %v467_v10  ;;  %v2058_v7 = vld [vmem:[%s2689_s7 + $0x40] sm:$0xff]   ;;  %v2061_v10 = vld [vmem:[%s2687_s5 + $0x50] sm:$0xff]  }
 0x386   :  { %v469_v14 = vpack.c.bf16 %v468_v12, %v468_v12  ;;  %v2063_v12 = vld [vmem:[%s2687_s5 + $0x58] sm:$0xff]  }
 0x388   :  { %1894 = vmatmul.mubr.msk.bf16.vlgmr.msra.gmra.mrb[8].mxu1 %vm145_vm4, %v469_v14  ;;  %v1666_v14 = vld [vmem:[%s2686_s4 + $0x2] ss:$0 sm:$0xff] }
 0x389   :  { %1910 = vmatpush3.bf16.msra.mxu1 %v2046_v13  ;;  %1917 = vmatprep.mubr.msk.bf16.mxu1 %vm2180_vm1, %v2179_v2  ;;  %v2064_v13 = vld [vmem:[%s2689_s7 + $0x58] sm:$0xff]  }
 0x38a   :  { %1911 = vmatprep.subr.bf16.mxu1 %v2179_v2 }
 0x38d   :  { %1912 = vmatpush3.bf16.msra.mxu1 %v2048_v15 }
 0x38e   :  { %1913 = vmatprep.subr.bf16.mxu1 %v2179_v2 }
 0x391   :  { %1914 = vmatpush3.bf16.msra.mxu1 %v2050_v17 }
 0x392   :  { %1915 = vmatprep.subr.bf16.mxu1 %v2179_v2 }
 0x395   :  { %1916 = vmatpush3.bf16.msra.mxu1 %v2052_v19 }
 0x396   :  { %1933 = vmatprep.subr.bf16.mxu1 %v2179_v2 }
 0x45b   :  { %v548_v21 = vpop.f32.mrb[8].mxu1 }
 0x45c   :  { %v549_v22 = vadd.f32 %v1615_v20, %v548_v21  ;;  %v1895_v23 = vpop.f32.mrb[9].mxu1 }
 0x45d   :  { %v551_v24 = vpop.f32.mrb[10].mxu1  ;;  %v1702_v23 = vld [vmem:[%s2691_s9 + $0x8] sm:$0xf] }
 0x45e   :  { %vm554_vm8 = vcmp.gt.f32.partialorder %v549_v22, 0.0  ;;  %v555_v25 = vmul.f32 0.2, %v549_v22  ;;  %v1896_v26 = vpop.f32.mrb[11].mxu1  ;;  %v1107_v24 = vsel %vm58_vm0, %v1702_v23, 0 }
 0x460   :  { %v556_v27 = vsel %vm554_vm8, %v549_v22, %v555_v25  ;;  %v1681_v25 = vld [vmem:[%s2688_s6 + $0x2] ss:$0 sm:$0xff] }
 0x461   :  { %v557_v28 = vpack.c.bf16 %v556_v27, %v556_v27 }
 0x463   :  { %1906 = vmatmul.mubr.msk.bf16.vlgmr.msra.gmra.mrb[16].mxu0 %vm145_vm4, %v557_v28  ;;  %1918 = vmatmul.mubr.msk.bf16.vlgmr.msra.gmra.mrb[12].mxu1 %vm145_vm4, %v557_v28 }
 0x464   :  { %1923 = vmatprep.mubr.msk.bf16.mxu0 %vm2180_vm1, %v2179_v2  ;;  %1941 = vmatprep.mubr.msk.bf16.mxu1 %vm2180_vm1, %v2179_v2 }
 0x465   :  { %1922 = vmatpush3.bf16.msra.mxu0 %v738_v30  ;;  %1934 = vmatpush3.bf16.msra.mxu1 %v2053_v51 }
 0x466   :  { %1927 = vmatprep.subr.bf16.mxu0 %v2179_v2  ;;  %1935 = vmatprep.subr.bf16.mxu1 %v2179_v2 }
 0x469   :  { %1936 = vmatpush3.bf16.msra.mxu1 %v2054_v52 }
 0x46a   :  { %1937 = vmatprep.subr.bf16.mxu1 %v2179_v2 }
 0x46d   :  { %1938 = vmatpush3.bf16.msra.mxu1 %v2055_v53 }
 0x46e   :  { %1939 = vmatprep.subr.bf16.mxu1 %v2179_v2 }
 0x536   :  { %v636_v32 = vpop.f32.mrb[16].mxu0  ;;  %v717_v33 = vpop.f32.mrb[12].mxu1 }
 0x537   :  { %v637_v34 = vadd.f32 %v1630_v31, %v636_v32  ;;  %v1907_v35 = vpop.f32.mrb[17].mxu0  ;;  %v1919_v36 = vpop.f32.mrb[13].mxu1  ;;  %v718_v45 = vadd.f32 %v1645_v43, %v717_v33 }
 0x538   :  { %v639_v37 = vpop.f32.mrb[18].mxu0  ;;  %v720_v38 = vpop.f32.mrb[14].mxu1 }
 0x539   :  { %v723_v39 = vmul.f32 1.442695, %v637_v34  ;;  %v1908_v40 = vpop.f32.mrb[19].mxu0  ;;  %v1920_v41 = vpop.f32.mrb[15].mxu1  ;;  %v727_v42 = vsel %vm54_vm2, %v637_v34, 0.0 }
 0x53a   :  { %728 = vadd.xlane.f32.xlu0 %v727_v42  ;;  %v1696_v37 = vld [vmem:[%s2690_s8 + $0x2] ss:$0 sm:$0xff]  ;;  %v1704_v41 = vld [vmem:[%s2683_s1 + $0xc] sm:$0xf] }
 0x53b   :  { %2079 = vpow2.f32 %v723_v39 }
 0x545   :  { %v2080_v44 = vpop.eup %2079 }
 0x546   :  { %v725_v46 = vmul.f32 %v2080_v44, %v2360_v54  ;;  %v2056_v54 = vld [vmem:[%s2685_s3 + $0x58] sm:$0xff]   ;;  %v1162_v44 = vsel %vm58_vm0, %v1704_v41, 0 }
 0x547   :  { %1940 = vmatpush3.bf16.msra.mxu1 %v2056_v54 }
 0x548   :  { %v2452_v48 = vadd.f32 %v725_v46, %v718_v45  ;;  %1957 = vmatprep.subr.bf16.mxu1 %v2179_v2  ;;  %v2065_v45 = vld [vmem:[%s2685_s3 + $0x60] sm:$0xff]   ;;  %v2066_v46 = vld [vmem:[%s2685_s3 + $0x68] sm:$0xff]  }
 0x54a   :  { %v731_v49 = vpack.c.bf16 %v2452_v48, %v2452_v48 }
 0x54c   :  { %1924 = vmatmul.mubr.msk.bf16.vlgmr.msra.gmra.mrb[20].mxu0 %vm54_vm2, %v731_v49 }
 0x54d   :  { %1928 = vmatpush3.bf16.msra.mxu0 %v793_v50  ;;  %1929 = vmatprep.mubr.msk.bf16.mxu0 %vm2180_vm1, %v2179_v2  ;;  %v2071_v50 = vld [vmem:[%s2687_s5 + $0x68] sm:$0xff]  }
 0x54e   :  { %1945 = vmatprep.subr.bf16.mxu0 %v2179_v2 }
 0x554   :  { %1930 = vmatmul.mubr.msk.bf16.vlgmr.msra.gmra.mrb[24].mxu0 %vm54_vm2, %v731_v49  ;;  %v2069_v49 = vld [vmem:[%s2687_s5 + $0x60] sm:$0xff]  }
 0x555   :  { %1953 = vmatprep.mubr.msk.bf16.mxu0 %vm2180_vm1, %v2179_v2  ;;  %1946 = vmatpush3.bf16.msra.mxu0 %v2057_v55 }
 0x556   :  { %1947 = vmatprep.subr.bf16.mxu0 %v2179_v2 }
 0x559   :  { %1948 = vmatpush3.bf16.msra.mxu0 %v2059_v56  ;;  %v1706_v56 = vld [vmem:[%s2684_s2 + $0x3] ss:$0 sm:$0xff] }
 0x55a   :  { %1949 = vmatprep.subr.bf16.mxu0 %v2179_v2 }
 0x55d   :  { %1950 = vmatpush3.bf16.msra.mxu0 %v2061_v10 }
 0x55e   :  { %1951 = vmatprep.subr.bf16.mxu0 %v2179_v2 }
 0x561   :  { %1952 = vmatpush3.bf16.msra.mxu0 %v2063_v12 }
 0x562   :  { %1969 = vmatprep.subr.bf16.mxu0 %v2179_v2 }
 0x61f   :  { %v774_v57 = vpop.f32.mrb[20].mxu0 }
 0x620   :  { %v780_v58 = vpack.c.bf16 %v774_v57, %v774_v57  ;;  %v1925_v59 = vpop.f32.mrb[21].mxu0 }
 0x621   :  { %v777_v60 = vpop.f32.mrb[22].mxu0 }
 0x622   :  { %v1926_v61 = vpop.f32.mrb[23].mxu0  ;;  %781 = vst.msk [vmem:[#allocation4] sm:$0xf] %vm411_vm6, %v780_v58 }
 0x627   :  { %v829_v63 = vpop.f32.mrb[24].mxu0 }
 0x628   :  { %v830_v0 = vadd.f32 %v1655_v62, %v829_v63  ;;  %v1931_v1 = vpop.f32.mrb[25].mxu0 }
 0x629   :  { %v832_v3 = vpop.f32.mrb[26].mxu0 }
 0x62a   :  { %vm835_vm9 = vcmp.gt.f32.partialorder %v830_v0, 0.0  ;;  %v836_v4 = vmul.f32 0.2, %v830_v0  ;;  %v1932_v5 = vpop.f32.mrb[27].mxu0  ;;  %v2072_v3 = vld [vmem:[%s2689_s7 + $0x68] sm:$0xff]  }
 0x62b   :  { %v2074_v5 = vld [vmem:[%s2689_s7 + $0x70] sm:$0xff]  }
 0x62c   :  { %v837_v6 = vsel %vm835_vm9, %v830_v0, %v836_v4  ;;  %v2070_v0 = vld [vmem:[%s2689_s7 + $0x60] sm:$0xff]   ;;  %v2073_v4 = vld [vmem:[%s2687_s5 + $0x70] sm:$0xff]  }
 0x62d   :  { %v838_v8 = vpack.c.bf16 %v837_v6, %v837_v6  ;;  %v2075_v6 = vld [vmem:[%s2687_s5 + $0x78] sm:$0xff]  }
 0x62f   :  { %1942 = vmatmul.mubr.msk.bf16.vlgmr.msra.gmra.mrb[16].mxu1 %vm145_vm4, %v838_v8  ;;  %v1717_v8 = vld [vmem:[%s2686_s4 + $0x3] ss:$0 sm:$0xff] }
 0x630   :  { %1958 = vmatpush3.bf16.msra.mxu1 %v2058_v7  ;;  %1965 = vmatprep.mubr.msk.bf16.mxu1 %vm2180_vm1, %v2179_v2  ;;  %v2076_v7 = vld [vmem:[%s2689_s7 + $0x78] sm:$0xff]  }
 0x631   :  { %1959 = vmatprep.subr.bf16.mxu1 %v2179_v2 }
 0x634   :  { %1960 = vmatpush3.bf16.msra.mxu1 %v2060_v9 }
 0x635   :  { %1961 = vmatprep.subr.bf16.mxu1 %v2179_v2 }
 0x638   :  { %1962 = vmatpush3.bf16.msra.mxu1 %v2062_v11 }
 0x639   :  { %1963 = vmatprep.subr.bf16.mxu1 %v2179_v2 }
 0x63c   :  { %1964 = vmatpush3.bf16.msra.mxu1 %v2064_v13 }
 0x63d   :  { %1981 = vmatprep.subr.bf16.mxu1 %v2179_v2 }
 0x702   :  { %v917_v15 = vpop.f32.mrb[16].mxu1 }
 0x703   :  { %v918_v16 = vadd.f32 %v1666_v14, %v917_v15  ;;  %v1943_v17 = vpop.f32.mrb[17].mxu1 }
 0x704   :  { %v920_v18 = vpop.f32.mrb[18].mxu1  ;;  %v1753_v17 = vld [vmem:[%s2691_s9 + $0xc] sm:$0xf] }
 0x705   :  { %vm923_vm10 = vcmp.gt.f32.partialorder %v918_v16, 0.0  ;;  %v924_v19 = vmul.f32 0.2, %v918_v16  ;;  %v1944_v20 = vpop.f32.mrb[19].mxu1  ;;  %v1476_v18 = vsel %vm58_vm0, %v1753_v17, 0 }
 0x707   :  { %v925_v21 = vsel %vm923_vm10, %v918_v16, %v924_v19  ;;  %v1732_v19 = vld [vmem:[%s2688_s6 + $0x3] ss:$0 sm:$0xff]  ;;  %s2181_s6 = smov [#allocation4]  }
 0x708   :  { %v926_v22 = vpack.c.bf16 %v925_v21, %v925_v21  ;;  %s1538_s15 = sshll.u32 %s2181_s6, 4  ;;  %s1539_s15 = int_to_ptr.vmem [resolvable:$true] %s1538_s15 }
 0x709   :  { %s2085_s17 = scalar_lea.vmem %s1539_s15, 64  ;;  %p2090_p1 = scmp.lt.s32.totalorder %s1539_s15, %s1539_s15 }
 0x70a   :  { %1954 = vmatmul.mubr.msk.bf16.vlgmr.msra.gmra.mrb[28].mxu0 %vm145_vm4, %v926_v22  ;;  %1966 = vmatmul.mubr.msk.bf16.vlgmr.msra.gmra.mrb[20].mxu1 %vm145_vm4, %v926_v22  ;;  %p2086_p0 = scmp.ne.s32.totalorder %s1539_s15, %s2085_s17  ;;  %p2091_p2 = scmp.lt.s32.totalorder %s2085_s17, %s2085_s17 }
 0x70b   :  { %1971 = vmatprep.mubr.msk.bf16.mxu0 %vm2180_vm1, %v2179_v2  ;;  %1989 = vmatprep.mubr.msk.bf16.mxu1 %vm2180_vm1, %v2179_v2 }
 0x70c   :  { %1970 = vmatpush3.bf16.msra.mxu0 %v1107_v24  ;;  %1982 = vmatpush3.bf16.msra.mxu1 %v2065_v45  ;;  %p2092_p3 = por %p2091_p2, %p2090_p1 }
 0x70d   :  { %1975 = vmatprep.subr.bf16.mxu0 %v2179_v2  ;;  %1983 = vmatprep.subr.bf16.mxu1 %v2179_v2 }
 0x70e   :  { %p2093_p4 = pnand %p2092_p3, %p2086_p0 }
 0x710   :  { %1984 = vmatpush3.bf16.msra.mxu1 %v2066_v46 }
 0x711   :  { %1985 = vmatprep.subr.bf16.mxu1 %v2179_v2 }
 0x714   :  { %1986 = vmatpush3.bf16.msra.mxu1 %v2067_v47 }
 0x715   :  { %1987 = vmatprep.subr.bf16.mxu1 %v2179_v2 }
 0x7dd   :  { %v1005_v26 = vpop.f32.mrb[28].mxu0  ;;  %v1086_v27 = vpop.f32.mrb[20].mxu1 }
 0x7de   :  { %v1006_v28 = vadd.f32 %v1681_v25, %v1005_v26  ;;  %v1955_v29 = vpop.f32.mrb[29].mxu0  ;;  %v1967_v30 = vpop.f32.mrb[21].mxu1  ;;  %v1087_v39 = vadd.f32 %v1696_v37, %v1086_v27 }
 0x7df   :  { %v1008_v31 = vpop.f32.mrb[30].mxu0  ;;  %v1089_v32 = vpop.f32.mrb[22].mxu1  ;;  %v1747_v30 = vld [vmem:[%s2690_s8 + $0x3] ss:$0 sm:$0xff] }
 0x7e0   :  { %v1092_v33 = vmul.f32 1.442695, %v1006_v28  ;;  %v1956_v34 = vpop.f32.mrb[31].mxu0  ;;  %v1968_v35 = vpop.f32.mrb[23].mxu1  ;;  %v1096_v36 = vsel %vm54_vm2, %v1006_v28, 0.0 }
 0x7e1   :  { %1097 = vadd.xlane.f32.xlu1 %v1096_v36 }
 0x7e2   :  { %2081 = vpow2.f32 %v1092_v33 }
 0x7ec   :  { %v2082_v38 = vpop.eup %2081 }
 0x7ed   :  { %v1094_v40 = vmul.f32 %v2082_v38, %v2452_v48  ;;  %v2068_v48 = vld [vmem:[%s2685_s3 + $0x78] sm:$0xff]   ;;  %s1528_s3 = sshll.u32 %s2182_s16, 4  ;;  %s1529_s3 = int_to_ptr.vmem [resolvable:$true] %s1528_s3 }
 0x7ee   :  { %1988 = vmatpush3.bf16.msra.mxu1 %v2068_v48 }
 0x7ef   :  { %v2544_v42 = vadd.f32 %v1094_v40, %v1087_v39  ;;  %2005 = vmatprep.subr.bf16.mxu1 %v2179_v2 }
 0x7f1   :  { %v1100_v43 = vpack.c.bf16 %v2544_v42, %v2544_v42 }
 0x7f3   :  { %1972 = vmatmul.mubr.msk.bf16.vlgmr.msra.gmra.mrb[32].mxu0 %vm54_vm2, %v1100_v43 }
 0x7f4   :  { %1976 = vmatpush3.bf16.msra.mxu0 %v1162_v44  ;;  %1977 = vmatprep.mubr.msk.bf16.mxu0 %vm2180_vm1, %v2179_v2 }
 0x7f5   :  { %1993 = vmatprep.subr.bf16.mxu0 %v2179_v2 }
 0x7fb   :  { %1978 = vmatmul.mubr.msk.bf16.vlgmr.msra.gmra.mrb[36].mxu0 %vm54_vm2, %v1100_v43 }
 0x7fc   :  { %2001 = vmatprep.mubr.msk.bf16.mxu0 %vm2180_vm1, %v2179_v2  ;;  %1994 = vmatpush3.bf16.msra.mxu0 %v2069_v49 }
 0x7fd   :  { %1995 = vmatprep.subr.bf16.mxu0 %v2179_v2 }
 0x800   :  { %1996 = vmatpush3.bf16.msra.mxu0 %v2071_v50 }
 0x801   :  { %1997 = vmatprep.subr.bf16.mxu0 %v2179_v2 }
 0x804   :  { %1998 = vmatpush3.bf16.msra.mxu0 %v2073_v4 }
 0x805   :  { %1999 = vmatprep.subr.bf16.mxu0 %v2179_v2 }
 0x808   :  { %2000 = vmatpush3.bf16.msra.mxu0 %v2075_v6 }
 0x809   :  { %2017 = vmatprep.subr.bf16.mxu0 %v2179_v2 }
 0x8c6   :  { %v1143_v51 = vpop.f32.mrb[32].mxu0 }
 0x8c7   :  { %v1149_v52 = vpack.c.bf16 %v1143_v51, %v1143_v51  ;;  %v1973_v53 = vpop.f32.mrb[33].mxu0 }
 0x8c8   :  { %v1146_v54 = vpop.f32.mrb[34].mxu0 }
 0x8c9   :  { %v1974_v55 = vpop.f32.mrb[35].mxu0  ;;  %1150 = vst.msk [vmem:[#allocation6] sm:$0xf] %vm411_vm6, %v1149_v52 }
 0x8ce   :  { %v1198_v57 = vpop.f32.mrb[36].mxu0 }
 0x8cf   :  { %v1199_v58 = vadd.f32 %v1706_v56, %v1198_v57  ;;  %v1979_v59 = vpop.f32.mrb[37].mxu0 }
 0x8d0   :  { %v1201_v60 = vpop.f32.mrb[38].mxu0 }
 0x8d1   :  { %vm1204_vm11 = vcmp.gt.f32.partialorder %v1199_v58, 0.0  ;;  %v1205_v61 = vmul.f32 0.2, %v1199_v58  ;;  %v1980_v62 = vpop.f32.mrb[39].mxu0 }
 0x8d3   :  { %v1206_v63 = vsel %vm1204_vm11, %v1199_v58, %v1205_v61 }
 0x8d4   :  { %v1207_v1 = vpack.c.bf16 %v1206_v63, %v1206_v63 }
 0x8d6   :  { %1990 = vmatmul.mubr.msk.bf16.vlgmr.msra.gmra.mrb[24].mxu1 %vm145_vm4, %v1207_v1 }
 0x8d7   :  { %2006 = vmatpush3.bf16.msra.mxu1 %v2070_v0  ;;  %2013 = vmatprep.mubr.msk.bf16.mxu1 %vm2180_vm1, %v2179_v2 }
 0x8d8   :  { %2007 = vmatprep.subr.bf16.mxu1 %v2179_v2 }
 0x8db   :  { %2008 = vmatpush3.bf16.msra.mxu1 %v2072_v3 }
 0x8dc   :  { %2009 = vmatprep.subr.bf16.mxu1 %v2179_v2 }
 0x8df   :  { %2010 = vmatpush3.bf16.msra.mxu1 %v2074_v5 }
 0x8e0   :  { %2011 = vmatprep.subr.bf16.mxu1 %v2179_v2 }
 0x8e3   :  { %2012 = vmatpush3.bf16.msra.mxu1 %v2076_v7 }
 0x9a9   :  { %v1286_v9 = vpop.f32.mrb[24].mxu1 }
 0x9aa   :  { %v1287_v10 = vadd.f32 %v1717_v8, %v1286_v9  ;;  %v1991_v11 = vpop.f32.mrb[25].mxu1 }
 0x9ab   :  { %v1289_v12 = vpop.f32.mrb[26].mxu1 }
 0x9ac   :  { %vm1292_vm12 = vcmp.gt.f32.partialorder %v1287_v10, 0.0  ;;  %v1293_v13 = vmul.f32 0.2, %v1287_v10  ;;  %v1992_v14 = vpop.f32.mrb[27].mxu1 }
 0x9ae   :  { %v1294_v15 = vsel %vm1292_vm12, %v1287_v10, %v1293_v13 }
 0x9af   :  { %v1295_v16 = vpack.c.bf16 %v1294_v15, %v1294_v15 }
 0x9b1   :  { %2002 = vmatmul.mubr.msk.bf16.vlgmr.msra.gmra.mrb[40].mxu0 %vm145_vm4, %v1295_v16  ;;  %2014 = vmatmul.mubr.msk.bf16.vlgmr.msra.gmra.mrb[28].mxu1 %vm145_vm4, %v1295_v16 }
 0x9b2   :  { %2019 = vmatprep.mubr.msk.bf16.mxu0 %vm2180_vm1, %v2179_v2  ;;  %2018 = vmatpush3.bf16.msra.mxu0 %v1476_v18 }
 0xa84   :  { %v1374_v20 = vpop.f32.mrb[40].mxu0  ;;  %v1455_v21 = vpop.f32.mrb[28].mxu1 }
 0xa85   :  { %v1375_v22 = vadd.f32 %v1732_v19, %v1374_v20  ;;  %v2003_v23 = vpop.f32.mrb[41].mxu0  ;;  %v2015_v24 = vpop.f32.mrb[29].mxu1  ;;  %v1456_v32 = vadd.f32 %v1747_v30, %v1455_v21 }
 0xa86   :  { %v1377_v25 = vpop.f32.mrb[42].mxu0  ;;  %v1458_v26 = vpop.f32.mrb[30].mxu1 }
 0xa87   :  { %v1461_v27 = vmul.f32 1.442695, %v1375_v22  ;;  %v2004_v2 = vpop.f32.mrb[43].mxu0  ;;  %v2016_v28 = vpop.f32.mrb[31].mxu1  ;;  %v1465_v29 = vsel %vm54_vm2, %v1375_v22, 0.0 }
 0xa88   :  { %1466 = vadd.xlane.f32.xlu1 %v1465_v29 }
 0xa89   :  { %2083 = vpow2.f32 %v1461_v27 }
 0xa93   :  { %v2084_v31 = vpop.eup %2083 }
 0xa94   :  { %v1463_v33 = vmul.f32 %v2084_v31, %v2544_v42 }
 0xa96   :  { %v1464_v34 = vadd.f32 %v1463_v33, %v1456_v32 }
 0xa98   :  { %v1469_v35 = vpack.c.bf16 %v1464_v34, %v1464_v34 }
 0xa9a   :  { %2020 = vmatmul.mubr.msk.bf16.vlgmr.msra.gmra.mrb[44].mxu0 %vm54_vm2, %v1469_v35 }
 0xa9b   :  { %2096 = shalt.err (!%p2093_p4)
}
 0xa9c   :  { %s2097_s0 = scalar_lea.hbm %s2693_s11, 64 }
 0xa9d   :  { %p2098_p5 = scmp.ne.s32.totalorder %s2693_s11, %s2097_s0  ;;  %p2101_p6 = scmp.lt.u32.totalorder %s2097_s0, %s2693_s11 }
 0xa9f   :  { %p2103_p7 = pnand %p2101_p6, %p2098_p5 }
 0xaa1   :  { %2106 = shalt.err (!%p2103_p7)
}
 0xaa2   :  { %1541 = dma.vmem_to_hbm [thread:$0]  %s1539_s15, 64, %s2693_s11, [#allocation5]  }
 0xaa3   :  { %s2107_s23 = scalar_lea.vmem %s1529_s3, 64  ;;  %p2112_p9 = scmp.lt.s32.totalorder %s1529_s3, %s1529_s3 }
 0xaa4   :  { %p2108_p8 = scmp.ne.s32.totalorder %s1529_s3, %s2107_s23  ;;  %p2113_p10 = scmp.lt.s32.totalorder %s2107_s23, %s2107_s23 }
 0xaa6   :  { %p2114_p11 = por %p2113_p10, %p2112_p9 }
 0xaa8   :  { %p2115_p12 = pnand %p2114_p11, %p2108_p8 }
 0xaaa   :  { %2118 = shalt.err (!%p2115_p12)
}
 0xaab   :  { %s2119_s26 = scalar_lea.hbm %s2692_s10, 64 }
 0xaac   :  { %p2120_p13 = scmp.ne.s32.totalorder %s2692_s10, %s2119_s26  ;;  %p2123_p0 = scmp.lt.u32.totalorder %s2119_s26, %s2692_s10 }
 0xaae   :  { %p2125_p1 = pnand %p2123_p0, %p2120_p13 }
 0xab0   :  { %2128 = shalt.err (!%p2125_p1)
}
 0xab1   :  { %1531 = dma.vmem_to_hbm [thread:$0]  %s1529_s3, 64, %s2692_s10, [#allocation3]  }
 0xab2   :  { %s2183_s29 = smov [#allocation6]  }
 0xab3   :  { %s1548_s9 = sshll.u32 %s2183_s29, 4  ;;  %s1549_s9 = int_to_ptr.vmem [resolvable:$true] %s1548_s9 }
 0xab4   :  { %s2129_s30 = scalar_lea.vmem %s1549_s9, 64  ;;  %p2134_p3 = scmp.lt.s32.totalorder %s1549_s9, %s1549_s9 }
 0xab5   :  { %p2130_p2 = scmp.ne.s32.totalorder %s1549_s9, %s2129_s30  ;;  %p2135_p4 = scmp.lt.s32.totalorder %s2129_s30, %s2129_s30 }
 0xab7   :  { %p2136_p5 = por %p2135_p4, %p2134_p3 }
 0xab9   :  { %p2137_p6 = pnand %p2136_p5, %p2130_p2 }
 0xabb   :  { %2140 = shalt.err (!%p2137_p6)
}
 0xabc   :  { %s2141_s16 = scalar_lea.hbm %s2694_s12, 64 }
 0xabd   :  { %p2142_p7 = scmp.ne.s32.totalorder %s2694_s12, %s2141_s16  ;;  %p2145_p8 = scmp.lt.u32.totalorder %s2141_s16, %s2694_s12 }
 0xabf   :  { %p2147_p9 = pnand %p2145_p8, %p2142_p7 }
 0xac1   :  { %2150 = shalt.err (!%p2147_p9)
}
 0xac2   :  { %1551 = dma.vmem_to_hbm [thread:$0]  %s1549_s9, 64, %s2694_s12, [#allocation5]   ;;  %v360_v36 = vpop.xlane.xlu0 %359  ;;  %v1098_v38 = vpop.xlane.xlu1 %1097  ;;  %vm1520_vm13 = vcmask 7168  }
 0xac3   :  { %s2184_s2 = smov [#allocation7]  }
 0xac4   :  { %s1558_s21 = sshll.u32 %s2184_s2, 4  ;;  %s1559_s21 = int_to_ptr.vmem [resolvable:$true] %s1558_s21 }
 0xac5   :  { %s2151_s12 = scalar_lea.vmem %s1559_s21, 64  ;;  %p2156_p11 = scmp.lt.s32.totalorder %s1559_s21, %s1559_s21 }
 0xac6   :  { %v729_v37 = vpop.xlane.xlu0 %728  ;;  %p2152_p10 = scmp.ne.s32.totalorder %s1559_s21, %s2151_s12  ;;  %p2157_p12 = scmp.lt.s32.totalorder %s2151_s12, %s2151_s12 }
 0xac7   :  { %v730_v39 = vadd.f32 %v729_v37, %v360_v36 }
 0xac8   :  { %p2158_p13 = por %p2157_p12, %p2156_p11 }
 0xac9   :  { %v1099_v40 = vadd.f32 %v1098_v38, %v730_v39 }
 0xaca   :  { %p2159_p0 = pnand %p2158_p13, %p2152_p10 }
 0xb15   :  { %v1467_v41 = vpop.xlane.xlu1 %1466 }
 0xb16   :  { %v1468_v42 = vadd.f32 %v1467_v41, %v1099_v40 }
 0xb18   :  { %1521 = vst.msk [vmem:[%s2696_s14] sm:$0xff] %vm1520_vm13, %v1468_v42 }
 0xb6d   :  { %v1512_v43 = vpop.f32.mrb[44].mxu0 }
 0xb6e   :  { %v1518_v44 = vpack.c.bf16 %v1512_v43, %v1512_v43  ;;  %v2021_v45 = vpop.f32.mrb[45].mxu0 }
 0xb6f   :  { %v1515_v46 = vpop.f32.mrb[46].mxu0 }
 0xb70   :  { %v2022_v47 = vpop.f32.mrb[47].mxu0  ;;  %1519 = vst.msk [vmem:[#allocation7] sm:$0xf] %vm411_vm6, %v1518_v44 }
 0xb71   :  { %2162 = shalt.err (!%p2159_p0)
}
 0xb72   :  { %s2163_s14 = scalar_lea.hbm %s2695_s13, 64 }
 0xb73   :  { %p2164_p1 = scmp.ne.s32.totalorder %s2695_s13, %s2163_s14  ;;  %p2167_p2 = scmp.lt.u32.totalorder %s2163_s14, %s2695_s13 }
 0xb75   :  { %p2169_p3 = pnand %p2167_p2, %p2164_p1 }
 0xb77   :  { %2172 = shalt.err (!%p2169_p3)
}
 0xb78   :  { %1561 = dma.vmem_to_hbm [thread:$0]  %s1559_s21, 64, %s2695_s13, [#allocation8]  }
 0xb79   :  { %2173 = dma.done.wait [#allocation3], 64  }
 0xb7a   :  { %2174 = vsyncadd [#allocation3], 4294967232 }
 0xb7b   :  { %2175 = dma.done.wait [#allocation5], 128  }
 0xb7c   :  { %2176 = vsyncadd [#allocation5], 4294967168 }
 0xb7d   :  { %2177 = dma.done.wait [#allocation8], 64  }
 0xb7e   :  { %2178 = vsyncadd [#allocation8], 4294967232 }
 0xb7f   :  { %1578 = vsyncpa [#allocation3], 1 }
 0xb80   :  { %1579 = vsyncpa [#allocation5], 1 }
 0xb81   :  { %1580 = vsyncpa [#allocation8], 1 }

// kernel: normalizing_flow_forward.1
= control target key start
LH: loop header
LB: loop body
LE: loop exit
PB: predicated region body
PF: predicated region fallthrough
CT: control target
= control target key end

     0   :  { %20 = vsyncpa [#allocation3], 0  ;;  %s2682_s0 = inlined_call_operand.vmem [shape: f32[8,8], index: 0, kind: input, shape index: {}]   ;;  %s2683_s1 = inlined_call_operand.vmem [shape: bf16[4,8,64], index: 1, kind: input, shape index: {}]   ;;  %s2684_s2 = inlined_call_operand.vmem [shape: f32[4,1,64], index: 2, kind: input, shape index: {}]   ;;  %s2685_s3 = inlined_call_operand.vmem [shape: bf16[4,64,64], index: 3, kind: input, shape index: {}]   ;;  %s2686_s4 = inlined_call_operand.vmem [shape: f32[4,1,64], index: 4, kind: input, shape index: {}]   ;;  %s2687_s5 = inlined_call_operand.vmem [shape: bf16[4,64,8], index: 5, kind: input, shape index: {}]   ;;  %s2688_s6 = inlined_call_operand.vmem [shape: f32[4,1,8], index: 6, kind: input, shape index: {}]   ;;  %s2689_s7 = inlined_call_operand.vmem [shape: bf16[4,64,8], index: 7, kind: input, shape index: {}]   ;;  %s2690_s8 = inlined_call_operand.vmem [shape: f32[4,1,8], index: 8, kind: input, shape index: {}]   ;;  %s2691_s9 = inlined_call_operand.vmem [shape: bf16[4,8,8], index: 9, kind: input, shape index: {}]   ;;  %s2692_s10 = inlined_call_operand.hbm [shape: bf16[8,8], index: 10, kind: output, shape index: {0}]   ;;  %s2693_s11 = inlined_call_operand.hbm [shape: bf16[8,8], index: 11, kind: output, shape index: {1}]   ;;  %s2694_s12 = inlined_call_operand.hbm [shape: bf16[8,8], index: 12, kind: output, shape index: {2}]   ;;  %s2695_s13 = inlined_call_operand.hbm [shape: bf16[8,8], index: 13, kind: output, shape index: {3}]   ;;  %s2696_s14 = inlined_call_operand.vmem [shape: f32[8,1], index: 14, kind: output, shape index: {4}]  }
   0x1   :  { %21 = vsyncpa [#allocation5], 0  ;;  %v46_v0 = vld [vmem:[%s2683_s1] sm:$0xf]  ;;  %vm58_vm0 = vcmask 1043456   ;;  %v2179_v2 = vmov 0.0  }
   0x2   :  { %v2266_v1 = vld [vmem:[%s2682_s0] sm:$0xff]  ;;  %1831 = vmatprep.subr.bf16.mxu0 %v2179_v2  ;;  %v60_v3 = vsel %vm58_vm0, %v46_v0, 0  ;;  %vm2180_vm1 = vmmov 0   ;;  %vm54_vm2 = vcmask 64512   ;;  %1837 = vmatprep.subr.bf16.mxu1 %v2179_v2  ;;  %v2030_v6 = vld [vmem:[%s2685_s3 + $0x8] sm:$0xff]  }
   0x3   :  { %1833 = vmatprep.mubr.msk.bf16.mxu0 %vm2180_vm1, %v2179_v2  ;;  %v45_v4 = vpack.c.bf16 %v2266_v1, %v2266_v1  ;;  %1832 = vmatpush3.bf16.msra.mxu0 %v60_v3  ;;  %v2029_v5 = vld [vmem:[%s2685_s3] sm:$0xff]  }
   0x4   :  { %1845 = vmatprep.mubr.msk.bf16.mxu1 %vm2180_vm1, %v2179_v2  ;;  %1849 = vmatprep.subr.bf16.mxu0 %v2179_v2 }
   0x5   :  { %1838 = vmatpush3.bf16.msra.mxu1 %v2029_v5 }
   0x6   :  { %1834 = vmatmul.mubr.msk.bf16.vlgmr.msra.gmra.mrb[0].mxu0 %vm54_vm2, %v45_v4  ;;  %1839 = vmatprep.subr.bf16.mxu1 %v2179_v2 }
   0x7   :  { %1857 = vmatprep.mubr.msk.bf16.mxu0 %vm2180_vm1, %v2179_v2 }
   0x9   :  { %1840 = vmatpush3.bf16.msra.mxu1 %v2030_v6 }
   0xa   :  { %1841 = vmatprep.subr.bf16.mxu1 %v2179_v2 }
   0xb   :  { %22 = vsyncpa [#allocation8], 0  ;;  %v2031_v7 = vld [vmem:[%s2685_s3 + $0x10] sm:$0xff]   ;;  %v2032_v8 = vld [vmem:[%s2685_s3 + $0x18] sm:$0xff]   ;;  %vm145_vm4 = vcmask 523264   ;;  %vm411_vm6 = vcmask 60416  }
   0xc   :  { %v2033_v9 = vld [vmem:[%s2687_s5] sm:$0xff]   ;;  %v2035_v10 = vld [vmem:[%s2687_s5 + $0x8] sm:$0xff]   ;;  %v2037_v22 = vld [vmem:[%s2687_s5 + $0x10] sm:$0xff]   ;;  %s2182_s16 = smov [#allocation2]  }
   0xd   :  { %1842 = vmatpush3.bf16.msra.mxu1 %v2031_v7  ;;  %1850 = vmatpush3.bf16.msra.mxu0 %v2033_v9  ;;  %v1581_v11 = vld [vmem:[%s2684_s2] ss:$0 sm:$0xff]  ;;  %v2036_v21 = vld [vmem:[%s2689_s7 + $0x8] sm:$0xff]   ;;  %v2038_v23 = vld [vmem:[%s2689_s7 + $0x10] sm:$0xff]  }
   0xe   :  { %1843 = vmatprep.subr.bf16.mxu1 %v2179_v2  ;;  %1851 = vmatprep.subr.bf16.mxu0 %v2179_v2  ;;  %v2034_v19 = vld [vmem:[%s2689_s7] sm:$0xff]   ;;  %v2039_v24 = vld [vmem:[%s2687_s5 + $0x18] sm:$0xff]   ;;  %v2042_v58 = vld [vmem:[%s2685_s3 + $0x28] sm:$0xff]  }
   0xf   :  { %v2040_v25 = vld [vmem:[%s2689_s7 + $0x18] sm:$0xff]   ;;  %v1583_v26 = vld [vmem:[%s2686_s4] ss:$0 sm:$0xff]  ;;  %v1602_v53 = vld [vmem:[%s2683_s1 + $0x4] sm:$0xf] }
  0x10   :  { %v363_v35 = vld [vmem:[%s2691_s9] sm:$0xf]  ;;  %v424_v56 = vsel %vm58_vm0, %v1602_v53, 0  ;;  %v2043_v59 = vld [vmem:[%s2685_s3 + $0x30] sm:$0xff]   ;;  %v2044_v60 = vld [vmem:[%s2685_s3 + $0x38] sm:$0xff]  }
  0x11   :  { %1844 = vmatpush3.bf16.msra.mxu1 %v2032_v8  ;;  %1852 = vmatpush3.bf16.msra.mxu0 %v2035_v10  ;;  %v368_v36 = vsel %vm58_vm0, %v363_v35, 0  ;;  %v1589_v37 = vld [vmem:[%s2688_s6] ss:$0 sm:$0xff]  ;;  %v2047_v62 = vld [vmem:[%s2687_s5 + $0x28] sm:$0xff]   ;;  %v1604_v5 = vld [vmem:[%s2684_s2 + $0x1] ss:$0 sm:$0xff] }
  0x12   :  { %1861 = vmatprep.subr.bf16.mxu1 %v2179_v2  ;;  %1853 = vmatprep.subr.bf16.mxu0 %v2179_v2  ;;  %v1595_v49 = vld [vmem:[%s2690_s8] ss:$0 sm:$0xff]  ;;  %v2055_v53 = vld [vmem:[%s2685_s3 + $0x50] sm:$0xff]  }
  0x13   :  { %v2041_v57 = vld [vmem:[%s2685_s3 + $0x20] sm:$0xff]  }
  0x14   :  { %v2045_v61 = vld [vmem:[%s2687_s5 + $0x20] sm:$0xff]  }
  0x15   :  { %1854 = vmatpush3.bf16.msra.mxu0 %v2037_v22 }
  0x16   :  { %1855 = vmatprep.subr.bf16.mxu0 %v2179_v2 }
  0x19   :  { %1856 = vmatpush3.bf16.msra.mxu0 %v2039_v24 }
  0x1a   :  { %1873 = vmatprep.subr.bf16.mxu0 %v2179_v2 }
  0xd9   :  { %v96_v12 = vpop.f32.mrb[0].mxu0 }
  0xda   :  { %v97_v13 = vadd.f32 %v1581_v11, %v96_v12  ;;  %v1835_v14 = vpop.f32.mrb[1].mxu0 }
  0xdb   :  { %v99_v15 = vpop.f32.mrb[2].mxu0 }
  0xdc   :  { %vm102_vm3 = vcmp.gt.f32.partialorder %v97_v13, 0.0  ;;  %v103_v16 = vmul.f32 0.2, %v97_v13  ;;  %v1836_v17 = vpop.f32.mrb[3].mxu0  ;;  %v2048_v15 = vld [vmem:[%s2689_s7 + $0x28] sm:$0xff]  }
  0xdd   :  { %v2050_v17 = vld [vmem:[%s2689_s7 + $0x30] sm:$0xff]  }
  0xde   :  { %v104_v18 = vsel %vm102_vm3, %v97_v13, %v103_v16  ;;  %v2046_v13 = vld [vmem:[%s2689_s7 + $0x20] sm:$0xff]   ;;  %v2049_v16 = vld [vmem:[%s2687_s5 + $0x30] sm:$0xff]  }
  0xdf   :  { %v105_v20 = vpack.c.bf16 %v104_v18, %v104_v18  ;;  %v2051_v18 = vld [vmem:[%s2687_s5 + $0x38] sm:$0xff]  }
  0xe1   :  { %1846 = vmatmul.mubr.msk.bf16.vlgmr.msra.gmra.mrb[0].mxu1 %vm145_vm4, %v105_v20  ;;  %v1615_v20 = vld [vmem:[%s2686_s4 + $0x1] ss:$0 sm:$0xff] }
  0xe2   :  { %1862 = vmatpush3.bf16.msra.mxu1 %v2034_v19  ;;  %1869 = vmatprep.mubr.msk.bf16.mxu1 %vm2180_vm1, %v2179_v2  ;;  %v2052_v19 = vld [vmem:[%s2689_s7 + $0x38] sm:$0xff]  }
  0xe3   :  { %1863 = vmatprep.subr.bf16.mxu1 %v2179_v2 }
  0xe6   :  { %1864 = vmatpush3.bf16.msra.mxu1 %v2036_v21 }
  0xe7   :  { %1865 = vmatprep.subr.bf16.mxu1 %v2179_v2 }
  0xea   :  { %1866 = vmatpush3.bf16.msra.mxu1 %v2038_v23 }
  0xeb   :  { %1867 = vmatprep.subr.bf16.mxu1 %v2179_v2 }
  0xee   :  { %1868 = vmatpush3.bf16.msra.mxu1 %v2040_v25 }
  0xef   :  { %1885 = vmatprep.subr.bf16.mxu1 %v2179_v2 }
 0x1b4   :  { %v183_v27 = vpop.f32.mrb[0].mxu1 }
 0x1b5   :  { %v184_v28 = vadd.f32 %v1583_v26, %v183_v27  ;;  %v1847_v29 = vpop.f32.mrb[1].mxu1 }
 0x1b6   :  { %v186_v30 = vpop.f32.mrb[2].mxu1  ;;  %v1651_v29 = vld [vmem:[%s2691_s9 + $0x4] sm:$0xf] }
 0x1b7   :  { %vm189_vm5 = vcmp.gt.f32.partialorder %v184_v28, 0.0  ;;  %v190_v31 = vmul.f32 0.2, %v184_v28  ;;  %v1848_v32 = vpop.f32.mrb[3].mxu1  ;;  %v738_v30 = vsel %vm58_vm0, %v1651_v29, 0 }
 0x1b9   :  { %v191_v33 = vsel %vm189_vm5, %v184_v28, %v190_v31  ;;  %v1630_v31 = vld [vmem:[%s2688_s6 + $0x1] ss:$0 sm:$0xff] }
 0x1ba   :  { %v192_v34 = vpack.c.bf16 %v191_v33, %v191_v33 }
 0x1bc   :  { %1858 = vmatmul.mubr.msk.bf16.vlgmr.msra.gmra.mrb[4].mxu0 %vm145_vm4, %v192_v34  ;;  %1870 = vmatmul.mubr.msk.bf16.vlgmr.msra.gmra.mrb[4].mxu1 %vm145_vm4, %v192_v34 }
 0x1bd   :  { %1875 = vmatprep.mubr.msk.bf16.mxu0 %vm2180_vm1, %v2179_v2  ;;  %1893 = vmatprep.mubr.msk.bf16.mxu1 %vm2180_vm1, %v2179_v2 }
 0x1be   :  { %1874 = vmatpush3.bf16.msra.mxu0 %v368_v36  ;;  %1886 = vmatpush3.bf16.msra.mxu1 %v2041_v57 }
 0x1bf   :  { %1879 = vmatprep.subr.bf16.mxu0 %v2179_v2  ;;  %1887 = vmatprep.subr.bf16.mxu1 %v2179_v2 }
 0x1c2   :  { %1888 = vmatpush3.bf16.msra.mxu1 %v2042_v58 }
 0x1c3   :  { %1889 = vmatprep.subr.bf16.mxu1 %v2179_v2 }
 0x1c6   :  { %1890 = vmatpush3.bf16.msra.mxu1 %v2043_v59 }
 0x1c7   :  { %1891 = vmatprep.subr.bf16.mxu1 %v2179_v2 }
 0x1ca   :  { %1892 = vmatpush3.bf16.msra.mxu1 %v2044_v60 }
 0x1cb   :  { %1909 = vmatprep.subr.bf16.mxu1 %v2179_v2 }
 0x28f   :  { %v269_v38 = vpop.f32.mrb[4].mxu0  ;;  %v348_v39 = vpop.f32.mrb[4].mxu1 }
 0x290   :  { %v270_v40 = vadd.f32 %v1589_v37, %v269_v38  ;;  %v1859_v41 = vpop.f32.mrb[5].mxu0  ;;  %v1871_v42 = vpop.f32.mrb[5].mxu1  ;;  %v349_v51 = vadd.f32 %v1595_v49, %v348_v39 }
 0x291   :  { %v272_v43 = vpop.f32.mrb[6].mxu0  ;;  %v351_v44 = vpop.f32.mrb[6].mxu1 }
 0x292   :  { %v354_v45 = vmul.f32 1.442695, %v270_v40  ;;  %v1860_v46 = vpop.f32.mrb[7].mxu0  ;;  %v1872_v47 = vpop.f32.mrb[7].mxu1  ;;  %v358_v48 = vsel %vm54_vm2, %v270_v40, 0.0 }
 0x293   :  { %359 = vadd.xlane.f32.xlu0 %v358_v48  ;;  %v1645_v43 = vld [vmem:[%s2690_s8 + $0x1] ss:$0 sm:$0xff]  ;;  %v1653_v47 = vld [vmem:[%s2683_s1 + $0x8] sm:$0xf] }
 0x294   :  { %2077 = vpow2.f32 %v354_v45 }
 0x29e   :  { %v2078_v50 = vpop.eup %2077 }
 0x29f   :  { %v356_v52 = vmul.f32 %v2078_v50, %v2266_v1  ;;  %v793_v50 = vsel %vm58_vm0, %v1653_v47, 0  ;;  %v2067_v47 = vld [vmem:[%s2685_s3 + $0x70] sm:$0xff]  }
 0x2a1   :  { %v2360_v54 = vadd.f32 %v356_v52, %v349_v51  ;;  %v2053_v51 = vld [vmem:[%s2685_s3 + $0x40] sm:$0xff]   ;;  %v2054_v52 = vld [vmem:[%s2685_s3 + $0x48] sm:$0xff]  }
 0x2a3   :  { %v362_v55 = vpack.c.bf16 %v2360_v54, %v2360_v54 }
 0x2a5   :  { %1876 = vmatmul.mubr.msk.bf16.vlgmr.msra.gmra.mrb[8].mxu0 %vm54_vm2, %v362_v55 }
 0x2a6   :  { %1880 = vmatpush3.bf16.msra.mxu0 %v424_v56  ;;  %1881 = vmatprep.mubr.msk.bf16.mxu0 %vm2180_vm1, %v2179_v2  ;;  %v2059_v56 = vld [vmem:[%s2687_s5 + $0x48] sm:$0xff]  }
 0x2a7   :  { %1897 = vmatprep.subr.bf16.mxu0 %v2179_v2 }
 0x2ad   :  { %1882 = vmatmul.mubr.msk.bf16.vlgmr.msra.gmra.mrb[12].mxu0 %vm54_vm2, %v362_v55  ;;  %v2057_v55 = vld [vmem:[%s2687_s5 + $0x40] sm:$0xff]  }
 0x2ae   :  { %1905 = vmatprep.mubr.msk.bf16.mxu0 %vm2180_vm1, %v2179_v2  ;;  %1898 = vmatpush3.bf16.msra.mxu0 %v2045_v61 }
 0x2af   :  { %1899 = vmatprep.subr.bf16.mxu0 %v2179_v2 }
 0x2b2   :  { %1900 = vmatpush3.bf16.msra.mxu0 %v2047_v62  ;;  %v1655_v62 = vld [vmem:[%s2684_s2 + $0x2] ss:$0 sm:$0xff] }
 0x2b3   :  { %1901 = vmatprep.subr.bf16.mxu0 %v2179_v2 }
 0x2b6   :  { %1902 = vmatpush3.bf16.msra.mxu0 %v2049_v16 }
 0x2b7   :  { %1903 = vmatprep.subr.bf16.mxu0 %v2179_v2 }
 0x2ba   :  { %1904 = vmatpush3.bf16.msra.mxu0 %v2051_v18 }
 0x2bb   :  { %1921 = vmatprep.subr.bf16.mxu0 %v2179_v2 }
 0x378   :  { %v404_v63 = vpop.f32.mrb[8].mxu0 }
 0x379   :  { %v410_v0 = vpack.c.bf16 %v404_v63, %v404_v63  ;;  %v1877_v1 = vpop.f32.mrb[9].mxu0 }
 0x37a   :  { %v407_v3 = vpop.f32.mrb[10].mxu0 }
 0x37b   :  { %v1878_v4 = vpop.f32.mrb[11].mxu0  ;;  %412 = vst.msk [vmem:[#allocation2] sm:$0xf] %vm411_vm6, %v410_v0 }
 0x380   :  { %v460_v6 = vpop.f32.mrb[12].mxu0 }
 0x381   :  { %v461_v7 = vadd.f32 %v1604_v5, %v460_v6  ;;  %v1883_v8 = vpop.f32.mrb[13].mxu0 }
 0x382   :  { %v463_v9 = vpop.f32.mrb[14].mxu0 }
 0x383   :  { %vm466_vm7 = vcmp.gt.f32.partialorder %v461_v7, 0.0  ;;  %v467_v10 = vmul.f32 0.2, %v461_v7  ;;  %v1884_v11 = vpop.f32.mrb[15].mxu0  ;;  %v2060_v9 = vld [vmem:[%s2689_s7 + $0x48] sm:$0xff]  }
 0x384   :  { %v2062_v11 = vld [vmem:[%s2689_s7 + $0x50] sm:$0xff]  }
 0x385   :  { %v468_v12 = vsel %vm466_vm7, %v461_v7, %v467_v10  ;;  %v2058_v7 = vld [vmem:[%s2689_s7 + $0x40] sm:$0xff]   ;;  %v2061_v10 = vld [vmem:[%s2687_s5 + $0x50] sm:$0xff]  }
 0x386   :  { %v469_v14 = vpack.c.bf16 %v468_v12, %v468_v12  ;;  %v2063_v12 = vld [vmem:[%s2687_s5 + $0x58] sm:$0xff]  }
 0x388   :  { %1894 = vmatmul.mubr.msk.bf16.vlgmr.msra.gmra.mrb[8].mxu1 %vm145_vm4, %v469_v14  ;;  %v1666_v14 = vld [vmem:[%s2686_s4 + $0x2] ss:$0 sm:$0xff] }
 0x389   :  { %1910 = vmatpush3.bf16.msra.mxu1 %v2046_v13  ;;  %1917 = vmatprep.mubr.msk.bf16.mxu1 %vm2180_vm1, %v2179_v2  ;;  %v2064_v13 = vld [vmem:[%s2689_s7 + $0x58] sm:$0xff]  }
 0x38a   :  { %1911 = vmatprep.subr.bf16.mxu1 %v2179_v2 }
 0x38d   :  { %1912 = vmatpush3.bf16.msra.mxu1 %v2048_v15 }
 0x38e   :  { %1913 = vmatprep.subr.bf16.mxu1 %v2179_v2 }
 0x391   :  { %1914 = vmatpush3.bf16.msra.mxu1 %v2050_v17 }
 0x392   :  { %1915 = vmatprep.subr.bf16.mxu1 %v2179_v2 }
 0x395   :  { %1916 = vmatpush3.bf16.msra.mxu1 %v2052_v19 }
 0x396   :  { %1933 = vmatprep.subr.bf16.mxu1 %v2179_v2 }
 0x45b   :  { %v548_v21 = vpop.f32.mrb[8].mxu1 }
 0x45c   :  { %v549_v22 = vadd.f32 %v1615_v20, %v548_v21  ;;  %v1895_v23 = vpop.f32.mrb[9].mxu1 }
 0x45d   :  { %v551_v24 = vpop.f32.mrb[10].mxu1  ;;  %v1702_v23 = vld [vmem:[%s2691_s9 + $0x8] sm:$0xf] }
 0x45e   :  { %vm554_vm8 = vcmp.gt.f32.partialorder %v549_v22, 0.0  ;;  %v555_v25 = vmul.f32 0.2, %v549_v22  ;;  %v1896_v26 = vpop.f32.mrb[11].mxu1  ;;  %v1107_v24 = vsel %vm58_vm0, %v1702_v23, 0 }
 0x460   :  { %v556_v27 = vsel %vm554_vm8, %v549_v22, %v555_v25  ;;  %v1681_v25 = vld [vmem:[%s2688_s6 + $0x2] ss:$0 sm:$0xff] }
 0x461   :  { %v557_v28 = vpack.c.bf16 %v556_v27, %v556_v27 }
 0x463   :  { %1906 = vmatmul.mubr.msk.bf16.vlgmr.msra.gmra.mrb[16].mxu0 %vm145_vm4, %v557_v28  ;;  %1918 = vmatmul.mubr.msk.bf16.vlgmr.msra.gmra.mrb[12].mxu1 %vm145_vm4, %v557_v28 }
 0x464   :  { %1923 = vmatprep.mubr.msk.bf16.mxu0 %vm2180_vm1, %v2179_v2  ;;  %1941 = vmatprep.mubr.msk.bf16.mxu1 %vm2180_vm1, %v2179_v2 }
 0x465   :  { %1922 = vmatpush3.bf16.msra.mxu0 %v738_v30  ;;  %1934 = vmatpush3.bf16.msra.mxu1 %v2053_v51 }
 0x466   :  { %1927 = vmatprep.subr.bf16.mxu0 %v2179_v2  ;;  %1935 = vmatprep.subr.bf16.mxu1 %v2179_v2 }
 0x469   :  { %1936 = vmatpush3.bf16.msra.mxu1 %v2054_v52 }
 0x46a   :  { %1937 = vmatprep.subr.bf16.mxu1 %v2179_v2 }
 0x46d   :  { %1938 = vmatpush3.bf16.msra.mxu1 %v2055_v53 }
 0x46e   :  { %1939 = vmatprep.subr.bf16.mxu1 %v2179_v2 }
 0x536   :  { %v636_v32 = vpop.f32.mrb[16].mxu0  ;;  %v717_v33 = vpop.f32.mrb[12].mxu1 }
 0x537   :  { %v637_v34 = vadd.f32 %v1630_v31, %v636_v32  ;;  %v1907_v35 = vpop.f32.mrb[17].mxu0  ;;  %v1919_v36 = vpop.f32.mrb[13].mxu1  ;;  %v718_v45 = vadd.f32 %v1645_v43, %v717_v33 }
 0x538   :  { %v639_v37 = vpop.f32.mrb[18].mxu0  ;;  %v720_v38 = vpop.f32.mrb[14].mxu1 }
 0x539   :  { %v723_v39 = vmul.f32 1.442695, %v637_v34  ;;  %v1908_v40 = vpop.f32.mrb[19].mxu0  ;;  %v1920_v41 = vpop.f32.mrb[15].mxu1  ;;  %v727_v42 = vsel %vm54_vm2, %v637_v34, 0.0 }
 0x53a   :  { %728 = vadd.xlane.f32.xlu0 %v727_v42  ;;  %v1696_v37 = vld [vmem:[%s2690_s8 + $0x2] ss:$0 sm:$0xff]  ;;  %v1704_v41 = vld [vmem:[%s2683_s1 + $0xc] sm:$0xf] }
 0x53b   :  { %2079 = vpow2.f32 %v723_v39 }
 0x545   :  { %v2080_v44 = vpop.eup %2079 }
 0x546   :  { %v725_v46 = vmul.f32 %v2080_v44, %v2360_v54  ;;  %v2056_v54 = vld [vmem:[%s2685_s3 + $0x58] sm:$0xff]   ;;  %v1162_v44 = vsel %vm58_vm0, %v1704_v41, 0 }
 0x547   :  { %1940 = vmatpush3.bf16.msra.mxu1 %v2056_v54 }
 0x548   :  { %v2452_v48 = vadd.f32 %v725_v46, %v718_v45  ;;  %1957 = vmatprep.subr.bf16.mxu1 %v2179_v2  ;;  %v2065_v45 = vld [vmem:[%s2685_s3 + $0x60] sm:$0xff]   ;;  %v2066_v46 = vld [vmem:[%s2685_s3 + $0x68] sm:$0xff]  }
 0x54a   :  { %v731_v49 = vpack.c.bf16 %v2452_v48, %v2452_v48 }
 0x54c   :  { %1924 = vmatmul.mubr.msk.bf16.vlgmr.msra.gmra.mrb[20].mxu0 %vm54_vm2, %v731_v49 }
 0x54d   :  { %1928 = vmatpush3.bf16.msra.mxu0 %v793_v50  ;;  %1929 = vmatprep.mubr.msk.bf16.mxu0 %vm2180_vm1, %v2179_v2  ;;  %v2071_v50 = vld [vmem:[%s2687_s5 + $0x68] sm:$0xff]  }
 0x54e   :  { %1945 = vmatprep.subr.bf16.mxu0 %v2179_v2 }
 0x554   :  { %1930 = vmatmul.mubr.msk.bf16.vlgmr.msra.gmra.mrb[24].mxu0 %vm54_vm2, %v731_v49  ;;  %v2069_v49 = vld [vmem:[%s2687_s5 + $0x60] sm:$0xff]  }
 0x555   :  { %1953 = vmatprep.mubr.msk.bf16.mxu0 %vm2180_vm1, %v2179_v2  ;;  %1946 = vmatpush3.bf16.msra.mxu0 %v2057_v55 }
 0x556   :  { %1947 = vmatprep.subr.bf16.mxu0 %v2179_v2 }
 0x559   :  { %1948 = vmatpush3.bf16.msra.mxu0 %v2059_v56  ;;  %v1706_v56 = vld [vmem:[%s2684_s2 + $0x3] ss:$0 sm:$0xff] }
 0x55a   :  { %1949 = vmatprep.subr.bf16.mxu0 %v2179_v2 }
 0x55d   :  { %1950 = vmatpush3.bf16.msra.mxu0 %v2061_v10 }
 0x55e   :  { %1951 = vmatprep.subr.bf16.mxu0 %v2179_v2 }
 0x561   :  { %1952 = vmatpush3.bf16.msra.mxu0 %v2063_v12 }
 0x562   :  { %1969 = vmatprep.subr.bf16.mxu0 %v2179_v2 }
 0x61f   :  { %v774_v57 = vpop.f32.mrb[20].mxu0 }
 0x620   :  { %v780_v58 = vpack.c.bf16 %v774_v57, %v774_v57  ;;  %v1925_v59 = vpop.f32.mrb[21].mxu0 }
 0x621   :  { %v777_v60 = vpop.f32.mrb[22].mxu0 }
 0x622   :  { %v1926_v61 = vpop.f32.mrb[23].mxu0  ;;  %781 = vst.msk [vmem:[#allocation4] sm:$0xf] %vm411_vm6, %v780_v58 }
 0x627   :  { %v829_v63 = vpop.f32.mrb[24].mxu0 }
 0x628   :  { %v830_v0 = vadd.f32 %v1655_v62, %v829_v63  ;;  %v1931_v1 = vpop.f32.mrb[25].mxu0 }
 0x629   :  { %v832_v3 = vpop.f32.mrb[26].mxu0 }
 0x62a   :  { %vm835_vm9 = vcmp.gt.f32.partialorder %v830_v0, 0.0  ;;  %v836_v4 = vmul.f32 0.2, %v830_v0  ;;  %v1932_v5 = vpop.f32.mrb[27].mxu0  ;;  %v2072_v3 = vld [vmem:[%s2689_s7 + $0x68] sm:$0xff]  }
 0x62b   :  { %v2074_v5 = vld [vmem:[%s2689_s7 + $0x70] sm:$0xff]  }
 0x62c   :  { %v837_v6 = vsel %vm835_vm9, %v830_v0, %v836_v4  ;;  %v2070_v0 = vld [vmem:[%s2689_s7 + $0x60] sm:$0xff]   ;;  %v2073_v4 = vld [vmem:[%s2687_s5 + $0x70] sm:$0xff]  }
 0x62d   :  { %v838_v8 = vpack.c.bf16 %v837_v6, %v837_v6  ;;  %v2075_v6 = vld [vmem:[%s2687_s5 + $0x78] sm:$0xff]  }
 0x62f   :  { %1942 = vmatmul.mubr.msk.bf16.vlgmr.msra.gmra.mrb[16].mxu1 %vm145_vm4, %v838_v8  ;;  %v1717_v8 = vld [vmem:[%s2686_s4 + $0x3] ss:$0 sm:$0xff] }
 0x630   :  { %1958 = vmatpush3.bf16.msra.mxu1 %v2058_v7  ;;  %1965 = vmatprep.mubr.msk.bf16.mxu1 %vm2180_vm1, %v2179_v2  ;;  %v2076_v7 = vld [vmem:[%s2689_s7 + $0x78] sm:$0xff]  }
 0x631   :  { %1959 = vmatprep.subr.bf16.mxu1 %v2179_v2 }
 0x634   :  { %1960 = vmatpush3.bf16.msra.mxu1 %v2060_v9 }
 0x635   :  { %1961 = vmatprep.subr.bf16.mxu1 %v2179_v2 }
 0x638   :  { %1962 = vmatpush3.bf16.msra.mxu1 %v2062_v11 }
 0x639   :  { %1963 = vmatprep.subr.bf16.mxu1 %v2179_v2 }
 0x63c   :  { %1964 = vmatpush3.bf16.msra.mxu1 %v2064_v13 }
 0x63d   :  { %1981 = vmatprep.subr.bf16.mxu1 %v2179_v2 }
 0x702   :  { %v917_v15 = vpop.f32.mrb[16].mxu1 }
 0x703   :  { %v918_v16 = vadd.f32 %v1666_v14, %v917_v15  ;;  %v1943_v17 = vpop.f32.mrb[17].mxu1 }
 0x704   :  { %v920_v18 = vpop.f32.mrb[18].mxu1  ;;  %v1753_v17 = vld [vmem:[%s2691_s9 + $0xc] sm:$0xf] }
 0x705   :  { %vm923_vm10 = vcmp.gt.f32.partialorder %v918_v16, 0.0  ;;  %v924_v19 = vmul.f32 0.2, %v918_v16  ;;  %v1944_v20 = vpop.f32.mrb[19].mxu1  ;;  %v1476_v18 = vsel %vm58_vm0, %v1753_v17, 0 }
 0x707   :  { %v925_v21 = vsel %vm923_vm10, %v918_v16, %v924_v19  ;;  %v1732_v19 = vld [vmem:[%s2688_s6 + $0x3] ss:$0 sm:$0xff]  ;;  %s2181_s6 = smov [#allocation4]  }
 0x708   :  { %v926_v22 = vpack.c.bf16 %v925_v21, %v925_v21  ;;  %s1538_s15 = sshll.u32 %s2181_s6, 4  ;;  %s1539_s15 = int_to_ptr.vmem [resolvable:$true] %s1538_s15 }
 0x709   :  { %s2085_s17 = scalar_lea.vmem %s1539_s15, 64  ;;  %p2090_p1 = scmp.lt.s32.totalorder %s1539_s15, %s1539_s15 }
 0x70a   :  { %1954 = vmatmul.mubr.msk.bf16.vlgmr.msra.gmra.mrb[28].mxu0 %vm145_vm4, %v926_v22  ;;  %1966 = vmatmul.mubr.msk.bf16.vlgmr.msra.gmra.mrb[20].mxu1 %vm145_vm4, %v926_v22  ;;  %p2086_p0 = scmp.ne.s32.totalorder %s1539_s15, %s2085_s17  ;;  %p2091_p2 = scmp.lt.s32.totalorder %s2085_s17, %s2085_s17 }
 0x70b   :  { %1971 = vmatprep.mubr.msk.bf16.mxu0 %vm2180_vm1, %v2179_v2  ;;  %1989 = vmatprep.mubr.msk.bf16.mxu1 %vm2180_vm1, %v2179_v2 }
 0x70c   :  { %1970 = vmatpush3.bf16.msra.mxu0 %v1107_v24  ;;  %1982 = vmatpush3.bf16.msra.mxu1 %v2065_v45  ;;  %p2092_p3 = por %p2091_p2, %p2090_p1 }
 0x70d   :  { %1975 = vmatprep.subr.bf16.mxu0 %v2179_v2  ;;  %1983 = vmatprep.subr.bf16.mxu1 %v2179_v2 }
 0x70e   :  { %p2093_p4 = pnand %p2092_p3, %p2086_p0 }
 0x710   :  { %1984 = vmatpush3.bf16.msra.mxu1 %v2066_v46 }
 0x711   :  { %1985 = vmatprep.subr.bf16.mxu1 %v2179_v2 }
 0x714   :  { %1986 = vmatpush3.bf16.msra.mxu1 %v2067_v47 }
 0x715   :  { %1987 = vmatprep.subr.bf16.mxu1 %v2179_v2 }
 0x7dd   :  { %v1005_v26 = vpop.f32.mrb[28].mxu0  ;;  %v1086_v27 = vpop.f32.mrb[20].mxu1 }
 0x7de   :  { %v1006_v28 = vadd.f32 %v1681_v25, %v1005_v26  ;;  %v1955_v29 = vpop.f32.mrb[29].mxu0  ;;  %v1967_v30 = vpop.f32.mrb[21].mxu1  ;;  %v1087_v39 = vadd.f32 %v1696_v37, %v1086_v27 }
 0x7df   :  { %v1008_v31 = vpop.f32.mrb[30].mxu0  ;;  %v1089_v32 = vpop.f32.mrb[22].mxu1  ;;  %v1747_v30 = vld [vmem:[%s2690_s8 + $0x3] ss:$0 sm:$0xff] }
 0x7e0   :  { %v1092_v33 = vmul.f32 1.442695, %v1006_v28  ;;  %v1956_v34 = vpop.f32.mrb[31].mxu0  ;;  %v1968_v35 = vpop.f32.mrb[23].mxu1  ;;  %v1096_v36 = vsel %vm54_vm2, %v1006_v28, 0.0 }
 0x7e1   :  { %1097 = vadd.xlane.f32.xlu1 %v1096_v36 }
 0x7e2   :  { %2081 = vpow2.f32 %v1092_v33 }
 0x7ec   :  { %v2082_v38 = vpop.eup %2081 }
 0x7ed   :  { %v1094_v40 = vmul.f32 %v2082_v38, %v2452_v48  ;;  %v2068_v48 = vld [vmem:[%s2685_s3 + $0x78] sm:$0xff]   ;;  %s1528_s3 = sshll.u32 %s2182_s16, 4  ;;  %s1529_s3 = int_to_ptr.vmem [resolvable:$true] %s1528_s3 }
 0x7ee   :  { %1988 = vmatpush3.bf16.msra.mxu1 %v2068_v48 }
 0x7ef   :  { %v2544_v42 = vadd.f32 %v1094_v40, %v1087_v39  ;;  %2005 = vmatprep.subr.bf16.mxu1 %v2179_v2 }
 0x7f1   :  { %v1100_v43 = vpack.c.bf16 %v2544_v42, %v2544_v42 }
 0x7f3   :  { %1972 = vmatmul.mubr.msk.bf16.vlgmr.msra.gmra.mrb[32].mxu0 %vm54_vm2, %v1100_v43 }
 0x7f4   :  { %1976 = vmatpush3.bf16.msra.mxu0 %v1162_v44  ;;  %1977 = vmatprep.mubr.msk.bf16.mxu0 %vm2180_vm1, %v2179_v2 }
 0x7f5   :  { %1993 = vmatprep.subr.bf16.mxu0 %v2179_v2 }
 0x7fb   :  { %1978 = vmatmul.mubr.msk.bf16.vlgmr.msra.gmra.mrb[36].mxu0 %vm54_vm2, %v1100_v43 }
 0x7fc   :  { %2001 = vmatprep.mubr.msk.bf16.mxu0 %vm2180_vm1, %v2179_v2  ;;  %1994 = vmatpush3.bf16.msra.mxu0 %v2069_v49 }
 0x7fd   :  { %1995 = vmatprep.subr.bf16.mxu0 %v2179_v2 }
 0x800   :  { %1996 = vmatpush3.bf16.msra.mxu0 %v2071_v50 }
 0x801   :  { %1997 = vmatprep.subr.bf16.mxu0 %v2179_v2 }
 0x804   :  { %1998 = vmatpush3.bf16.msra.mxu0 %v2073_v4 }
 0x805   :  { %1999 = vmatprep.subr.bf16.mxu0 %v2179_v2 }
 0x808   :  { %2000 = vmatpush3.bf16.msra.mxu0 %v2075_v6 }
 0x809   :  { %2017 = vmatprep.subr.bf16.mxu0 %v2179_v2 }
 0x8c6   :  { %v1143_v51 = vpop.f32.mrb[32].mxu0 }
 0x8c7   :  { %v1149_v52 = vpack.c.bf16 %v1143_v51, %v1143_v51  ;;  %v1973_v53 = vpop.f32.mrb[33].mxu0 }
 0x8c8   :  { %v1146_v54 = vpop.f32.mrb[34].mxu0 }
 0x8c9   :  { %v1974_v55 = vpop.f32.mrb[35].mxu0  ;;  %1150 = vst.msk [vmem:[#allocation6] sm:$0xf] %vm411_vm6, %v1149_v52 }
 0x8ce   :  { %v1198_v57 = vpop.f32.mrb[36].mxu0 }
 0x8cf   :  { %v1199_v58 = vadd.f32 %v1706_v56, %v1198_v57  ;;  %v1979_v59 = vpop.f32.mrb[37].mxu0 }
 0x8d0   :  { %v1201_v60 = vpop.f32.mrb[38].mxu0 }
 0x8d1   :  { %vm1204_vm11 = vcmp.gt.f32.partialorder %v1199_v58, 0.0  ;;  %v1205_v61 = vmul.f32 0.2, %v1199_v58  ;;  %v1980_v62 = vpop.f32.mrb[39].mxu0 }
 0x8d3   :  { %v1206_v63 = vsel %vm1204_vm11, %v1199_v58, %v1205_v61 }
 0x8d4   :  { %v1207_v1 = vpack.c.bf16 %v1206_v63, %v1206_v63 }
 0x8d6   :  { %1990 = vmatmul.mubr.msk.bf16.vlgmr.msra.gmra.mrb[24].mxu1 %vm145_vm4, %v1207_v1 }
 0x8d7   :  { %2006 = vmatpush3.bf16.msra.mxu1 %v2070_v0  ;;  %2013 = vmatprep.mubr.msk.bf16.mxu1 %vm2180_vm1, %v2179_v2 }
 0x8d8   :  { %2007 = vmatprep.subr.bf16.mxu1 %v2179_v2 }
 0x8db   :  { %2008 = vmatpush3.bf16.msra.mxu1 %v2072_v3 }
 0x8dc   :  { %2009 = vmatprep.subr.bf16.mxu1 %v2179_v2 }
 0x8df   :  { %2010 = vmatpush3.bf16.msra.mxu1 %v2074_v5 }
 0x8e0   :  { %2011 = vmatprep.subr.bf16.mxu1 %v2179_v2 }
 0x8e3   :  { %2012 = vmatpush3.bf16.msra.mxu1 %v2076_v7 }
 0x9a9   :  { %v1286_v9 = vpop.f32.mrb[24].mxu1 }
 0x9aa   :  { %v1287_v10 = vadd.f32 %v1717_v8, %v1286_v9  ;;  %v1991_v11 = vpop.f32.mrb[25].mxu1 }
 0x9ab   :  { %v1289_v12 = vpop.f32.mrb[26].mxu1 }
 0x9ac   :  { %vm1292_vm12 = vcmp.gt.f32.partialorder %v1287_v10, 0.0  ;;  %v1293_v13 = vmul.f32 0.2, %v1287_v10  ;;  %v1992_v14 = vpop.f32.mrb[27].mxu1 }
 0x9ae   :  { %v1294_v15 = vsel %vm1292_vm12, %v1287_v10, %v1293_v13 }
 0x9af   :  { %v1295_v16 = vpack.c.bf16 %v1294_v15, %v1294_v15 }
 0x9b1   :  { %2002 = vmatmul.mubr.msk.bf16.vlgmr.msra.gmra.mrb[40].mxu0 %vm145_vm4, %v1295_v16  ;;  %2014 = vmatmul.mubr.msk.bf16.vlgmr.msra.gmra.mrb[28].mxu1 %vm145_vm4, %v1295_v16 }
 0x9b2   :  { %2019 = vmatprep.mubr.msk.bf16.mxu0 %vm2180_vm1, %v2179_v2  ;;  %2018 = vmatpush3.bf16.msra.mxu0 %v1476_v18 }
 0xa84   :  { %v1374_v20 = vpop.f32.mrb[40].mxu0  ;;  %v1455_v21 = vpop.f32.mrb[28].mxu1 }
 0xa85   :  { %v1375_v22 = vadd.f32 %v1732_v19, %v1374_v20  ;;  %v2003_v23 = vpop.f32.mrb[41].mxu0  ;;  %v2015_v24 = vpop.f32.mrb[29].mxu1  ;;  %v1456_v32 = vadd.f32 %v1747_v30, %v1455_v21 }
 0xa86   :  { %v1377_v25 = vpop.f32.mrb[42].mxu0  ;;  %v1458_v26 = vpop.f32.mrb[30].mxu1 }
 0xa87   :  { %v1461_v27 = vmul.f32 1.442695, %v1375_v22  ;;  %v2004_v2 = vpop.f32.mrb[43].mxu0  ;;  %v2016_v28 = vpop.f32.mrb[31].mxu1  ;;  %v1465_v29 = vsel %vm54_vm2, %v1375_v22, 0.0 }
 0xa88   :  { %1466 = vadd.xlane.f32.xlu1 %v1465_v29 }
 0xa89   :  { %2083 = vpow2.f32 %v1461_v27 }
 0xa93   :  { %v2084_v31 = vpop.eup %2083 }
 0xa94   :  { %v1463_v33 = vmul.f32 %v2084_v31, %v2544_v42 }
 0xa96   :  { %v1464_v34 = vadd.f32 %v1463_v33, %v1456_v32 }
 0xa98   :  { %v1469_v35 = vpack.c.bf16 %v1464_v34, %v1464_v34 }
 0xa9a   :  { %2020 = vmatmul.mubr.msk.bf16.vlgmr.msra.gmra.mrb[44].mxu0 %vm54_vm2, %v1469_v35 }
 0xa9b   :  { %2096 = shalt.err (!%p2093_p4)
}
 0xa9c   :  { %s2097_s0 = scalar_lea.hbm %s2693_s11, 64 }
 0xa9d   :  { %p2098_p5 = scmp.ne.s32.totalorder %s2693_s11, %s2097_s0  ;;  %p2101_p6 = scmp.lt.u32.totalorder %s2097_s0, %s2693_s11 }
 0xa9f   :  { %p2103_p7 = pnand %p2101_p6, %p2098_p5 }
 0xaa1   :  { %2106 = shalt.err (!%p2103_p7)
}
 0xaa2   :  { %1541 = dma.vmem_to_hbm [thread:$0]  %s1539_s15, 64, %s2693_s11, [#allocation5]  }
 0xaa3   :  { %s2107_s23 = scalar_lea.vmem %s1529_s3, 64  ;;  %p2112_p9 = scmp.lt.s32.totalorder %s1529_s3, %s1529_s3 }
 0xaa4   :  { %p2108_p8 = scmp.ne.s32.totalorder %s1529_s3, %s2107_s23  ;;  %p2113_p10 = scmp.lt.s32.totalorder %s2107_s23, %s2107_s23 }
 0xaa6   :  { %p2114_p11 = por %p2113_p10, %p2112_p9 }
 0xaa8   :  { %p2115_p12 = pnand %p2114_p11, %p2108_p8 }
 0xaaa   :  { %2118 = shalt.err (!%p2115_p12)
}
 0xaab   :  { %s2119_s26 = scalar_lea.hbm %s2692_s10, 64 }
 0xaac   :  { %p2120_p13 = scmp.ne.s32.totalorder %s2692_s10, %s2119_s26  ;;  %p2123_p0 = scmp.lt.u32.totalorder %s2119_s26, %s2692_s10 }
 0xaae   :  { %p2125_p1 = pnand %p2123_p0, %p2120_p13 }
 0xab0   :  { %2128 = shalt.err (!%p2125_p1)
}
 0xab1   :  { %1531 = dma.vmem_to_hbm [thread:$0]  %s1529_s3, 64, %s2692_s10, [#allocation3]  }
 0xab2   :  { %s2183_s29 = smov [#allocation6]  }
 0xab3   :  { %s1548_s9 = sshll.u32 %s2183_s29, 4  ;;  %s1549_s9 = int_to_ptr.vmem [resolvable:$true] %s1548_s9 }
 0xab4   :  { %s2129_s30 = scalar_lea.vmem %s1549_s9, 64  ;;  %p2134_p3 = scmp.lt.s32.totalorder %s1549_s9, %s1549_s9 }
 0xab5   :  { %p2130_p2 = scmp.ne.s32.totalorder %s1549_s9, %s2129_s30  ;;  %p2135_p4 = scmp.lt.s32.totalorder %s2129_s30, %s2129_s30 }
 0xab7   :  { %p2136_p5 = por %p2135_p4, %p2134_p3 }
 0xab9   :  { %p2137_p6 = pnand %p2136_p5, %p2130_p2 }
 0xabb   :  { %2140 = shalt.err (!%p2137_p6)
}
 0xabc   :  { %s2141_s16 = scalar_lea.hbm %s2694_s12, 64 }
 0xabd   :  { %p2142_p7 = scmp.ne.s32.totalorder %s2694_s12, %s2141_s16  ;;  %p2145_p8 = scmp.lt.u32.totalorder %s2141_s16, %s2694_s12 }
 0xabf   :  { %p2147_p9 = pnand %p2145_p8, %p2142_p7 }
 0xac1   :  { %2150 = shalt.err (!%p2147_p9)
}
 0xac2   :  { %1551 = dma.vmem_to_hbm [thread:$0]  %s1549_s9, 64, %s2694_s12, [#allocation5]   ;;  %v360_v36 = vpop.xlane.xlu0 %359  ;;  %v1098_v38 = vpop.xlane.xlu1 %1097  ;;  %vm1520_vm13 = vcmask 7168  }
 0xac3   :  { %s2184_s2 = smov [#allocation7]  }
 0xac4   :  { %s1558_s21 = sshll.u32 %s2184_s2, 4  ;;  %s1559_s21 = int_to_ptr.vmem [resolvable:$true] %s1558_s21 }
 0xac5   :  { %s2151_s12 = scalar_lea.vmem %s1559_s21, 64  ;;  %p2156_p11 = scmp.lt.s32.totalorder %s1559_s21, %s1559_s21 }
 0xac6   :  { %v729_v37 = vpop.xlane.xlu0 %728  ;;  %p2152_p10 = scmp.ne.s32.totalorder %s1559_s21, %s2151_s12  ;;  %p2157_p12 = scmp.lt.s32.totalorder %s2151_s12, %s2151_s12 }
 0xac7   :  { %v730_v39 = vadd.f32 %v729_v37, %v360_v36 }
 0xac8   :  { %p2158_p13 = por %p2157_p12, %p2156_p11 }
 0xac9   :  { %v1099_v40 = vadd.f32 %v1098_v38, %v730_v39 }
 0xaca   :  { %p2159_p0 = pnand %p2158_p13, %p2152_p10 }
 0xb15   :  { %v1467_v41 = vpop.xlane.xlu1 %1466 }
 0xb16   :  { %v1468_v42 = vadd.f32 %v1467_v41, %v1099_v40 }
 0xb18   :  { %1521 = vst.msk [vmem:[%s2696_s14] sm:$0xff] %vm1520_vm13, %v1468_v42 }
 0xb6d   :  { %v1512_v43 = vpop.f32.mrb[44].mxu0 }
 0xb6e   :  { %v1518_v44 = vpack.c.bf16 %v1512_v43, %v1512_v43  ;;  %v2021_v45 = vpop.f32.mrb[45].mxu0 }
 0xb6f   :  { %v1515_v46 = vpop.f32.mrb[46].mxu0 }
 0xb70   :  { %v2022_v47 = vpop.f32.mrb[47].mxu0  ;;  %1519 = vst.msk [vmem:[#allocation7] sm:$0xf] %vm411_vm6, %v1518_v44 }
 0xb71   :  { %2162 = shalt.err (!%p2159_p0)
}
 0xb72   :  { %s2163_s14 = scalar_lea.hbm %s2695_s13, 64 }
 0xb73   :  { %p2164_p1 = scmp.ne.s32.totalorder %s2695_s13, %s2163_s14  ;;  %p2167_p2 = scmp.lt.u32.totalorder %s2163_s14, %s2695_s13 }
 0xb75   :  { %p2169_p3 = pnand %p2167_p2, %p2164_p1 }
 0xb77   :  { %2172 = shalt.err (!%p2169_p3)
}
 0xb78   :  { %1561 = dma.vmem_to_hbm [thread:$0]  %s1559_s21, 64, %s2695_s13, [#allocation8]  }
 0xb79   :  { %2173 = dma.done.wait [#allocation3], 64  }
 0xb7a   :  { %2174 = vsyncadd [#allocation3], 4294967232 }
 0xb7b   :  { %2175 = dma.done.wait [#allocation5], 128  }
 0xb7c   :  { %2176 = vsyncadd [#allocation5], 4294967168 }
 0xb7d   :  { %2177 = dma.done.wait [#allocation8], 64  }
 0xb7e   :  { %2178 = vsyncadd [#allocation8], 4294967232 }
 0xb7f   :  { %1578 = vsyncpa [#allocation3], 1 }
 0xb80   :  { %1579 = vsyncpa [#allocation5], 1 }
 0xb81   :  { %1580 = vsyncpa [#allocation8], 1 }

</bundles_post_ra>
